<compile_context>
chip_gen: v6e
topology: v6e:2x2x1
jax: 0.10.0
libtpu: 0.0.40
codegen_flags: <defaults>
</compile_context>

<pallas_src>
import math
import numpy as np
import jax
import jax.numpy as jnp
from jax.experimental import pallas as pl
from jax.experimental.pallas import tpu as pltpu

# ----------------- config (consistent with the Eva module, small shapes) ---------------
EMBED_DIM = 48
DEPTH = 2
NUM_HEADS = 4
HEAD_DIM = EMBED_DIM // NUM_HEADS                 # 12
MLP_RATIO = 4 * 2 / 3                             # EVA02 default
HIDDEN_DIM = int(EMBED_DIM * MLP_RATIO)           # 128
REF_FEAT_SHAPE = (2, 2, 2)                        # 3D feature grid
NUM_PATCHES = int(np.prod(REF_FEAT_SHAPE))        # 8
BATCH = 2
BN = BATCH * NUM_PATCHES                          # 16 tokens total (batch folded in)
LN_EPS = 1e-5                                     # torch.nn.LayerNorm default
LANE = 128

# ---------------- small-params slab layout (128-lane slots, BN rows each) ---------------
SLOT_POS, SLOT_COS, SLOT_SIN, SLOT_FINW, SLOT_FINB = 0, 1, 2, 3, 4
OFF_LN1W, OFF_LN1B, OFF_BQKV, OFF_BO, OFF_LN2W, OFF_LN2B = 0, 1, 2, 4, 5, 6
OFF_BM1, OFF_LNMW, OFF_LNMB, OFF_BM2 = 7, 9, 10, 11
SLOTS_PER_LAYER = 12
N_SLOTS = 5 + SLOTS_PER_LAYER * DEPTH


def _layer_base(l):
    return 5 + l * SLOTS_PER_LAYER


# -------------------------------------- kernel ------------------------------------------
def eva_fused_kernel(x_ref, wqkv_ref, wo_ref, wm1_ref, wm2_ref, small_ref, o_ref):
    f32 = jnp.float32
    bf16 = jnp.bfloat16
    D, Hd, H, HID = EMBED_DIM, HEAD_DIM, NUM_HEADS, HIDDEN_DIM
    B, N = BATCH, NUM_PATCHES

    def slab(slot, width):
        c = slot * LANE                       # lane offset is a multiple of 128 -> no rotate
        return small_ref[:, c:c + width]      # (BN, width), already broadcast to BN rows

    def layernorm(v, w, b):
        mu = jnp.mean(v, axis=-1, keepdims=True)
        var = jnp.mean(jnp.square(v - mu), axis=-1, keepdims=True)
        return (v - mu) * jax.lax.rsqrt(var + LN_EPS) * w + b

    # abs pos embed add (pos_drop is identity at p=0)
    x = x_ref[...].astype(f32) + slab(SLOT_POS, D)
    cos = slab(SLOT_COS, Hd)                  # (BN, Hd): identical rope for every head
    sin = slab(SLOT_SIN, Hd)

    for l in range(DEPTH):                    # DEPTH=2 -> fully unrolled, weights stay in VMEM
        base = _layer_base(l)

        # ------------------------------- attention ------------------------------------
        xn = layernorm(x, slab(base + OFF_LN1W, D), slab(base + OFF_LN1B, D))
        # fused head-major [q | rot(q) | k | rot(k) | v] projection; attn scale folded in q
        qkv = jnp.dot(xn.astype(bf16), wqkv_ref[l],
                      preferred_element_type=f32) + slab(base + OFF_BQKV, 5 * D)   # (BN, 5D)

        attn = None
        for h in range(H):
            w0 = h * 5 * Hd                   # this head's contiguous lane window
            # apply_rot_embed_cat: x*cos + rot(x)*sin (rot via the fused @R columns)
            q = qkv[:, w0 + 0 * Hd:w0 + 1 * Hd] * cos + qkv[:, w0 + 1 * Hd:w0 + 2 * Hd] * sin
            k = qkv[:, w0 + 2 * Hd:w0 + 3 * Hd] * cos + qkv[:, w0 + 3 * Hd:w0 + 4 * Hd] * sin
            v = qkv[:, w0 + 4 * Hd:w0 + 5 * Hd]

            q3 = q.reshape(B, N, Hd).astype(bf16)
            k3 = k.reshape(B, N, Hd).astype(bf16)
            v3 = v.reshape(B, N, Hd).astype(bf16)

            s = jnp.einsum('bqd,bkd->bqk', q3, k3, preferred_element_type=f32)     # (B, N, N)
            s = s - jnp.max(s, axis=-1, keepdims=True)
            p = jnp.exp(s)
            p = p * pl.reciprocal(jnp.sum(p, axis=-1, keepdims=True), approx=True)
            oh = jnp.einsum('bqk,bkd->bqd', p.astype(bf16), v3,
                            preferred_element_type=f32)                            # (B, N, Hd)

            # per-head output projection accumulated in registers (no VMEM scratch)
            contrib = jnp.dot(oh.reshape(B * N, Hd).astype(bf16), wo_ref[l * H + h],
                              preferred_element_type=f32)                          # (BN, D)
            attn = contrib if attn is None else attn + contrib

        x = x + attn + slab(base + OFF_BO, D)

        # --------------------------- SwiGLU MLP (scale-norm) ---------------------------
        xn2 = layernorm(x, slab(base + OFF_LN2W, D), slab(base + OFF_LN2B, D))
        gu = jnp.dot(xn2.astype(bf16), wm1_ref[l],
                     preferred_element_type=f32) + slab(base + OFF_BM1, 2 * HID)   # (BN, 2H)
        g = gu[:, 0:HID]
        u = gu[:, HID:2 * HID]
        a = (g * jax.nn.sigmoid(g)) * u                                            # SiLU(gate)*x
        a = layernorm(a, slab(base + OFF_LNMW, HID), slab(base + OFF_LNMB, HID))
        mlp = jnp.dot(a.astype(bf16), wm2_ref[l],
                      preferred_element_type=f32) + slab(base + OFF_BM2, D)
        x = x + mlp

    o_ref[...] = layernorm(x, slab(SLOT_FINW, D), slab(SLOT_FINB, D)).astype(o_ref.dtype)


# -------------------------------------- wrapper -----------------------------------------
def eva_forward(x, w_qkv, w_o, w_m1, w_m2, small):
    B, N, D = x.shape
    vmem = pl.BlockSpec(memory_space=pltpu.MemorySpace.VMEM)
    out2d = pl.pallas_call(
        eva_fused_kernel,
        out_shape=jax.ShapeDtypeStruct((B * N, D), x.dtype),
        in_specs=[vmem] * 6,
        out_specs=vmem,
        compiler_params=pltpu.CompilerParams(vmem_limit_bytes=32 * 1024 * 1024),
    )(x.reshape(B * N, D), w_qkv, w_o, w_m1, w_m2, small)
    # (features, keep_indices): patch_drop is None -> keep_indices is None
    return out2d.reshape(B, N, D), None


# --------------------------- parameter / buffer setup ------------------------------------
def trunc_normal(key, shape, std=0.02):
    return std * jax.random.truncated_normal(key, -2.0, 2.0, shape, jnp.float32)


def init_block(key, layer_id):
    ks = jax.random.split(key, 7)
    p = {}
    p['ln1_w'] = jnp.ones((1, EMBED_DIM), jnp.float32)
    p['ln1_b'] = jnp.zeros((1, EMBED_DIM), jnp.float32)
    p['wq'] = trunc_normal(ks[0], (EMBED_DIM, EMBED_DIM))
    p['bq'] = jnp.zeros((1, EMBED_DIM), jnp.float32)
    p['wk'] = trunc_normal(ks[1], (EMBED_DIM, EMBED_DIM))     # k_proj has no bias
    p['wv'] = trunc_normal(ks[2], (EMBED_DIM, EMBED_DIM))
    p['bv'] = jnp.zeros((1, EMBED_DIM), jnp.float32)
    # fix_init_weight(): attn.proj.weight and mlp.fc2.weight divided by sqrt(2*layer_id)
    p['wo'] = trunc_normal(ks[3], (EMBED_DIM, EMBED_DIM)) / math.sqrt(2.0 * layer_id)
    p['bo'] = jnp.zeros((1, EMBED_DIM), jnp.float32)
    p['ln2_w'] = jnp.ones((1, EMBED_DIM), jnp.float32)
    p['ln2_b'] = jnp.zeros((1, EMBED_DIM), jnp.float32)
    p['w1g'] = trunc_normal(ks[4], (EMBED_DIM, HIDDEN_DIM))
    p['b1g'] = jnp.zeros((1, HIDDEN_DIM), jnp.float32)
    p['w1x'] = trunc_normal(ks[5], (EMBED_DIM, HIDDEN_DIM))
    p['b1x'] = jnp.zeros((1, HIDDEN_DIM), jnp.float32)
    p['lnm_w'] = jnp.ones((1, HIDDEN_DIM), jnp.float32)
    p['lnm_b'] = jnp.zeros((1, HIDDEN_DIM), jnp.float32)
    p['w2'] = trunc_normal(ks[6], (HIDDEN_DIM, EMBED_DIM)) / math.sqrt(2.0 * layer_id)
    p['b2'] = jnp.zeros((1, EMBED_DIM), jnp.float32)
    return p


def build_rope():
    # RotaryEmbeddingCat(in_pixels=False, feat_shape=ref_feat_shape, ref_feat_shape=ref_feat_shape)
    rope_dim = round(HEAD_DIM / 1.5)
    assert rope_dim == HEAD_DIM / 1.5, 'rope dim must be divisible by (num_heads * 1.5)'
    assert rope_dim % 4 == 0, 'rope dim must be divisible by 4'
    num_bands = rope_dim // 4
    exp = np.arange(num_bands, dtype=np.float64) / num_bands
    bands = 1.0 / (10000.0 ** exp)                                      # freq_bands(step=1)
    t = [np.arange(s, dtype=np.float64) for s in REF_FEAT_SHAPE]        # ref == feat -> no rescale
    grid = np.stack(np.meshgrid(*t, indexing='ij'), axis=-1)            # (*shape, 3)
    pos = grid[..., None] * bands                                       # (*shape, 3, nb)
    sin = np.repeat(np.sin(pos).reshape(NUM_PATCHES, -1), 2, axis=-1)   # (N, head_dim)
    cos = np.repeat(np.cos(pos).reshape(NUM_PATCHES, -1), 2, axis=-1)   # (N, head_dim)
    # rot(x): [x0,x1,x2,x3,...] -> [-x1,x0,-x3,x2,...] expressed as x @ Rh (per-head block)
    Rh = np.zeros((HEAD_DIM, HEAD_DIM), np.float32)
    for i in range(HEAD_DIM // 2):
        Rh[2 * i, 2 * i + 1] = 1.0
        Rh[2 * i + 1, 2 * i] = -1.0
    return cos.astype(np.float32), sin.astype(np.float32), Rh


def pack_weights(blocks, Rh):
    """Fuse + stack per-layer MXU weights into 4 bf16 slabs (head-major QKV packing)."""
    scale = HEAD_DIM ** -0.5
    Rh = jnp.asarray(Rh)
    wqkv, wo, wm1, wm2 = [], [], [], []
    for p in blocks:
        wq_s = p['wq'] * scale      # fold attention scale into q (exact: rope is linear)
        cols = []
        for h in range(NUM_HEADS):
            sl = slice(h * HEAD_DIM, (h + 1) * HEAD_DIM)
            cols += [wq_s[:, sl], wq_s[:, sl] @ Rh,
                     p['wk'][:, sl], p['wk'][:, sl] @ Rh,
                     p['wv'][:, sl]]
        wqkv.append(jnp.concatenate(cols, axis=1))                        # (D, 5D) head-major
        for h in range(NUM_HEADS):                                        # output proj, per head
            wo.append(p['wo'][h * HEAD_DIM:(h + 1) * HEAD_DIM, :])        # (Hd, D)
        wm1.append(jnp.concatenate([p['w1g'], p['w1x']], axis=1))         # (D, 2H)
        wm2.append(p['w2'])                                               # (H, D)
    w_qkv = jnp.stack(wqkv).astype(jnp.bfloat16)                          # (L, D, 5D)
    w_o = jnp.stack(wo).astype(jnp.bfloat16)                              # (L*H, Hd, D)
    w_m1 = jnp.stack(wm1).astype(jnp.bfloat16)                            # (L, D, 2H)
    w_m2 = jnp.stack(wm2).astype(jnp.bfloat16)                            # (L, H, D)
    return w_qkv, w_o, w_m1, w_m2


def pack_small(blocks, fin_w, fin_b, pos_embed, cos, sin, Rh):
    """One f32 slab with every bias / LN param / pos / rope table, pre-broadcast to BN rows
    and placed in 128-lane slots (all kernel slices land on vreg-aligned lane offsets)."""
    scale = HEAD_DIM ** -0.5
    slab = np.zeros((BN, N_SLOTS * LANE), np.float32)

    def put(slot, arr):
        arr = np.asarray(arr, np.float32)
        if arr.ndim == 1:
            arr = arr[None, :]
        if arr.shape[0] == 1:
            arr = np.broadcast_to(arr, (BN, arr.shape[1]))
        slab[:, slot * LANE: slot * LANE + arr.shape[1]] = arr

    pos_bn = np.tile(np.asarray(pos_embed, np.float32).reshape(NUM_PATCHES, EMBED_DIM),
                     (BATCH, 1))
    put(SLOT_POS, pos_bn)
    put(SLOT_COS, np.tile(cos, (BATCH, 1)))
    put(SLOT_SIN, np.tile(sin, (BATCH, 1)))
    put(SLOT_FINW, fin_w)
    put(SLOT_FINB, fin_b)

    for l, p in enumerate(blocks):
        base = _layer_base(l)
        bq_s = np.asarray(p['bq'], np.float32) * scale
        bv = np.asarray(p['bv'], np.float32)
        zero = np.zeros((1, HEAD_DIM), np.float32)
        cols = []
        for h in range(NUM_HEADS):
            sl = slice(h * HEAD_DIM, (h + 1) * HEAD_DIM)
            cols += [bq_s[:, sl], bq_s[:, sl] @ Rh, zero, zero, bv[:, sl]]
        put(base + OFF_LN1W, p['ln1_w'])
        put(base + OFF_LN1B, p['ln1_b'])
        put(base + OFF_BQKV, np.concatenate(cols, axis=1))                 # (1, 5D) head-major
        put(base + OFF_BO, p['bo'])
        put(base + OFF_LN2W, p['ln2_w'])
        put(base + OFF_LN2B, p['ln2_b'])
        put(base + OFF_BM1, np.concatenate([np.asarray(p['b1g'], np.float32),
                                            np.asarray(p['b1x'], np.float32)], axis=1))
        put(base + OFF_LNMW, p['lnm_w'])
        put(base + OFF_LNMB, p['lnm_b'])
        put(base + OFF_BM2, p['b2'])
    return jnp.asarray(slab)


# ------------------------------------- end-to-end ----------------------------------------
if __name__ == "__main__":
    key = jax.random.PRNGKey(0)
    kx, kpos, kparams = jax.random.split(key, 3)

    x = jax.random.normal(kx, (BATCH, NUM_PATCHES, EMBED_DIM), jnp.float32)
    pos_embed = trunc_normal(kpos, (1, NUM_PATCHES, EMBED_DIM), std=0.02)

    block_keys = jax.random.split(kparams, DEPTH)
    blocks = [init_block(block_keys[i], i + 1) for i in range(DEPTH)]
    fin_w = jnp.ones((1, EMBED_DIM), jnp.float32)
    fin_b = jnp.zeros((1, EMBED_DIM), jnp.float32)

    cos, sin, Rh = build_rope()
    w_qkv, w_o, w_m1, w_m2 = pack_weights(blocks, Rh)
    small = pack_small(blocks, fin_w, fin_b, pos_embed, cos, sin, Rh)

    out, keep_indices = eva_forward(x, w_qkv, w_o, w_m1, w_m2, small)
    out = jax.block_until_ready(out)

    assert out.shape == (BATCH, NUM_PATCHES, EMBED_DIM)
    assert keep_indices is None
    assert bool(jnp.all(jnp.isfinite(out)))
    print("KERNEL_OK")
</pallas_src>

<mosaic_0001>
module attributes {stable_mosaic.version = 11 : i64} {
  func.func @eva_fused_kernel(%arg0: memref<16x48xf32, #tpu.memory_space<vmem>>, %arg1: memref<2x48x240xbf16, #tpu.memory_space<vmem>>, %arg2: memref<8x12x48xbf16, #tpu.memory_space<vmem>>, %arg3: memref<2x48x256xbf16, #tpu.memory_space<vmem>>, %arg4: memref<2x128x48xbf16, #tpu.memory_space<vmem>>, %arg5: memref<16x3712xf32, #tpu.memory_space<vmem>>, %arg6: memref<16x48xf32, #tpu.memory_space<vmem>>) attributes {dimension_semantics = [], scalar_prefetch = 0 : i64, scratch_operands = 0 : i64, tpu.core_type = #tpu.core_type<tc>} {
    %c0 = arith.constant 0 : index
    %c0_0 = arith.constant 0 : index
    %0 = vector.load %arg0[%c0, %c0_0] : memref<16x48xf32, #tpu.memory_space<vmem>>, vector<16x48xf32>
    %c0_1 = arith.constant 0 : index
    %c0_2 = arith.constant 0 : index
    %1 = vector.load %arg5[%c0_1, %c0_2] : memref<16x3712xf32, #tpu.memory_space<vmem>>, vector<16x48xf32>
    %2 = arith.addf %0, %1 : vector<16x48xf32>
    %c0_3 = arith.constant 0 : index
    %c128 = arith.constant 128 : index
    %3 = vector.load %arg5[%c0_3, %c128] : memref<16x3712xf32, #tpu.memory_space<vmem>>, vector<16x12xf32>
    %c0_4 = arith.constant 0 : index
    %c256 = arith.constant 256 : index
    %4 = vector.load %arg5[%c0_4, %c256] : memref<16x3712xf32, #tpu.memory_space<vmem>>, vector<16x12xf32>
    %c0_5 = arith.constant 0 : index
    %c640 = arith.constant 640 : index
    %5 = vector.load %arg5[%c0_5, %c640] : memref<16x3712xf32, #tpu.memory_space<vmem>>, vector<16x48xf32>
    %c0_6 = arith.constant 0 : index
    %c768 = arith.constant 768 : index
    %6 = vector.load %arg5[%c0_6, %c768] : memref<16x3712xf32, #tpu.memory_space<vmem>>, vector<16x48xf32>
    %cst = arith.constant dense<0.000000e+00> : vector<16xf32>
    %7 = vector.multi_reduction <add>, %2, %cst [1] : vector<16x48xf32> to vector<16xf32>
    %8 = vector.shape_cast %7 : vector<16xf32> to vector<16x1xf32>
    %cst_7 = arith.constant 4.800000e+01 : f32
    %9 = vector.broadcast %cst_7 : f32 to vector<16x1xf32>
    %10 = arith.divf %8, %9 : vector<16x1xf32>
    %11 = vector.broadcast %10 : vector<16x1xf32> to vector<16x48xf32>
    %12 = arith.subf %2, %11 : vector<16x48xf32>
    %13 = arith.mulf %12, %12 : vector<16x48xf32>
    %cst_8 = arith.constant dense<0.000000e+00> : vector<16xf32>
    %14 = vector.multi_reduction <add>, %13, %cst_8 [1] : vector<16x48xf32> to vector<16xf32>
    %15 = vector.shape_cast %14 : vector<16xf32> to vector<16x1xf32>
    %cst_9 = arith.constant 4.800000e+01 : f32
    %16 = vector.broadcast %cst_9 : f32 to vector<16x1xf32>
    %17 = arith.divf %15, %16 : vector<16x1xf32>
    %18 = vector.broadcast %10 : vector<16x1xf32> to vector<16x48xf32>
    %19 = arith.subf %2, %18 : vector<16x48xf32>
    %cst_10 = arith.constant 9.99999974E-6 : f32
    %20 = vector.broadcast %cst_10 : f32 to vector<16x1xf32>
    %21 = arith.addf %17, %20 : vector<16x1xf32>
    %22 = math.rsqrt %21 : vector<16x1xf32>
    %23 = vector.broadcast %22 : vector<16x1xf32> to vector<16x48xf32>
    %24 = arith.mulf %19, %23 : vector<16x48xf32>
    %25 = arith.mulf %24, %5 : vector<16x48xf32>
    %26 = arith.addf %25, %6 : vector<16x48xf32>
    %27 = arith.truncf %26 : vector<16x48xf32> to vector<16x48xbf16>
    %c0_11 = arith.constant 0 : index
    %c0_12 = arith.constant 0 : index
    %c0_13 = arith.constant 0 : index
    %28 = vector.load %arg1[%c0_11, %c0_12, %c0_13] : memref<2x48x240xbf16, #tpu.memory_space<vmem>>, vector<1x48x240xbf16>
    %29 = vector.shape_cast %28 : vector<1x48x240xbf16> to vector<48x240xbf16>
    %cst_14 = arith.constant dense<0.000000e+00> : vector<16x240xf32>
    %30 = tpu.matmul %27, %29, %cst_14 {dimension_numbers = #tpu.dot_dimension_numbers<[1], [0], [0], [1], [0, 0, 1, 1], [], []>} : vector<16x48xbf16>, vector<48x240xbf16>, vector<16x240xf32> -> vector<16x240xf32>
    %c0_15 = arith.constant 0 : index
    %c896 = arith.constant 896 : index
    %31 = vector.load %arg5[%c0_15, %c896] : memref<16x3712xf32, #tpu.memory_space<vmem>>, vector<16x240xf32>
    %32 = arith.addf %30, %31 : vector<16x240xf32>
    %33 = vector.extract_strided_slice %32 {offsets = [0, 0], sizes = [16, 12], strides = [1, 1]} : vector<16x240xf32> to vector<16x12xf32>
    %34 = arith.mulf %33, %3 : vector<16x12xf32>
    %35 = vector.extract_strided_slice %32 {offsets = [0, 12], sizes = [16, 12], strides = [1, 1]} : vector<16x240xf32> to vector<16x12xf32>
    %36 = arith.mulf %35, %4 : vector<16x12xf32>
    %37 = arith.addf %34, %36 : vector<16x12xf32>
    %38 = vector.extract_strided_slice %32 {offsets = [0, 24], sizes = [16, 12], strides = [1, 1]} : vector<16x240xf32> to vector<16x12xf32>
    %39 = arith.mulf %38, %3 : vector<16x12xf32>
    %40 = vector.extract_strided_slice %32 {offsets = [0, 36], sizes = [16, 12], strides = [1, 1]} : vector<16x240xf32> to vector<16x12xf32>
    %41 = arith.mulf %40, %4 : vector<16x12xf32>
    %42 = arith.addf %39, %41 : vector<16x12xf32>
    %43 = vector.extract_strided_slice %32 {offsets = [0, 48], sizes = [16, 12], strides = [1, 1]} : vector<16x240xf32> to vector<16x12xf32>
    %44 = vector.shape_cast %37 : vector<16x12xf32> to vector<2x8x12xf32>
    %45 = arith.truncf %44 : vector<2x8x12xf32> to vector<2x8x12xbf16>
    %46 = vector.shape_cast %42 : vector<16x12xf32> to vector<2x8x12xf32>
    %47 = arith.truncf %46 : vector<2x8x12xf32> to vector<2x8x12xbf16>
    %48 = vector.shape_cast %43 : vector<16x12xf32> to vector<2x8x12xf32>
    %49 = arith.truncf %48 : vector<2x8x12xf32> to vector<2x8x12xbf16>
    "tpu.trace_start"() <{level = 10 : i32, message = "bqd,bkd->bqk"}> : () -> ()
    %cst_16 = arith.constant dense<0.000000e+00> : vector<2x8x8xf32>
    %50 = tpu.matmul %45, %47, %cst_16 {dimension_numbers = #tpu.dot_dimension_numbers<[2], [2], [1], [1], [0, 0, 0, 1, 1, 1], [0], [0]>} : vector<2x8x12xbf16>, vector<2x8x12xbf16>, vector<2x8x8xf32> -> vector<2x8x8xf32>
    "tpu.trace_stop"() : () -> ()
    %cst_17 = arith.constant dense<0xFF800000> : vector<2x8xf32>
    %51 = vector.multi_reduction <maximumf>, %50, %cst_17 [2] : vector<2x8x8xf32> to vector<2x8xf32>
    %52 = vector.shape_cast %51 : vector<2x8xf32> to vector<2x8x1xf32>
    %53 = vector.broadcast %52 : vector<2x8x1xf32> to vector<2x8x8xf32>
    %54 = arith.subf %50, %53 : vector<2x8x8xf32>
    %55 = math.exp %54 : vector<2x8x8xf32>
    %cst_18 = arith.constant dense<0.000000e+00> : vector<2x8xf32>
    %56 = vector.multi_reduction <add>, %55, %cst_18 [2] : vector<2x8x8xf32> to vector<2x8xf32>
    %57 = vector.shape_cast %56 : vector<2x8xf32> to vector<2x8x1xf32>
    %58 = tpu.reciprocal %57 {approx = true} : vector<2x8x1xf32> -> vector<2x8x1xf32>
    %59 = vector.broadcast %58 : vector<2x8x1xf32> to vector<2x8x8xf32>
    %60 = arith.mulf %55, %59 : vector<2x8x8xf32>
    %61 = arith.truncf %60 : vector<2x8x8xf32> to vector<2x8x8xbf16>
    "tpu.trace_start"() <{level = 10 : i32, message = "bqk,bkd->bqd"}> : () -> ()
    %cst_19 = arith.constant dense<0.000000e+00> : vector<2x8x12xf32>
    %62 = tpu.matmul %61, %49, %cst_19 {dimension_numbers = #tpu.dot_dimension_numbers<[2], [1], [1], [2], [0, 0, 0, 1, 1, 2], [0], [0]>} : vector<2x8x8xbf16>, vector<2x8x12xbf16>, vector<2x8x12xf32> -> vector<2x8x12xf32>
    "tpu.trace_stop"() : () -> ()
    %63 = vector.shape_cast %62 : vector<2x8x12xf32> to vector<16x12xf32>
    %64 = arith.truncf %63 : vector<16x12xf32> to vector<16x12xbf16>
    %c0_20 = arith.constant 0 : index
    %c0_21 = arith.constant 0 : index
    %c0_22 = arith.constant 0 : index
    %65 = vector.load %arg2[%c0_20, %c0_21, %c0_22] : memref<8x12x48xbf16, #tpu.memory_space<vmem>>, vector<1x12x48xbf16>
    %66 = vector.shape_cast %65 : vector<1x12x48xbf16> to vector<12x48xbf16>
    %cst_23 = arith.constant dense<0.000000e+00> : vector<16x48xf32>
    %67 = tpu.matmul %64, %66, %cst_23 {dimension_numbers = #tpu.dot_dimension_numbers<[1], [0], [0], [1], [0, 0, 1, 1], [], []>} : vector<16x12xbf16>, vector<12x48xbf16>, vector<16x48xf32> -> vector<16x48xf32>
    %68 = vector.extract_strided_slice %32 {offsets = [0, 60], sizes = [16, 12], strides = [1, 1]} : vector<16x240xf32> to vector<16x12xf32>
    %69 = arith.mulf %68, %3 : vector<16x12xf32>
    %70 = vector.extract_strided_slice %32 {offsets = [0, 72], sizes = [16, 12], strides = [1, 1]} : vector<16x240xf32> to vector<16x12xf32>
    %71 = arith.mulf %70, %4 : vector<16x12xf32>
    %72 = arith.addf %69, %71 : vector<16x12xf32>
    %73 = vector.extract_strided_slice %32 {offsets = [0, 84], sizes = [16, 12], strides = [1, 1]} : vector<16x240xf32> to vector<16x12xf32>
    %74 = arith.mulf %73, %3 : vector<16x12xf32>
    %75 = vector.extract_strided_slice %32 {offsets = [0, 96], sizes = [16, 12], strides = [1, 1]} : vector<16x240xf32> to vector<16x12xf32>
    %76 = arith.mulf %75, %4 : vector<16x12xf32>
    %77 = arith.addf %74, %76 : vector<16x12xf32>
    %78 = vector.extract_strided_slice %32 {offsets = [0, 108], sizes = [16, 12], strides = [1, 1]} : vector<16x240xf32> to vector<16x12xf32>
    %79 = vector.shape_cast %72 : vector<16x12xf32> to vector<2x8x12xf32>
    %80 = arith.truncf %79 : vector<2x8x12xf32> to vector<2x8x12xbf16>
    %81 = vector.shape_cast %77 : vector<16x12xf32> to vector<2x8x12xf32>
    %82 = arith.truncf %81 : vector<2x8x12xf32> to vector<2x8x12xbf16>
    %83 = vector.shape_cast %78 : vector<16x12xf32> to vector<2x8x12xf32>
    %84 = arith.truncf %83 : vector<2x8x12xf32> to vector<2x8x12xbf16>
    "tpu.trace_start"() <{level = 10 : i32, message = "bqd,bkd->bqk"}> : () -> ()
    %cst_24 = arith.constant dense<0.000000e+00> : vector<2x8x8xf32>
    %85 = tpu.matmul %80, %82, %cst_24 {dimension_numbers = #tpu.dot_dimension_numbers<[2], [2], [1], [1], [0, 0, 0, 1, 1, 1], [0], [0]>} : vector<2x8x12xbf16>, vector<2x8x12xbf16>, vector<2x8x8xf32> -> vector<2x8x8xf32>
    "tpu.trace_stop"() : () -> ()
    %cst_25 = arith.constant dense<0xFF800000> : vector<2x8xf32>
    %86 = vector.multi_reduction <maximumf>, %85, %cst_25 [2] : vector<2x8x8xf32> to vector<2x8xf32>
    %87 = vector.shape_cast %86 : vector<2x8xf32> to vector<2x8x1xf32>
    %88 = vector.broadcast %87 : vector<2x8x1xf32> to vector<2x8x8xf32>
    %89 = arith.subf %85, %88 : vector<2x8x8xf32>
    %90 = math.exp %89 : vector<2x8x8xf32>
    %cst_26 = arith.constant dense<0.000000e+00> : vector<2x8xf32>
    %91 = vector.multi_reduction <add>, %90, %cst_26 [2] : vector<2x8x8xf32> to vector<2x8xf32>
    %92 = vector.shape_cast %91 : vector<2x8xf32> to vector<2x8x1xf32>
    %93 = tpu.reciprocal %92 {approx = true} : vector<2x8x1xf32> -> vector<2x8x1xf32>
    %94 = vector.broadcast %93 : vector<2x8x1xf32> to vector<2x8x8xf32>
    %95 = arith.mulf %90, %94 : vector<2x8x8xf32>
    %96 = arith.truncf %95 : vector<2x8x8xf32> to vector<2x8x8xbf16>
    "tpu.trace_start"() <{level = 10 : i32, message = "bqk,bkd->bqd"}> : () -> ()
    %cst_27 = arith.constant dense<0.000000e+00> : vector<2x8x12xf32>
    %97 = tpu.matmul %96, %84, %cst_27 {dimension_numbers = #tpu.dot_dimension_numbers<[2], [1], [1], [2], [0, 0, 0, 1, 1, 2], [0], [0]>} : vector<2x8x8xbf16>, vector<2x8x12xbf16>, vector<2x8x12xf32> -> vector<2x8x12xf32>
    "tpu.trace_stop"() : () -> ()
    %98 = vector.shape_cast %97 : vector<2x8x12xf32> to vector<16x12xf32>
    %99 = arith.truncf %98 : vector<16x12xf32> to vector<16x12xbf16>
    %c1 = arith.constant 1 : index
    %c0_28 = arith.constant 0 : index
    %c0_29 = arith.constant 0 : index
    %100 = vector.load %arg2[%c1, %c0_28, %c0_29] : memref<8x12x48xbf16, #tpu.memory_space<vmem>>, vector<1x12x48xbf16>
    %101 = vector.shape_cast %100 : vector<1x12x48xbf16> to vector<12x48xbf16>
    %cst_30 = arith.constant dense<0.000000e+00> : vector<16x48xf32>
    %102 = tpu.matmul %99, %101, %cst_30 {dimension_numbers = #tpu.dot_dimension_numbers<[1], [0], [0], [1], [0, 0, 1, 1], [], []>} : vector<16x12xbf16>, vector<12x48xbf16>, vector<16x48xf32> -> vector<16x48xf32>
    %103 = arith.addf %67, %102 : vector<16x48xf32>
    %104 = vector.extract_strided_slice %32 {offsets = [0, 120], sizes = [16, 12], strides = [1, 1]} : vector<16x240xf32> to vector<16x12xf32>
    %105 = arith.mulf %104, %3 : vector<16x12xf32>
    %106 = vector.extract_strided_slice %32 {offsets = [0, 132], sizes = [16, 12], strides = [1, 1]} : vector<16x240xf32> to vector<16x12xf32>
    %107 = arith.mulf %106, %4 : vector<16x12xf32>
    %108 = arith.addf %105, %107 : vector<16x12xf32>
    %109 = vector.extract_strided_slice %32 {offsets = [0, 144], sizes = [16, 12], strides = [1, 1]} : vector<16x240xf32> to vector<16x12xf32>
    %110 = arith.mulf %109, %3 : vector<16x12xf32>
    %111 = vector.extract_strided_slice %32 {offsets = [0, 156], sizes = [16, 12], strides = [1, 1]} : vector<16x240xf32> to vector<16x12xf32>
    %112 = arith.mulf %111, %4 : vector<16x12xf32>
    %113 = arith.addf %110, %112 : vector<16x12xf32>
    %114 = vector.extract_strided_slice %32 {offsets = [0, 168], sizes = [16, 12], strides = [1, 1]} : vector<16x240xf32> to vector<16x12xf32>
    %115 = vector.shape_cast %108 : vector<16x12xf32> to vector<2x8x12xf32>
    %116 = arith.truncf %115 : vector<2x8x12xf32> to vector<2x8x12xbf16>
    %117 = vector.shape_cast %113 : vector<16x12xf32> to vector<2x8x12xf32>
    %118 = arith.truncf %117 : vector<2x8x12xf32> to vector<2x8x12xbf16>
    %119 = vector.shape_cast %114 : vector<16x12xf32> to vector<2x8x12xf32>
    %120 = arith.truncf %119 : vector<2x8x12xf32> to vector<2x8x12xbf16>
    "tpu.trace_start"() <{level = 10 : i32, message = "bqd,bkd->bqk"}> : () -> ()
    %cst_31 = arith.constant dense<0.000000e+00> : vector<2x8x8xf32>
    %121 = tpu.matmul %116, %118, %cst_31 {dimension_numbers = #tpu.dot_dimension_numbers<[2], [2], [1], [1], [0, 0, 0, 1, 1, 1], [0], [0]>} : vector<2x8x12xbf16>, vector<2x8x12xbf16>, vector<2x8x8xf32> -> vector<2x8x8xf32>
    "tpu.trace_stop"() : () -> ()
    %cst_32 = arith.constant dense<0xFF800000> : vector<2x8xf32>
    %122 = vector.multi_reduction <maximumf>, %121, %cst_32 [2] : vector<2x8x8xf32> to vector<2x8xf32>
    %123 = vector.shape_cast %122 : vector<2x8xf32> to vector<2x8x1xf32>
    %124 = vector.broadcast %123 : vector<2x8x1xf32> to vector<2x8x8xf32>
    %125 = arith.subf %121, %124 : vector<2x8x8xf32>
    %126 = math.exp %125 : vector<2x8x8xf32>
    %cst_33 = arith.constant dense<0.000000e+00> : vector<2x8xf32>
    %127 = vector.multi_reduction <add>, %126, %cst_33 [2] : vector<2x8x8xf32> to vector<2x8xf32>
    %128 = vector.shape_cast %127 : vector<2x8xf32> to vector<2x8x1xf32>
    %129 = tpu.reciprocal %128 {approx = true} : vector<2x8x1xf32> -> vector<2x8x1xf32>
    %130 = vector.broadcast %129 : vector<2x8x1xf32> to vector<2x8x8xf32>
    %131 = arith.mulf %126, %130 : vector<2x8x8xf32>
    %132 = arith.truncf %131 : vector<2x8x8xf32> to vector<2x8x8xbf16>
    "tpu.trace_start"() <{level = 10 : i32, message = "bqk,bkd->bqd"}> : () -> ()
    %cst_34 = arith.constant dense<0.000000e+00> : vector<2x8x12xf32>
    %133 = tpu.matmul %132, %120, %cst_34 {dimension_numbers = #tpu.dot_dimension_numbers<[2], [1], [1], [2], [0, 0, 0, 1, 1, 2], [0], [0]>} : vector<2x8x8xbf16>, vector<2x8x12xbf16>, vector<2x8x12xf32> -> vector<2x8x12xf32>
    "tpu.trace_stop"() : () -> ()
    %134 = vector.shape_cast %133 : vector<2x8x12xf32> to vector<16x12xf32>
    %135 = arith.truncf %134 : vector<16x12xf32> to vector<16x12xbf16>
    %c2 = arith.constant 2 : index
    %c0_35 = arith.constant 0 : index
    %c0_36 = arith.constant 0 : index
    %136 = vector.load %arg2[%c2, %c0_35, %c0_36] : memref<8x12x48xbf16, #tpu.memory_space<vmem>>, vector<1x12x48xbf16>
    %137 = vector.shape_cast %136 : vector<1x12x48xbf16> to vector<12x48xbf16>
    %cst_37 = arith.constant dense<0.000000e+00> : vector<16x48xf32>
    %138 = tpu.matmul %135, %137, %cst_37 {dimension_numbers = #tpu.dot_dimension_numbers<[1], [0], [0], [1], [0, 0, 1, 1], [], []>} : vector<16x12xbf16>, vector<12x48xbf16>, vector<16x48xf32> -> vector<16x48xf32>
    %139 = arith.addf %103, %138 : vector<16x48xf32>
    %140 = vector.extract_strided_slice %32 {offsets = [0, 180], sizes = [16, 12], strides = [1, 1]} : vector<16x240xf32> to vector<16x12xf32>
    %141 = arith.mulf %140, %3 : vector<16x12xf32>
    %142 = vector.extract_strided_slice %32 {offsets = [0, 192], sizes = [16, 12], strides = [1, 1]} : vector<16x240xf32> to vector<16x12xf32>
    %143 = arith.mulf %142, %4 : vector<16x12xf32>
    %144 = arith.addf %141, %143 : vector<16x12xf32>
    %145 = vector.extract_strided_slice %32 {offsets = [0, 204], sizes = [16, 12], strides = [1, 1]} : vector<16x240xf32> to vector<16x12xf32>
    %146 = arith.mulf %145, %3 : vector<16x12xf32>
    %147 = vector.extract_strided_slice %32 {offsets = [0, 216], sizes = [16, 12], strides = [1, 1]} : vector<16x240xf32> to vector<16x12xf32>
    %148 = arith.mulf %147, %4 : vector<16x12xf32>
    %149 = arith.addf %146, %148 : vector<16x12xf32>
    %150 = vector.extract_strided_slice %32 {offsets = [0, 228], sizes = [16, 12], strides = [1, 1]} : vector<16x240xf32> to vector<16x12xf32>
    %151 = vector.shape_cast %144 : vector<16x12xf32> to vector<2x8x12xf32>
    %152 = arith.truncf %151 : vector<2x8x12xf32> to vector<2x8x12xbf16>
    %153 = vector.shape_cast %149 : vector<16x12xf32> to vector<2x8x12xf32>
    %154 = arith.truncf %153 : vector<2x8x12xf32> to vector<2x8x12xbf16>
    %155 = vector.shape_cast %150 : vector<16x12xf32> to vector<2x8x12xf32>
    %156 = arith.truncf %155 : vector<2x8x12xf32> to vector<2x8x12xbf16>
    "tpu.trace_start"() <{level = 10 : i32, message = "bqd,bkd->bqk"}> : () -> ()
    %cst_38 = arith.constant dense<0.000000e+00> : vector<2x8x8xf32>
    %157 = tpu.matmul %152, %154, %cst_38 {dimension_numbers = #tpu.dot_dimension_numbers<[2], [2], [1], [1], [0, 0, 0, 1, 1, 1], [0], [0]>} : vector<2x8x12xbf16>, vector<2x8x12xbf16>, vector<2x8x8xf32> -> vector<2x8x8xf32>
    "tpu.trace_stop"() : () -> ()
    %cst_39 = arith.constant dense<0xFF800000> : vector<2x8xf32>
    %158 = vector.multi_reduction <maximumf>, %157, %cst_39 [2] : vector<2x8x8xf32> to vector<2x8xf32>
    %159 = vector.shape_cast %158 : vector<2x8xf32> to vector<2x8x1xf32>
    %160 = vector.broadcast %159 : vector<2x8x1xf32> to vector<2x8x8xf32>
    %161 = arith.subf %157, %160 : vector<2x8x8xf32>
    %162 = math.exp %161 : vector<2x8x8xf32>
    %cst_40 = arith.constant dense<0.000000e+00> : vector<2x8xf32>
    %163 = vector.multi_reduction <add>, %162, %cst_40 [2] : vector<2x8x8xf32> to vector<2x8xf32>
    %164 = vector.shape_cast %163 : vector<2x8xf32> to vector<2x8x1xf32>
    %165 = tpu.reciprocal %164 {approx = true} : vector<2x8x1xf32> -> vector<2x8x1xf32>
    %166 = vector.broadcast %165 : vector<2x8x1xf32> to vector<2x8x8xf32>
    %167 = arith.mulf %162, %166 : vector<2x8x8xf32>
    %168 = arith.truncf %167 : vector<2x8x8xf32> to vector<2x8x8xbf16>
    "tpu.trace_start"() <{level = 10 : i32, message = "bqk,bkd->bqd"}> : () -> ()
    %cst_41 = arith.constant dense<0.000000e+00> : vector<2x8x12xf32>
    %169 = tpu.matmul %168, %156, %cst_41 {dimension_numbers = #tpu.dot_dimension_numbers<[2], [1], [1], [2], [0, 0, 0, 1, 1, 2], [0], [0]>} : vector<2x8x8xbf16>, vector<2x8x12xbf16>, vector<2x8x12xf32> -> vector<2x8x12xf32>
    "tpu.trace_stop"() : () -> ()
    %170 = vector.shape_cast %169 : vector<2x8x12xf32> to vector<16x12xf32>
    %171 = arith.truncf %170 : vector<16x12xf32> to vector<16x12xbf16>
    %c3 = arith.constant 3 : index
    %c0_42 = arith.constant 0 : index
    %c0_43 = arith.constant 0 : index
    %172 = vector.load %arg2[%c3, %c0_42, %c0_43] : memref<8x12x48xbf16, #tpu.memory_space<vmem>>, vector<1x12x48xbf16>
    %173 = vector.shape_cast %172 : vector<1x12x48xbf16> to vector<12x48xbf16>
    %cst_44 = arith.constant dense<0.000000e+00> : vector<16x48xf32>
    %174 = tpu.matmul %171, %173, %cst_44 {dimension_numbers = #tpu.dot_dimension_numbers<[1], [0], [0], [1], [0, 0, 1, 1], [], []>} : vector<16x12xbf16>, vector<12x48xbf16>, vector<16x48xf32> -> vector<16x48xf32>
    %175 = arith.addf %139, %174 : vector<16x48xf32>
    %176 = arith.addf %2, %175 : vector<16x48xf32>
    %c0_45 = arith.constant 0 : index
    %c1152 = arith.constant 1152 : index
    %177 = vector.load %arg5[%c0_45, %c1152] : memref<16x3712xf32, #tpu.memory_space<vmem>>, vector<16x48xf32>
    %178 = arith.addf %176, %177 : vector<16x48xf32>
    %c0_46 = arith.constant 0 : index
    %c1280 = arith.constant 1280 : index
    %179 = vector.load %arg5[%c0_46, %c1280] : memref<16x3712xf32, #tpu.memory_space<vmem>>, vector<16x48xf32>
    %c0_47 = arith.constant 0 : index
    %c1408 = arith.constant 1408 : index
    %180 = vector.load %arg5[%c0_47, %c1408] : memref<16x3712xf32, #tpu.memory_space<vmem>>, vector<16x48xf32>
    %cst_48 = arith.constant dense<0.000000e+00> : vector<16xf32>
    %181 = vector.multi_reduction <add>, %178, %cst_48 [1] : vector<16x48xf32> to vector<16xf32>
    %182 = vector.shape_cast %181 : vector<16xf32> to vector<16x1xf32>
    %cst_49 = arith.constant 4.800000e+01 : f32
    %183 = vector.broadcast %cst_49 : f32 to vector<16x1xf32>
    %184 = arith.divf %182, %183 : vector<16x1xf32>
    %185 = vector.broadcast %184 : vector<16x1xf32> to vector<16x48xf32>
    %186 = arith.subf %178, %185 : vector<16x48xf32>
    %187 = arith.mulf %186, %186 : vector<16x48xf32>
    %cst_50 = arith.constant dense<0.000000e+00> : vector<16xf32>
    %188 = vector.multi_reduction <add>, %187, %cst_50 [1] : vector<16x48xf32> to vector<16xf32>
    %189 = vector.shape_cast %188 : vector<16xf32> to vector<16x1xf32>
    %cst_51 = arith.constant 4.800000e+01 : f32
    %190 = vector.broadcast %cst_51 : f32 to vector<16x1xf32>
    %191 = arith.divf %189, %190 : vector<16x1xf32>
    %192 = vector.broadcast %184 : vector<16x1xf32> to vector<16x48xf32>
    %193 = arith.subf %178, %192 : vector<16x48xf32>
    %cst_52 = arith.constant 9.99999974E-6 : f32
    %194 = vector.broadcast %cst_52 : f32 to vector<16x1xf32>
    %195 = arith.addf %191, %194 : vector<16x1xf32>
    %196 = math.rsqrt %195 : vector<16x1xf32>
    %197 = vector.broadcast %196 : vector<16x1xf32> to vector<16x48xf32>
    %198 = arith.mulf %193, %197 : vector<16x48xf32>
    %199 = arith.mulf %198, %179 : vector<16x48xf32>
    %200 = arith.addf %199, %180 : vector<16x48xf32>
    %201 = arith.truncf %200 : vector<16x48xf32> to vector<16x48xbf16>
    %c0_53 = arith.constant 0 : index
    %c0_54 = arith.constant 0 : index
    %c0_55 = arith.constant 0 : index
    %202 = vector.load %arg3[%c0_53, %c0_54, %c0_55] : memref<2x48x256xbf16, #tpu.memory_space<vmem>>, vector<1x48x256xbf16>
    %203 = vector.shape_cast %202 : vector<1x48x256xbf16> to vector<48x256xbf16>
    %cst_56 = arith.constant dense<0.000000e+00> : vector<16x256xf32>
    %204 = tpu.matmul %201, %203, %cst_56 {dimension_numbers = #tpu.dot_dimension_numbers<[1], [0], [0], [1], [0, 0, 1, 1], [], []>} : vector<16x48xbf16>, vector<48x256xbf16>, vector<16x256xf32> -> vector<16x256xf32>
    %c0_57 = arith.constant 0 : index
    %c1536 = arith.constant 1536 : index
    %205 = vector.load %arg5[%c0_57, %c1536] : memref<16x3712xf32, #tpu.memory_space<vmem>>, vector<16x256xf32>
    %206 = arith.addf %204, %205 : vector<16x256xf32>
    %207 = vector.extract_strided_slice %206 {offsets = [0, 0], sizes = [16, 128], strides = [1, 1]} : vector<16x256xf32> to vector<16x128xf32>
    %208 = vector.extract_strided_slice %206 {offsets = [0, 128], sizes = [16, 128], strides = [1, 1]} : vector<16x256xf32> to vector<16x128xf32>
    %209 = arith.negf %207 : vector<16x128xf32>
    %210 = math.exp %209 : vector<16x128xf32>
    %cst_58 = arith.constant 1.000000e+00 : f32
    %211 = vector.broadcast %cst_58 : f32 to vector<16x128xf32>
    %212 = arith.addf %211, %210 : vector<16x128xf32>
    %213 = arith.divf %211, %212 : vector<16x128xf32>
    %214 = arith.mulf %207, %213 : vector<16x128xf32>
    %215 = arith.mulf %214, %208 : vector<16x128xf32>
    %c0_59 = arith.constant 0 : index
    %c1792 = arith.constant 1792 : index
    %216 = vector.load %arg5[%c0_59, %c1792] : memref<16x3712xf32, #tpu.memory_space<vmem>>, vector<16x128xf32>
    %c0_60 = arith.constant 0 : index
    %c1920 = arith.constant 1920 : index
    %217 = vector.load %arg5[%c0_60, %c1920] : memref<16x3712xf32, #tpu.memory_space<vmem>>, vector<16x128xf32>
    %cst_61 = arith.constant dense<0.000000e+00> : vector<16xf32>
    %218 = vector.multi_reduction <add>, %215, %cst_61 [1] : vector<16x128xf32> to vector<16xf32>
    %219 = vector.shape_cast %218 : vector<16xf32> to vector<16x1xf32>
    %cst_62 = arith.constant 1.280000e+02 : f32
    %220 = vector.broadcast %cst_62 : f32 to vector<16x1xf32>
    %221 = arith.divf %219, %220 : vector<16x1xf32>
    %222 = vector.broadcast %221 : vector<16x1xf32> to vector<16x128xf32>
    %223 = arith.subf %215, %222 : vector<16x128xf32>
    %224 = arith.mulf %223, %223 : vector<16x128xf32>
    %cst_63 = arith.constant dense<0.000000e+00> : vector<16xf32>
    %225 = vector.multi_reduction <add>, %224, %cst_63 [1] : vector<16x128xf32> to vector<16xf32>
    %226 = vector.shape_cast %225 : vector<16xf32> to vector<16x1xf32>
    %cst_64 = arith.constant 1.280000e+02 : f32
    %227 = vector.broadcast %cst_64 : f32 to vector<16x1xf32>
    %228 = arith.divf %226, %227 : vector<16x1xf32>
    %229 = vector.broadcast %221 : vector<16x1xf32> to vector<16x128xf32>
    %230 = arith.subf %215, %229 : vector<16x128xf32>
    %cst_65 = arith.constant 9.99999974E-6 : f32
    %231 = vector.broadcast %cst_65 : f32 to vector<16x1xf32>
    %232 = arith.addf %228, %231 : vector<16x1xf32>
    %233 = math.rsqrt %232 : vector<16x1xf32>
    %234 = vector.broadcast %233 : vector<16x1xf32> to vector<16x128xf32>
    %235 = arith.mulf %230, %234 : vector<16x128xf32>
    %236 = arith.mulf %235, %216 : vector<16x128xf32>
    %237 = arith.addf %236, %217 : vector<16x128xf32>
    %238 = arith.truncf %237 : vector<16x128xf32> to vector<16x128xbf16>
    %c0_66 = arith.constant 0 : index
    %c0_67 = arith.constant 0 : index
    %c0_68 = arith.constant 0 : index
    %239 = vector.load %arg4[%c0_66, %c0_67, %c0_68] : memref<2x128x48xbf16, #tpu.memory_space<vmem>>, vector<1x128x48xbf16>
    %240 = vector.shape_cast %239 : vector<1x128x48xbf16> to vector<128x48xbf16>
    %cst_69 = arith.constant dense<0.000000e+00> : vector<16x48xf32>
    %241 = tpu.matmul %238, %240, %cst_69 {dimension_numbers = #tpu.dot_dimension_numbers<[1], [0], [0], [1], [0, 0, 1, 1], [], []>} : vector<16x128xbf16>, vector<128x48xbf16>, vector<16x48xf32> -> vector<16x48xf32>
    %c0_70 = arith.constant 0 : index
    %c2048 = arith.constant 2048 : index
    %242 = vector.load %arg5[%c0_70, %c2048] : memref<16x3712xf32, #tpu.memory_space<vmem>>, vector<16x48xf32>
    %243 = arith.addf %241, %242 : vector<16x48xf32>
    %244 = arith.addf %178, %243 : vector<16x48xf32>
    %c0_71 = arith.constant 0 : index
    %c2176 = arith.constant 2176 : index
    %245 = vector.load %arg5[%c0_71, %c2176] : memref<16x3712xf32, #tpu.memory_space<vmem>>, vector<16x48xf32>
    %c0_72 = arith.constant 0 : index
    %c2304 = arith.constant 2304 : index
    %246 = vector.load %arg5[%c0_72, %c2304] : memref<16x3712xf32, #tpu.memory_space<vmem>>, vector<16x48xf32>
    %cst_73 = arith.constant dense<0.000000e+00> : vector<16xf32>
    %247 = vector.multi_reduction <add>, %244, %cst_73 [1] : vector<16x48xf32> to vector<16xf32>
    %248 = vector.shape_cast %247 : vector<16xf32> to vector<16x1xf32>
    %cst_74 = arith.constant 4.800000e+01 : f32
    %249 = vector.broadcast %cst_74 : f32 to vector<16x1xf32>
    %250 = arith.divf %248, %249 : vector<16x1xf32>
    %251 = vector.broadcast %250 : vector<16x1xf32> to vector<16x48xf32>
    %252 = arith.subf %244, %251 : vector<16x48xf32>
    %253 = arith.mulf %252, %252 : vector<16x48xf32>
    %cst_75 = arith.constant dense<0.000000e+00> : vector<16xf32>
    %254 = vector.multi_reduction <add>, %253, %cst_75 [1] : vector<16x48xf32> to vector<16xf32>
    %255 = vector.shape_cast %254 : vector<16xf32> to vector<16x1xf32>
    %cst_76 = arith.constant 4.800000e+01 : f32
    %256 = vector.broadcast %cst_76 : f32 to vector<16x1xf32>
    %257 = arith.divf %255, %256 : vector<16x1xf32>
    %258 = vector.broadcast %250 : vector<16x1xf32> to vector<16x48xf32>
    %259 = arith.subf %244, %258 : vector<16x48xf32>
    %cst_77 = arith.constant 9.99999974E-6 : f32
    %260 = vector.broadcast %cst_77 : f32 to vector<16x1xf32>
    %261 = arith.addf %257, %260 : vector<16x1xf32>
    %262 = math.rsqrt %261 : vector<16x1xf32>
    %263 = vector.broadcast %262 : vector<16x1xf32> to vector<16x48xf32>
    %264 = arith.mulf %259, %263 : vector<16x48xf32>
    %265 = arith.mulf %264, %245 : vector<16x48xf32>
    %266 = arith.addf %265, %246 : vector<16x48xf32>
    %267 = arith.truncf %266 : vector<16x48xf32> to vector<16x48xbf16>
    %c1_78 = arith.constant 1 : index
    %c0_79 = arith.constant 0 : index
    %c0_80 = arith.constant 0 : index
    %268 = vector.load %arg1[%c1_78, %c0_79, %c0_80] : memref<2x48x240xbf16, #tpu.memory_space<vmem>>, vector<1x48x240xbf16>
    %269 = vector.shape_cast %268 : vector<1x48x240xbf16> to vector<48x240xbf16>
    %cst_81 = arith.constant dense<0.000000e+00> : vector<16x240xf32>
    %270 = tpu.matmul %267, %269, %cst_81 {dimension_numbers = #tpu.dot_dimension_numbers<[1], [0], [0], [1], [0, 0, 1, 1], [], []>} : vector<16x48xbf16>, vector<48x240xbf16>, vector<16x240xf32> -> vector<16x240xf32>
    %c0_82 = arith.constant 0 : index
    %c2432 = arith.constant 2432 : index
    %271 = vector.load %arg5[%c0_82, %c2432] : memref<16x3712xf32, #tpu.memory_space<vmem>>, vector<16x240xf32>
    %272 = arith.addf %270, %271 : vector<16x240xf32>
    %273 = vector.extract_strided_slice %272 {offsets = [0, 0], sizes = [16, 12], strides = [1, 1]} : vector<16x240xf32> to vector<16x12xf32>
    %274 = arith.mulf %273, %3 : vector<16x12xf32>
    %275 = vector.extract_strided_slice %272 {offsets = [0, 12], sizes = [16, 12], strides = [1, 1]} : vector<16x240xf32> to vector<16x12xf32>
    %276 = arith.mulf %275, %4 : vector<16x12xf32>
    %277 = arith.addf %274, %276 : vector<16x12xf32>
    %278 = vector.extract_strided_slice %272 {offsets = [0, 24], sizes = [16, 12], strides = [1, 1]} : vector<16x240xf32> to vector<16x12xf32>
    %279 = arith.mulf %278, %3 : vector<16x12xf32>
    %280 = vector.extract_strided_slice %272 {offsets = [0, 36], sizes = [16, 12], strides = [1, 1]} : vector<16x240xf32> to vector<16x12xf32>
    %281 = arith.mulf %280, %4 : vector<16x12xf32>
    %282 = arith.addf %279, %281 : vector<16x12xf32>
    %283 = vector.extract_strided_slice %272 {offsets = [0, 48], sizes = [16, 12], strides = [1, 1]} : vector<16x240xf32> to vector<16x12xf32>
    %284 = vector.shape_cast %277 : vector<16x12xf32> to vector<2x8x12xf32>
    %285 = arith.truncf %284 : vector<2x8x12xf32> to vector<2x8x12xbf16>
    %286 = vector.shape_cast %282 : vector<16x12xf32> to vector<2x8x12xf32>
    %287 = arith.truncf %286 : vector<2x8x12xf32> to vector<2x8x12xbf16>
    %288 = vector.shape_cast %283 : vector<16x12xf32> to vector<2x8x12xf32>
    %289 = arith.truncf %288 : vector<2x8x12xf32> to vector<2x8x12xbf16>
    "tpu.trace_start"() <{level = 10 : i32, message = "bqd,bkd->bqk"}> : () -> ()
    %cst_83 = arith.constant dense<0.000000e+00> : vector<2x8x8xf32>
    %290 = tpu.matmul %285, %287, %cst_83 {dimension_numbers = #tpu.dot_dimension_numbers<[2], [2], [1], [1], [0, 0, 0, 1, 1, 1], [0], [0]>} : vector<2x8x12xbf16>, vector<2x8x12xbf16>, vector<2x8x8xf32> -> vector<2x8x8xf32>
    "tpu.trace_stop"() : () -> ()
    %cst_84 = arith.constant dense<0xFF800000> : vector<2x8xf32>
    %291 = vector.multi_reduction <maximumf>, %290, %cst_84 [2] : vector<2x8x8xf32> to vector<2x8xf32>
    %292 = vector.shape_cast %291 : vector<2x8xf32> to vector<2x8x1xf32>
    %293 = vector.broadcast %292 : vector<2x8x1xf32> to vector<2x8x8xf32>
    %294 = arith.subf %290, %293 : vector<2x8x8xf32>
    %295 = math.exp %294 : vector<2x8x8xf32>
    %cst_85 = arith.constant dense<0.000000e+00> : vector<2x8xf32>
    %296 = vector.multi_reduction <add>, %295, %cst_85 [2] : vector<2x8x8xf32> to vector<2x8xf32>
    %297 = vector.shape_cast %296 : vector<2x8xf32> to vector<2x8x1xf32>
    %298 = tpu.reciprocal %297 {approx = true} : vector<2x8x1xf32> -> vector<2x8x1xf32>
    %299 = vector.broadcast %298 : vector<2x8x1xf32> to vector<2x8x8xf32>
    %300 = arith.mulf %295, %299 : vector<2x8x8xf32>
    %301 = arith.truncf %300 : vector<2x8x8xf32> to vector<2x8x8xbf16>
    "tpu.trace_start"() <{level = 10 : i32, message = "bqk,bkd->bqd"}> : () -> ()
    %cst_86 = arith.constant dense<0.000000e+00> : vector<2x8x12xf32>
    %302 = tpu.matmul %301, %289, %cst_86 {dimension_numbers = #tpu.dot_dimension_numbers<[2], [1], [1], [2], [0, 0, 0, 1, 1, 2], [0], [0]>} : vector<2x8x8xbf16>, vector<2x8x12xbf16>, vector<2x8x12xf32> -> vector<2x8x12xf32>
    "tpu.trace_stop"() : () -> ()
    %303 = vector.shape_cast %302 : vector<2x8x12xf32> to vector<16x12xf32>
    %304 = arith.truncf %303 : vector<16x12xf32> to vector<16x12xbf16>
    %c4 = arith.constant 4 : index
    %c0_87 = arith.constant 0 : index
    %c0_88 = arith.constant 0 : index
    %305 = vector.load %arg2[%c4, %c0_87, %c0_88] : memref<8x12x48xbf16, #tpu.memory_space<vmem>>, vector<1x12x48xbf16>
    %306 = vector.shape_cast %305 : vector<1x12x48xbf16> to vector<12x48xbf16>
    %cst_89 = arith.constant dense<0.000000e+00> : vector<16x48xf32>
    %307 = tpu.matmul %304, %306, %cst_89 {dimension_numbers = #tpu.dot_dimension_numbers<[1], [0], [0], [1], [0, 0, 1, 1], [], []>} : vector<16x12xbf16>, vector<12x48xbf16>, vector<16x48xf32> -> vector<16x48xf32>
    %308 = vector.extract_strided_slice %272 {offsets = [0, 60], sizes = [16, 12], strides = [1, 1]} : vector<16x240xf32> to vector<16x12xf32>
    %309 = arith.mulf %308, %3 : vector<16x12xf32>
    %310 = vector.extract_strided_slice %272 {offsets = [0, 72], sizes = [16, 12], strides = [1, 1]} : vector<16x240xf32> to vector<16x12xf32>
    %311 = arith.mulf %310, %4 : vector<16x12xf32>
    %312 = arith.addf %309, %311 : vector<16x12xf32>
    %313 = vector.extract_strided_slice %272 {offsets = [0, 84], sizes = [16, 12], strides = [1, 1]} : vector<16x240xf32> to vector<16x12xf32>
    %314 = arith.mulf %313, %3 : vector<16x12xf32>
    %315 = vector.extract_strided_slice %272 {offsets = [0, 96], sizes = [16, 12], strides = [1, 1]} : vector<16x240xf32> to vector<16x12xf32>
    %316 = arith.mulf %315, %4 : vector<16x12xf32>
    %317 = arith.addf %314, %316 : vector<16x12xf32>
    %318 = vector.extract_strided_slice %272 {offsets = [0, 108], sizes = [16, 12], strides = [1, 1]} : vector<16x240xf32> to vector<16x12xf32>
    %319 = vector.shape_cast %312 : vector<16x12xf32> to vector<2x8x12xf32>
    %320 = arith.truncf %319 : vector<2x8x12xf32> to vector<2x8x12xbf16>
    %321 = vector.shape_cast %317 : vector<16x12xf32> to vector<2x8x12xf32>
    %322 = arith.truncf %321 : vector<2x8x12xf32> to vector<2x8x12xbf16>
    %323 = vector.shape_cast %318 : vector<16x12xf32> to vector<2x8x12xf32>
    %324 = arith.truncf %323 : vector<2x8x12xf32> to vector<2x8x12xbf16>
    "tpu.trace_start"() <{level = 10 : i32, message = "bqd,bkd->bqk"}> : () -> ()
    %cst_90 = arith.constant dense<0.000000e+00> : vector<2x8x8xf32>
    %325 = tpu.matmul %320, %322, %cst_90 {dimension_numbers = #tpu.dot_dimension_numbers<[2], [2], [1], [1], [0, 0, 0, 1, 1, 1], [0], [0]>} : vector<2x8x12xbf16>, vector<2x8x12xbf16>, vector<2x8x8xf32> -> vector<2x8x8xf32>
    "tpu.trace_stop"() : () -> ()
    %cst_91 = arith.constant dense<0xFF800000> : vector<2x8xf32>
    %326 = vector.multi_reduction <maximumf>, %325, %cst_91 [2] : vector<2x8x8xf32> to vector<2x8xf32>
    %327 = vector.shape_cast %326 : vector<2x8xf32> to vector<2x8x1xf32>
    %328 = vector.broadcast %327 : vector<2x8x1xf32> to vector<2x8x8xf32>
    %329 = arith.subf %325, %328 : vector<2x8x8xf32>
    %330 = math.exp %329 : vector<2x8x8xf32>
    %cst_92 = arith.constant dense<0.000000e+00> : vector<2x8xf32>
    %331 = vector.multi_reduction <add>, %330, %cst_92 [2] : vector<2x8x8xf32> to vector<2x8xf32>
    %332 = vector.shape_cast %331 : vector<2x8xf32> to vector<2x8x1xf32>
    %333 = tpu.reciprocal %332 {approx = true} : vector<2x8x1xf32> -> vector<2x8x1xf32>
    %334 = vector.broadcast %333 : vector<2x8x1xf32> to vector<2x8x8xf32>
    %335 = arith.mulf %330, %334 : vector<2x8x8xf32>
    %336 = arith.truncf %335 : vector<2x8x8xf32> to vector<2x8x8xbf16>
    "tpu.trace_start"() <{level = 10 : i32, message = "bqk,bkd->bqd"}> : () -> ()
    %cst_93 = arith.constant dense<0.000000e+00> : vector<2x8x12xf32>
    %337 = tpu.matmul %336, %324, %cst_93 {dimension_numbers = #tpu.dot_dimension_numbers<[2], [1], [1], [2], [0, 0, 0, 1, 1, 2], [0], [0]>} : vector<2x8x8xbf16>, vector<2x8x12xbf16>, vector<2x8x12xf32> -> vector<2x8x12xf32>
    "tpu.trace_stop"() : () -> ()
    %338 = vector.shape_cast %337 : vector<2x8x12xf32> to vector<16x12xf32>
    %339 = arith.truncf %338 : vector<16x12xf32> to vector<16x12xbf16>
    %c5 = arith.constant 5 : index
    %c0_94 = arith.constant 0 : index
    %c0_95 = arith.constant 0 : index
    %340 = vector.load %arg2[%c5, %c0_94, %c0_95] : memref<8x12x48xbf16, #tpu.memory_space<vmem>>, vector<1x12x48xbf16>
    %341 = vector.shape_cast %340 : vector<1x12x48xbf16> to vector<12x48xbf16>
    %cst_96 = arith.constant dense<0.000000e+00> : vector<16x48xf32>
    %342 = tpu.matmul %339, %341, %cst_96 {dimension_numbers = #tpu.dot_dimension_numbers<[1], [0], [0], [1], [0, 0, 1, 1], [], []>} : vector<16x12xbf16>, vector<12x48xbf16>, vector<16x48xf32> -> vector<16x48xf32>
    %343 = arith.addf %307, %342 : vector<16x48xf32>
    %344 = vector.extract_strided_slice %272 {offsets = [0, 120], sizes = [16, 12], strides = [1, 1]} : vector<16x240xf32> to vector<16x12xf32>
    %345 = arith.mulf %344, %3 : vector<16x12xf32>
    %346 = vector.extract_strided_slice %272 {offsets = [0, 132], sizes = [16, 12], strides = [1, 1]} : vector<16x240xf32> to vector<16x12xf32>
    %347 = arith.mulf %346, %4 : vector<16x12xf32>
    %348 = arith.addf %345, %347 : vector<16x12xf32>
    %349 = vector.extract_strided_slice %272 {offsets = [0, 144], sizes = [16, 12], strides = [1, 1]} : vector<16x240xf32> to vector<16x12xf32>
    %350 = arith.mulf %349, %3 : vector<16x12xf32>
    %351 = vector.extract_strided_slice %272 {offsets = [0, 156], sizes = [16, 12], strides = [1, 1]} : vector<16x240xf32> to vector<16x12xf32>
    %352 = arith.mulf %351, %4 : vector<16x12xf32>
    %353 = arith.addf %350, %352 : vector<16x12xf32>
    %354 = vector.extract_strided_slice %272 {offsets = [0, 168], sizes = [16, 12], strides = [1, 1]} : vector<16x240xf32> to vector<16x12xf32>
    %355 = vector.shape_cast %348 : vector<16x12xf32> to vector<2x8x12xf32>
    %356 = arith.truncf %355 : vector<2x8x12xf32> to vector<2x8x12xbf16>
    %357 = vector.shape_cast %353 : vector<16x12xf32> to vector<2x8x12xf32>
    %358 = arith.truncf %357 : vector<2x8x12xf32> to vector<2x8x12xbf16>
    %359 = vector.shape_cast %354 : vector<16x12xf32> to vector<2x8x12xf32>
    %360 = arith.truncf %359 : vector<2x8x12xf32> to vector<2x8x12xbf16>
    "tpu.trace_start"() <{level = 10 : i32, message = "bqd,bkd->bqk"}> : () -> ()
    %cst_97 = arith.constant dense<0.000000e+00> : vector<2x8x8xf32>
    %361 = tpu.matmul %356, %358, %cst_97 {dimension_numbers = #tpu.dot_dimension_numbers<[2], [2], [1], [1], [0, 0, 0, 1, 1, 1], [0], [0]>} : vector<2x8x12xbf16>, vector<2x8x12xbf16>, vector<2x8x8xf32> -> vector<2x8x8xf32>
    "tpu.trace_stop"() : () -> ()
    %cst_98 = arith.constant dense<0xFF800000> : vector<2x8xf32>
    %362 = vector.multi_reduction <maximumf>, %361, %cst_98 [2] : vector<2x8x8xf32> to vector<2x8xf32>
    %363 = vector.shape_cast %362 : vector<2x8xf32> to vector<2x8x1xf32>
    %364 = vector.broadcast %363 : vector<2x8x1xf32> to vector<2x8x8xf32>
    %365 = arith.subf %361, %364 : vector<2x8x8xf32>
    %366 = math.exp %365 : vector<2x8x8xf32>
    %cst_99 = arith.constant dense<0.000000e+00> : vector<2x8xf32>
    %367 = vector.multi_reduction <add>, %366, %cst_99 [2] : vector<2x8x8xf32> to vector<2x8xf32>
    %368 = vector.shape_cast %367 : vector<2x8xf32> to vector<2x8x1xf32>
    %369 = tpu.reciprocal %368 {approx = true} : vector<2x8x1xf32> -> vector<2x8x1xf32>
    %370 = vector.broadcast %369 : vector<2x8x1xf32> to vector<2x8x8xf32>
    %371 = arith.mulf %366, %370 : vector<2x8x8xf32>
    %372 = arith.truncf %371 : vector<2x8x8xf32> to vector<2x8x8xbf16>
    "tpu.trace_start"() <{level = 10 : i32, message = "bqk,bkd->bqd"}> : () -> ()
    %cst_100 = arith.constant dense<0.000000e+00> : vector<2x8x12xf32>
    %373 = tpu.matmul %372, %360, %cst_100 {dimension_numbers = #tpu.dot_dimension_numbers<[2], [1], [1], [2], [0, 0, 0, 1, 1, 2], [0], [0]>} : vector<2x8x8xbf16>, vector<2x8x12xbf16>, vector<2x8x12xf32> -> vector<2x8x12xf32>
    "tpu.trace_stop"() : () -> ()
    %374 = vector.shape_cast %373 : vector<2x8x12xf32> to vector<16x12xf32>
    %375 = arith.truncf %374 : vector<16x12xf32> to vector<16x12xbf16>
    %c6 = arith.constant 6 : index
    %c0_101 = arith.constant 0 : index
    %c0_102 = arith.constant 0 : index
    %376 = vector.load %arg2[%c6, %c0_101, %c0_102] : memref<8x12x48xbf16, #tpu.memory_space<vmem>>, vector<1x12x48xbf16>
    %377 = vector.shape_cast %376 : vector<1x12x48xbf16> to vector<12x48xbf16>
    %cst_103 = arith.constant dense<0.000000e+00> : vector<16x48xf32>
    %378 = tpu.matmul %375, %377, %cst_103 {dimension_numbers = #tpu.dot_dimension_numbers<[1], [0], [0], [1], [0, 0, 1, 1], [], []>} : vector<16x12xbf16>, vector<12x48xbf16>, vector<16x48xf32> -> vector<16x48xf32>
    %379 = arith.addf %343, %378 : vector<16x48xf32>
    %380 = vector.extract_strided_slice %272 {offsets = [0, 180], sizes = [16, 12], strides = [1, 1]} : vector<16x240xf32> to vector<16x12xf32>
    %381 = arith.mulf %380, %3 : vector<16x12xf32>
    %382 = vector.extract_strided_slice %272 {offsets = [0, 192], sizes = [16, 12], strides = [1, 1]} : vector<16x240xf32> to vector<16x12xf32>
    %383 = arith.mulf %382, %4 : vector<16x12xf32>
    %384 = arith.addf %381, %383 : vector<16x12xf32>
    %385 = vector.extract_strided_slice %272 {offsets = [0, 204], sizes = [16, 12], strides = [1, 1]} : vector<16x240xf32> to vector<16x12xf32>
    %386 = arith.mulf %385, %3 : vector<16x12xf32>
    %387 = vector.extract_strided_slice %272 {offsets = [0, 216], sizes = [16, 12], strides = [1, 1]} : vector<16x240xf32> to vector<16x12xf32>
    %388 = arith.mulf %387, %4 : vector<16x12xf32>
    %389 = arith.addf %386, %388 : vector<16x12xf32>
    %390 = vector.extract_strided_slice %272 {offsets = [0, 228], sizes = [16, 12], strides = [1, 1]} : vector<16x240xf32> to vector<16x12xf32>
    %391 = vector.shape_cast %384 : vector<16x12xf32> to vector<2x8x12xf32>
    %392 = arith.truncf %391 : vector<2x8x12xf32> to vector<2x8x12xbf16>
    %393 = vector.shape_cast %389 : vector<16x12xf32> to vector<2x8x12xf32>
    %394 = arith.truncf %393 : vector<2x8x12xf32> to vector<2x8x12xbf16>
    %395 = vector.shape_cast %390 : vector<16x12xf32> to vector<2x8x12xf32>
    %396 = arith.truncf %395 : vector<2x8x12xf32> to vector<2x8x12xbf16>
    "tpu.trace_start"() <{level = 10 : i32, message = "bqd,bkd->bqk"}> : () -> ()
    %cst_104 = arith.constant dense<0.000000e+00> : vector<2x8x8xf32>
    %397 = tpu.matmul %392, %394, %cst_104 {dimension_numbers = #tpu.dot_dimension_numbers<[2], [2], [1], [1], [0, 0, 0, 1, 1, 1], [0], [0]>} : vector<2x8x12xbf16>, vector<2x8x12xbf16>, vector<2x8x8xf32> -> vector<2x8x8xf32>
    "tpu.trace_stop"() : () -> ()
    %cst_105 = arith.constant dense<0xFF800000> : vector<2x8xf32>
    %398 = vector.multi_reduction <maximumf>, %397, %cst_105 [2] : vector<2x8x8xf32> to vector<2x8xf32>
    %399 = vector.shape_cast %398 : vector<2x8xf32> to vector<2x8x1xf32>
    %400 = vector.broadcast %399 : vector<2x8x1xf32> to vector<2x8x8xf32>
    %401 = arith.subf %397, %400 : vector<2x8x8xf32>
    %402 = math.exp %401 : vector<2x8x8xf32>
    %cst_106 = arith.constant dense<0.000000e+00> : vector<2x8xf32>
    %403 = vector.multi_reduction <add>, %402, %cst_106 [2] : vector<2x8x8xf32> to vector<2x8xf32>
    %404 = vector.shape_cast %403 : vector<2x8xf32> to vector<2x8x1xf32>
    %405 = tpu.reciprocal %404 {approx = true} : vector<2x8x1xf32> -> vector<2x8x1xf32>
    %406 = vector.broadcast %405 : vector<2x8x1xf32> to vector<2x8x8xf32>
    %407 = arith.mulf %402, %406 : vector<2x8x8xf32>
    %408 = arith.truncf %407 : vector<2x8x8xf32> to vector<2x8x8xbf16>
    "tpu.trace_start"() <{level = 10 : i32, message = "bqk,bkd->bqd"}> : () -> ()
    %cst_107 = arith.constant dense<0.000000e+00> : vector<2x8x12xf32>
    %409 = tpu.matmul %408, %396, %cst_107 {dimension_numbers = #tpu.dot_dimension_numbers<[2], [1], [1], [2], [0, 0, 0, 1, 1, 2], [0], [0]>} : vector<2x8x8xbf16>, vector<2x8x12xbf16>, vector<2x8x12xf32> -> vector<2x8x12xf32>
    "tpu.trace_stop"() : () -> ()
    %410 = vector.shape_cast %409 : vector<2x8x12xf32> to vector<16x12xf32>
    %411 = arith.truncf %410 : vector<16x12xf32> to vector<16x12xbf16>
    %c7 = arith.constant 7 : index
    %c0_108 = arith.constant 0 : index
    %c0_109 = arith.constant 0 : index
    %412 = vector.load %arg2[%c7, %c0_108, %c0_109] : memref<8x12x48xbf16, #tpu.memory_space<vmem>>, vector<1x12x48xbf16>
    %413 = vector.shape_cast %412 : vector<1x12x48xbf16> to vector<12x48xbf16>
    %cst_110 = arith.constant dense<0.000000e+00> : vector<16x48xf32>
    %414 = tpu.matmul %411, %413, %cst_110 {dimension_numbers = #tpu.dot_dimension_numbers<[1], [0], [0], [1], [0, 0, 1, 1], [], []>} : vector<16x12xbf16>, vector<12x48xbf16>, vector<16x48xf32> -> vector<16x48xf32>
    %415 = arith.addf %379, %414 : vector<16x48xf32>
    %416 = arith.addf %244, %415 : vector<16x48xf32>
    %c0_111 = arith.constant 0 : index
    %c2688 = arith.constant 2688 : index
    %417 = vector.load %arg5[%c0_111, %c2688] : memref<16x3712xf32, #tpu.memory_space<vmem>>, vector<16x48xf32>
    %418 = arith.addf %416, %417 : vector<16x48xf32>
    %c0_112 = arith.constant 0 : index
    %c2816 = arith.constant 2816 : index
    %419 = vector.load %arg5[%c0_112, %c2816] : memref<16x3712xf32, #tpu.memory_space<vmem>>, vector<16x48xf32>
    %c0_113 = arith.constant 0 : index
    %c2944 = arith.constant 2944 : index
    %420 = vector.load %arg5[%c0_113, %c2944] : memref<16x3712xf32, #tpu.memory_space<vmem>>, vector<16x48xf32>
    %cst_114 = arith.constant dense<0.000000e+00> : vector<16xf32>
    %421 = vector.multi_reduction <add>, %418, %cst_114 [1] : vector<16x48xf32> to vector<16xf32>
    %422 = vector.shape_cast %421 : vector<16xf32> to vector<16x1xf32>
    %cst_115 = arith.constant 4.800000e+01 : f32
    %423 = vector.broadcast %cst_115 : f32 to vector<16x1xf32>
    %424 = arith.divf %422, %423 : vector<16x1xf32>
    %425 = vector.broadcast %424 : vector<16x1xf32> to vector<16x48xf32>
    %426 = arith.subf %418, %425 : vector<16x48xf32>
    %427 = arith.mulf %426, %426 : vector<16x48xf32>
    %cst_116 = arith.constant dense<0.000000e+00> : vector<16xf32>
    %428 = vector.multi_reduction <add>, %427, %cst_116 [1] : vector<16x48xf32> to vector<16xf32>
    %429 = vector.shape_cast %428 : vector<16xf32> to vector<16x1xf32>
    %cst_117 = arith.constant 4.800000e+01 : f32
    %430 = vector.broadcast %cst_117 : f32 to vector<16x1xf32>
    %431 = arith.divf %429, %430 : vector<16x1xf32>
    %432 = vector.broadcast %424 : vector<16x1xf32> to vector<16x48xf32>
    %433 = arith.subf %418, %432 : vector<16x48xf32>
    %cst_118 = arith.constant 9.99999974E-6 : f32
    %434 = vector.broadcast %cst_118 : f32 to vector<16x1xf32>
    %435 = arith.addf %431, %434 : vector<16x1xf32>
    %436 = math.rsqrt %435 : vector<16x1xf32>
    %437 = vector.broadcast %436 : vector<16x1xf32> to vector<16x48xf32>
    %438 = arith.mulf %433, %437 : vector<16x48xf32>
    %439 = arith.mulf %438, %419 : vector<16x48xf32>
    %440 = arith.addf %439, %420 : vector<16x48xf32>
    %441 = arith.truncf %440 : vector<16x48xf32> to vector<16x48xbf16>
    %c1_119 = arith.constant 1 : index
    %c0_120 = arith.constant 0 : index
    %c0_121 = arith.constant 0 : index
    %442 = vector.load %arg3[%c1_119, %c0_120, %c0_121] : memref<2x48x256xbf16, #tpu.memory_space<vmem>>, vector<1x48x256xbf16>
    %443 = vector.shape_cast %442 : vector<1x48x256xbf16> to vector<48x256xbf16>
    %cst_122 = arith.constant dense<0.000000e+00> : vector<16x256xf32>
    %444 = tpu.matmul %441, %443, %cst_122 {dimension_numbers = #tpu.dot_dimension_numbers<[1], [0], [0], [1], [0, 0, 1, 1], [], []>} : vector<16x48xbf16>, vector<48x256xbf16>, vector<16x256xf32> -> vector<16x256xf32>
    %c0_123 = arith.constant 0 : index
    %c3072 = arith.constant 3072 : index
    %445 = vector.load %arg5[%c0_123, %c3072] : memref<16x3712xf32, #tpu.memory_space<vmem>>, vector<16x256xf32>
    %446 = arith.addf %444, %445 : vector<16x256xf32>
    %447 = vector.extract_strided_slice %446 {offsets = [0, 0], sizes = [16, 128], strides = [1, 1]} : vector<16x256xf32> to vector<16x128xf32>
    %448 = vector.extract_strided_slice %446 {offsets = [0, 128], sizes = [16, 128], strides = [1, 1]} : vector<16x256xf32> to vector<16x128xf32>
    %449 = arith.negf %447 : vector<16x128xf32>
    %450 = math.exp %449 : vector<16x128xf32>
    %cst_124 = arith.constant 1.000000e+00 : f32
    %451 = vector.broadcast %cst_124 : f32 to vector<16x128xf32>
    %452 = arith.addf %451, %450 : vector<16x128xf32>
    %453 = arith.divf %451, %452 : vector<16x128xf32>
    %454 = arith.mulf %447, %453 : vector<16x128xf32>
    %455 = arith.mulf %454, %448 : vector<16x128xf32>
    %c0_125 = arith.constant 0 : index
    %c3328 = arith.constant 3328 : index
    %456 = vector.load %arg5[%c0_125, %c3328] : memref<16x3712xf32, #tpu.memory_space<vmem>>, vector<16x128xf32>
    %c0_126 = arith.constant 0 : index
    %c3456 = arith.constant 3456 : index
    %457 = vector.load %arg5[%c0_126, %c3456] : memref<16x3712xf32, #tpu.memory_space<vmem>>, vector<16x128xf32>
    %cst_127 = arith.constant dense<0.000000e+00> : vector<16xf32>
    %458 = vector.multi_reduction <add>, %455, %cst_127 [1] : vector<16x128xf32> to vector<16xf32>
    %459 = vector.shape_cast %458 : vector<16xf32> to vector<16x1xf32>
    %cst_128 = arith.constant 1.280000e+02 : f32
    %460 = vector.broadcast %cst_128 : f32 to vector<16x1xf32>
    %461 = arith.divf %459, %460 : vector<16x1xf32>
    %462 = vector.broadcast %461 : vector<16x1xf32> to vector<16x128xf32>
    %463 = arith.subf %455, %462 : vector<16x128xf32>
    %464 = arith.mulf %463, %463 : vector<16x128xf32>
    %cst_129 = arith.constant dense<0.000000e+00> : vector<16xf32>
    %465 = vector.multi_reduction <add>, %464, %cst_129 [1] : vector<16x128xf32> to vector<16xf32>
    %466 = vector.shape_cast %465 : vector<16xf32> to vector<16x1xf32>
    %cst_130 = arith.constant 1.280000e+02 : f32
    %467 = vector.broadcast %cst_130 : f32 to vector<16x1xf32>
    %468 = arith.divf %466, %467 : vector<16x1xf32>
    %469 = vector.broadcast %461 : vector<16x1xf32> to vector<16x128xf32>
    %470 = arith.subf %455, %469 : vector<16x128xf32>
    %cst_131 = arith.constant 9.99999974E-6 : f32
    %471 = vector.broadcast %cst_131 : f32 to vector<16x1xf32>
    %472 = arith.addf %468, %471 : vector<16x1xf32>
    %473 = math.rsqrt %472 : vector<16x1xf32>
    %474 = vector.broadcast %473 : vector<16x1xf32> to vector<16x128xf32>
    %475 = arith.mulf %470, %474 : vector<16x128xf32>
    %476 = arith.mulf %475, %456 : vector<16x128xf32>
    %477 = arith.addf %476, %457 : vector<16x128xf32>
    %478 = arith.truncf %477 : vector<16x128xf32> to vector<16x128xbf16>
    %c1_132 = arith.constant 1 : index
    %c0_133 = arith.constant 0 : index
    %c0_134 = arith.constant 0 : index
    %479 = vector.load %arg4[%c1_132, %c0_133, %c0_134] : memref<2x128x48xbf16, #tpu.memory_space<vmem>>, vector<1x128x48xbf16>
    %480 = vector.shape_cast %479 : vector<1x128x48xbf16> to vector<128x48xbf16>
    %cst_135 = arith.constant dense<0.000000e+00> : vector<16x48xf32>
    %481 = tpu.matmul %478, %480, %cst_135 {dimension_numbers = #tpu.dot_dimension_numbers<[1], [0], [0], [1], [0, 0, 1, 1], [], []>} : vector<16x128xbf16>, vector<128x48xbf16>, vector<16x48xf32> -> vector<16x48xf32>
    %c0_136 = arith.constant 0 : index
    %c3584 = arith.constant 3584 : index
    %482 = vector.load %arg5[%c0_136, %c3584] : memref<16x3712xf32, #tpu.memory_space<vmem>>, vector<16x48xf32>
    %483 = arith.addf %481, %482 : vector<16x48xf32>
    %484 = arith.addf %418, %483 : vector<16x48xf32>
    %c0_137 = arith.constant 0 : index
    %c384 = arith.constant 384 : index
    %485 = vector.load %arg5[%c0_137, %c384] : memref<16x3712xf32, #tpu.memory_space<vmem>>, vector<16x48xf32>
    %c0_138 = arith.constant 0 : index
    %c512 = arith.constant 512 : index
    %486 = vector.load %arg5[%c0_138, %c512] : memref<16x3712xf32, #tpu.memory_space<vmem>>, vector<16x48xf32>
    %cst_139 = arith.constant dense<0.000000e+00> : vector<16xf32>
    %487 = vector.multi_reduction <add>, %484, %cst_139 [1] : vector<16x48xf32> to vector<16xf32>
    %488 = vector.shape_cast %487 : vector<16xf32> to vector<16x1xf32>
    %cst_140 = arith.constant 4.800000e+01 : f32
    %489 = vector.broadcast %cst_140 : f32 to vector<16x1xf32>
    %490 = arith.divf %488, %489 : vector<16x1xf32>
    %491 = vector.broadcast %490 : vector<16x1xf32> to vector<16x48xf32>
    %492 = arith.subf %484, %491 : vector<16x48xf32>
    %493 = arith.mulf %492, %492 : vector<16x48xf32>
    %cst_141 = arith.constant dense<0.000000e+00> : vector<16xf32>
    %494 = vector.multi_reduction <add>, %493, %cst_141 [1] : vector<16x48xf32> to vector<16xf32>
    %495 = vector.shape_cast %494 : vector<16xf32> to vector<16x1xf32>
    %cst_142 = arith.constant 4.800000e+01 : f32
    %496 = vector.broadcast %cst_142 : f32 to vector<16x1xf32>
    %497 = arith.divf %495, %496 : vector<16x1xf32>
    %498 = vector.broadcast %490 : vector<16x1xf32> to vector<16x48xf32>
    %499 = arith.subf %484, %498 : vector<16x48xf32>
    %cst_143 = arith.constant 9.99999974E-6 : f32
    %500 = vector.broadcast %cst_143 : f32 to vector<16x1xf32>
    %501 = arith.addf %497, %500 : vector<16x1xf32>
    %502 = math.rsqrt %501 : vector<16x1xf32>
    %503 = vector.broadcast %502 : vector<16x1xf32> to vector<16x48xf32>
    %504 = arith.mulf %499, %503 : vector<16x48xf32>
    %505 = arith.mulf %504, %485 : vector<16x48xf32>
    %506 = arith.addf %505, %486 : vector<16x48xf32>
    %c0_144 = arith.constant 0 : index
    %c0_145 = arith.constant 0 : index
    %507 = vector.load %arg6[%c0_144, %c0_145] : memref<16x48xf32, #tpu.memory_space<vmem>>, vector<16x48xf32>
    tpu.vector_store %arg6[%c0_144, %c0_145], %506 {strides = array<i32>} : memref<16x48xf32, #tpu.memory_space<vmem>>, vector<16x48xf32>,
    return
  }
}

</mosaic_0001>

<bundles_post_ra>
// kernel: tpu_custom_call.1
= control target key start
LH: loop header
LB: loop body
LE: loop exit
PB: predicated region body
PF: predicated region fallthrough
CT: control target
= control target key end

     0   :  { %11 = vsyncpa [#allocation3], 0  ;;  %s5320_s0 = inlined_call_operand.vmem [shape: f32[16,48], index: 0, kind: input, shape index: {}]   ;;  %s5321_s1 = inlined_call_operand.vmem [shape: bf16[2,48,240], index: 1, kind: input, shape index: {}]   ;;  %s5322_s2 = inlined_call_operand.vmem [shape: bf16[8,12,48], index: 2, kind: input, shape index: {}]   ;;  %s5323_s3 = inlined_call_operand.vmem [shape: bf16[2,48,256], index: 3, kind: input, shape index: {}]   ;;  %s5324_s4 = inlined_call_operand.vmem [shape: bf16[2,128,48], index: 4, kind: input, shape index: {}]   ;;  %s5325_s5 = inlined_call_operand.hbm [shape: f32[16,3712], index: 5, kind: input, shape index: {}]   ;;  %s5326_s6 = inlined_call_operand.hbm [shape: f32[16,48], index: 6, kind: output, shape index: {}]  }
   0x1   :  { %12 = vsyncpa [#allocation4], 0  ;;  %s4311_s21 = smov [#allocation2]  }
   0x2   :  { %s28_s22 = sshll.u32 %s4311_s21, 4  ;;  %s29_s22 = int_to_ptr.vmem [resolvable:$true] %s28_s22 }
   0x3   :  { %s4275_s23 = scalar_lea.vmem %s29_s22, 7424  ;;  %p4280_p1 = scmp.lt.s32.totalorder %s29_s22, %s29_s22 }
   0x4   :  { %p4276_p0 = scmp.ne.s32.totalorder %s29_s22, %s4275_s23  ;;  %p4281_p2 = scmp.lt.s32.totalorder %s4275_s23, %s4275_s23 }
   0x6   :  { %p4282_p3 = por %p4281_p2, %p4280_p1 }
   0x8   :  { %p4283_p4 = pnand %p4282_p3, %p4276_p0 }
   0xa   :  { %4286 = shalt.err (!%p4283_p4)
}
   0xb   :  { %s4312_s24 = smov 3712   ;;  %s4313_s25 = smov 232  }
   0xc   :  { %34 = dma.hbm_to_vmem [thread:$0]  %s5325_s5, 7424, %s29_s22, [#allocation3], %s4312_s24, %s4312_s24, %s4313_s25  }
   0xd   :  { %4307 = dma.done.wait [#allocation3], 7424  }
   0xe   :  { %4308 = vsyncadd [#allocation3], 4294959872  ;;  %v39_v0 = vld [vmem:[%s5320_s0] sm:$0xff]  ;;  %vm53_vm0 = vcmask 392192   ;;  %v40_v2 = vld [vmem:[%s5320_s0 + $0x8] sm:$0xff]  ;;  %v4314_v22 = vmov 0  }
   0xf   :  { %v41_v1 = vld [vmem:[#allocation2] sm:$0xff]  ;;  %v42_v4 = vld [vmem:[#allocation2 + $0xe8] sm:$0xff]  ;;  %v4100_v20 = vld [vmem:[%s5321_s1 + $0x14] ss:$8 sps:$4 sm:$0xff]   ;;  %161 = vmatprep.mubr.bf16.mxu1 %v4314_v22  ;;  %s4315_s18 = smov 36   ;;  %s4316_s19 = smov 12  }
  0x10   :  { %v4386_v3 = vadd.f32 %v41_v1, %v39_v0  ;;  %v4388_v5 = vadd.f32 %v42_v4, %v40_v2  ;;  %v4097_v18 = vld [vmem:[%s5321_s1 + $0x24] ss:$8 sps:$4 sm:$0xff]   ;;  %v4099_v19 = vld [vmem:[%s5321_s1 + $0x20] ss:$8 sps:$4 sm:$0xff]   ;;  %v4102_v21 = vld [vmem:[%s5321_s1 + $0x10] ss:$8 sps:$4 sm:$0xff]  }
  0x11   :  { %139 = vmatprep.subr.bf16.mxu1 %v4097_v18  ;;  %v4103_v23 = vld [vmem:[%s5321_s1 + $0x4] ss:$8 sps:$4 sm:$0xff]   ;;  %v4105_v24 = vld [vmem:[%s5321_s1] ss:$8 sps:$4 sm:$0xff]   ;;  %v4417_v25 = vld [vmem:[#allocation2 + $0x10] sm:$0xff]  ;;  %s4317_s20 = smov 24  }
  0x12   :  { %v54_v6 = vsel %vm53_vm0, %v4386_v3, 0.0  ;;  %v57_v7 = vsel %vm53_vm0, %v4388_v5, 0.0  ;;  %140 = vmatpush1.bf16.msra.mxu1 %v4099_v19  ;;  %v4419_v26 = vld [vmem:[#allocation2 + $0xf8] sm:$0xff]  ;;  %v4423_v27 = vld [vmem:[#allocation2 + $0x8] sm:$0xff]  ;;  %v50_v38 = vld [vmem:[#allocation2 + $0x110] sm:$0xff]  ;;  %s4318_s21 = smov 116  }
  0x13   :  { %55 = vadd.xlane.f32.xlu0 %v54_v6  ;;  %141 = vmatprep.subr.bf16.mxu1 %v4100_v20  ;;  %v49_v36 = vld [vmem:[#allocation2 + $0x28] sm:$0xff]  ;;  %v51_v41 = vld [vmem:[#allocation2 + $0x30] sm:$0xff]  ;;  %v52_v42 = vld [vmem:[#allocation2 + $0x118] sm:$0xff]  ;;  %v4319_v61 = vmov 0.0   ;;  %vm4320_vm1 = vmmov 0   ;;  %s4321_s22 = smov 104  }
  0x14   :  { %v92_v47 = vld [vmem:[#allocation2 + $0x38] sm:$0xff]  ;;  %v94_v52 = vld [vmem:[#allocation2 + $0x120] sm:$0xff]  ;;  %v4445_v58 = vld [vmem:[#allocation2 + $0xf0] sm:$0xff]  ;;  %3798 = vmatprep.subr.bf16.mxu0 %v4319_v61  ;;  %3800 = vmatprep.mubr.msk.bf16.mxu0 %vm4320_vm1, %v4319_v61  ;;  %s4322_s23 = smov 96   ;;  %vm231_vm2 = vcmask 97280   ;;  %vm327_vm3 = vcmask 64512  }
  0x15   :  { %s4323_s24 = smov 72   ;;  %s4324_s25 = smov 84   ;;  %vm358_vm4 = vcmask 1043456   ;;  %vm746_vm5 = vcmask 1045504  }
  0x16   :  { %142 = vmatpush1.bf16.msra.mxu1 %v4102_v21  ;;  %s4325_s26 = smov 60   ;;  %s4326_s27 = smov 80  }
  0x17   :  { %58 = vadd.xlane.f32.xlu0 %v57_v7  ;;  %143 = vmatprep.subr.bf16.mxu1 %v4103_v23  ;;  %s4327_s28 = smov 44   ;;  %s4328_s29 = smov 68  }
  0x18   :  { %s4329_s30 = smov 20   ;;  %s4330_s7 = smov 28  }
  0x19   :  { %s4331_s0 = smov 4   ;;  %s4332_s5 = smov 16  }
  0x1a   :  { %144 = vmatpush1.bf16.msra.mxu1 %v4105_v24  ;;  %s4333_s8 = smov 120   ;;  %s4334_s9 = smov 112  }
  0x1b   :  { %3786 = vmatprep.subr.bf16.mxu1 %v4319_v61  ;;  %s4335_s14 = smov 8   ;;  %s4336_s15 = smov 88  }
  0x1c   :  { %s4337_s16 = smov 64   ;;  %s4338_s17 = smov 76  }
  0x2d   :  { %204 = vrot.lane.b32.xlu0 %v4417_v25, %s4315_s18 }
  0x31   :  { %176 = vrot.lane.b32.xlu0 %v4417_v25, %s4316_s19 }
  0x9c   :  { %v56_v8 = vpop.xlane.xlu0 %55 }
  0x9d   :  { %v61_v9 = vmul.f32 0.020833334, %v56_v8 }
  0x9f   :  { %v63_v10 = vsub.f32 %v4386_v3, %v61_v9 }
  0xa0   :  { %v59_v11 = vpop.xlane.xlu0 %58 }
  0xa1   :  { %v62_v12 = vmul.f32 0.020833334, %v59_v11  ;;  %v65_v13 = vmul.f32 %v63_v10, %v63_v10 }
  0xa3   :  { %v64_v14 = vsub.f32 %v4388_v5, %v62_v12  ;;  %v67_v15 = vsel %vm53_vm0, %v65_v13, 0.0 }
  0xa4   :  { %68 = vadd.xlane.f32.xlu1 %v67_v15  ;;  %v4432_v50 = vpop.permute.xlu0 %204 }
  0xa5   :  { %v66_v16 = vmul.f32 %v64_v14, %v64_v14 }
  0xa7   :  { %v70_v17 = vsel %vm53_vm0, %v66_v16, 0.0 }
  0xa8   :  { %71 = vadd.xlane.f32.xlu1 %v70_v17  ;;  %v4450_v59 = vpop.permute.xlu0 %176 }
  0xb9   :  { %206 = vrot.lane.b32.xlu1 %v4419_v26, %s4315_s18  ;;  %s4339_s18 = smov 52  }
  0xbd   :  { %196 = vrot.lane.b32.xlu1 %v4423_v27, %s4317_s20 }
 0x12d   :  { %v69_v28 = vpop.xlane.xlu1 %68 }
 0x12e   :  { %v73_v29 = vmul.f32 0.020833334, %v69_v28 }
 0x130   :  { %v75_v30 = vadd.f32 1e-05, %v73_v29 }
 0x131   :  { %v72_v31 = vpop.xlane.xlu1 %71 }
 0x132   :  { %4157 = vrsqrt.f32 %v75_v30  ;;  %v74_v32 = vmul.f32 0.020833334, %v72_v31 }
 0x134   :  { %v76_v33 = vadd.f32 1e-05, %v74_v32 }
 0x135   :  { %v4441_v56 = vpop.permute.xlu1 %206 }
 0x136   :  { %4159 = vrsqrt.f32 %v76_v33 }
 0x139   :  { %v4459_v62 = vpop.permute.xlu1 %196 }
 0x13f   :  { %v4158_v34 = vpop.eup %4157 }
 0x140   :  { %v79_v35 = vmul.f32 %v4158_v34, %v63_v10 }
 0x142   :  { %v81_v40 = vmul.f32 %v79_v35, %v49_v36 }
 0x143   :  { %v4160_v37 = vpop.eup %4159 }
 0x144   :  { %v80_v39 = vmul.f32 %v4160_v37, %v64_v14  ;;  %v83_v44 = vadd.f32 %v81_v40, %v51_v41 }
 0x146   :  { %v82_v43 = vmul.f32 %v80_v39, %v50_v38 }
 0x148   :  { %v84_v45 = vadd.f32 %v82_v43, %v52_v42 }
 0x14a   :  { %v85_v46 = vpack.c.bf16 %v84_v45, %v83_v44 }
 0x14c   :  { %3556 = vmatmul.mubr.msk.bf16.vlgmr.msra.gmra.mxu1 %vm53_vm0, %v85_v46 }
 0x14d   :  { %3788 = vmatprep.mubr.msk.bf16.mxu1 %vm4320_vm1, %v4319_v61 }
 0x20c   :  { %v163_v48 = vpop.f32.mrf.mxu1 }
 0x20d   :  { %v4430_v49 = vadd.f32 %v163_v48, %v92_v47 }
 0x20e   :  { %v4434_v51 = vpop.f32.mrf.mxu1 }
 0x20f   :  { %v210_v53 = vmul.f32 %v4432_v50, %v4430_v49  ;;  %v182_v60 = vmul.f32 %v4450_v59, %v4430_v49  ;;  %v202_v63 = vmul.f32 %v4459_v62, %v4430_v49  ;;  %v172_v14 = vmul.f32 %v4430_v49, %v4423_v27 }
 0x210   :  { %v167_v54 = vpop.f32.mrf.mxu1  ;;  %v4521_v47 = vpack.c.bf16 %v4430_v49, %v4430_v49 }
 0x211   :  { %v4438_v55 = vadd.f32 %v167_v54, %v94_v52  ;;  %214 = vrot.lane.b32.xlu1 %v210_v53, %s4318_s21 }
 0x212   :  { %v4494_v28 = vpop.f32.mrf.mxu1 }
 0x213   :  { %v211_v57 = vmul.f32 %v4441_v56, %v4438_v55  ;;  %v173_v20 = vmul.f32 %v4438_v55, %v4445_v58  ;;  %v4532_v54 = vpack.c.bf16 %v4438_v55, %v4438_v55 }
 0x215   :  { %216 = vrot.lane.b32.xlu0 %v211_v57, %s4318_s21  ;;  %198 = vrot.lane.b32.xlu1 %v4445_v58, %s4317_s20 }
 0x219   :  { %178 = vrot.lane.b32.xlu1 %v4419_v26, %s4316_s19 }
 0x21d   :  { %186 = vrot.lane.b32.xlu1 %v182_v60, %s4318_s21 }
 0x283   :  { %v215_v0 = vpop.permute.xlu1 %214 }
 0x284   :  { %v220_v1 = vadd.f32 %v215_v0, %v202_v63 }
 0x286   :  { %v224_v2 = vpack.c.bf16 %v220_v1, %v220_v1 }
 0x287   :  { %v4467_v4 = vpop.permute.xlu1 %198  ;;  %v217_v7 = vpop.permute.xlu0 %216 }
 0x288   :  { %v203_v6 = vmul.f32 %v4467_v4, %v4438_v55  ;;  %229 = vrot.lane.b32.xlu0 %v224_v2, %s4321_s22 }
 0x28a   :  { %v221_v8 = vadd.f32 %v217_v7, %v203_v6 }
 0x28b   :  { %v4472_v9 = vpop.permute.xlu1 %178 }
 0x28c   :  { %v225_v10 = vpack.c.bf16 %v221_v8, %v221_v8  ;;  %v183_v11 = vmul.f32 %v4472_v9, %v4438_v55 }
 0x28e   :  { %188 = vrot.lane.b32.xlu1 %v183_v11, %s4318_s21  ;;  %279 = vrot.lane.b32.xlu0 %v225_v10, %s4321_s22 }
 0x28f   :  { %v187_v12 = vpop.permute.xlu1 %186 }
 0x290   :  { %v192_v16 = vadd.f32 %v187_v12, %v172_v14 }
 0x292   :  { %490 = vrot.lane.b32.xlu1 %v4419_v26, %s4322_s23  ;;  %488 = vrot.lane.b32.xlu0 %v4417_v25, %s4322_s23  ;;  %v222_v18 = vpack.c.bf16 %v192_v16, %v192_v16 }
 0x2fa   :  { %v230_v13 = vpop.permute.xlu0 %229 }
 0x2fb   :  { %v236_v15 = vsel %vm231_vm2, %v230_v13, 0 }
 0x2fc   :  { %3787 = vmatpush3.bf16.xpose.msra.mxu1 %v236_v15 }
 0x2fd   :  { %3792 = vmatprep.subr.bf16.mxu1 %v4319_v61 }
 0x300   :  { %v280_v17 = vpop.permute.xlu0 %279  ;;  %v189_v19 = vpop.permute.xlu1 %188 }
 0x301   :  { %v285_v21 = vsel %vm231_vm2, %v280_v17, 0  ;;  %v193_v23 = vadd.f32 %v189_v19, %v173_v20 }
 0x303   :  { %3789 = vmatmul.mubr.msk.bf16.vlgmr.msra.gmra.mxu1 %vm231_vm2, %v222_v18  ;;  %v223_v24 = vpack.c.bf16 %v193_v23, %v193_v23 }
 0x304   :  { %3793 = vmatpush3.bf16.xpose.msra.mxu1 %v285_v21  ;;  %3794 = vmatprep.mubr.msk.bf16.mxu1 %vm4320_vm1, %v4319_v61  ;;  %v4499_v39 = vpop.permute.xlu0 %488  ;;  %v4503_v40 = vpop.permute.xlu1 %490 }
 0x305   :  { %3804 = vmatprep.subr.bf16.mxu1 %v4319_v61  ;;  %v494_v41 = vmul.f32 %v4499_v39, %v4430_v49  ;;  %v495_v42 = vmul.f32 %v4503_v40, %v4438_v55 }
 0x30b   :  { %3795 = vmatmul.mubr.msk.bf16.vlgmr.msra.gmra.mxu1 %vm231_vm2, %v223_v24 }
 0x30c   :  { %3806 = vmatprep.mubr.msk.bf16.mxu1 %vm4320_vm1, %v4319_v61 }
 0x3c3   :  { %v272_v29 = vpop.f32.mrf.mxu1 }
 0x3c4   :  { %v328_v30 = vsel %vm327_vm3, %v272_v29, -inf }
 0x3c5   :  { %329 = vmax.xlane.f32.xlu0 %v328_v30  ;;  %v3790_v31 = vpop.f32.mrf.mxu1 }
 0x3c7   :  { %v275_v32 = vpop.f32.mrf.mxu1 }
 0x3c9   :  { %v3791_v33 = vpop.f32.mrf.mxu1 }
 0x3cb   :  { %v321_v34 = vpop.f32.mrf.mxu1 }
 0x3cc   :  { %v331_v35 = vsel %vm327_vm3, %v321_v34, -inf }
 0x3cd   :  { %332 = vmax.xlane.f32.xlu1 %v331_v35  ;;  %v3796_v36 = vpop.f32.mrf.mxu1 }
 0x3cf   :  { %v324_v37 = vpop.f32.mrf.mxu1 }
 0x3d1   :  { %v3797_v38 = vpop.f32.mrf.mxu1 }
 0x3db   :  { %462 = vrot.lane.b32.xlu0 %v4417_v25, %s4323_s24 }
 0x3de   :  { %464 = vrot.lane.b32.xlu1 %v4419_v26, %s4323_s24 }
 0x3df   :  { %480 = vrot.lane.b32.xlu0 %v4423_v27, %s4324_s25 }
 0x3e2   :  { %482 = vrot.lane.b32.xlu1 %v4445_v58, %s4324_s25 }
 0x3e3   :  { %498 = vrot.lane.b32.xlu0 %v494_v41, %s4318_s21 }
 0x3e6   :  { %500 = vrot.lane.b32.xlu1 %v495_v42, %s4318_s21 }
 0x3e7   :  { %454 = vrot.lane.b32.xlu0 %v4423_v27, %s4325_s26 }
 0x3ea   :  { %456 = vrot.lane.b32.xlu1 %v4445_v58, %s4325_s26 }
 0x44e   :  { %v330_v43 = vpop.xlane.xlu0 %329 }
 0x44f   :  { %v334_v53 = vsub.f32 %v272_v29, %v330_v43 }
 0x451   :  { %v336_v57 = vmul.f32 1.442695, %v334_v53 }
 0x452   :  { %v4514_v44 = vpop.permute.xlu0 %462 }
 0x453   :  { %v468_v45 = vmul.f32 %v4514_v44, %v4430_v49  ;;  %4161 = vpow2.f32 %v336_v57 }
 0x455   :  { %472 = vrot.lane.b32.xlu0 %v468_v45, %s4318_s21 }
 0x456   :  { %v333_v46 = vpop.xlane.xlu1 %332  ;;  %v4537_v2 = vpop.permute.xlu0 %480 }
 0x457   :  { %v335_v60 = vsub.f32 %v321_v34, %v333_v46  ;;  %v486_v10 = vmul.f32 %v4537_v2, %v4430_v49 }
 0x459   :  { %353 = vrot.lane.b32.xlu0 %v4521_v47, %s4326_s27  ;;  %v338_v63 = vmul.f32 1.442695, %v335_v60 }
 0x45a   :  { %v4525_v48 = vpop.permute.xlu1 %464  ;;  %v499_v8 = vpop.permute.xlu0 %498 }
 0x45b   :  { %v469_v52 = vmul.f32 %v4525_v48, %v4438_v55  ;;  %4163 = vpow2.f32 %v338_v63  ;;  %v504_v12 = vadd.f32 %v499_v8, %v486_v10 }
 0x45d   :  { %474 = vrot.lane.b32.xlu1 %v469_v52, %s4318_s21  ;;  %v508_v13 = vpack.c.bf16 %v504_v12, %v504_v12 }
 0x45e   :  { %v4542_v11 = vpop.permute.xlu1 %482  ;;  %v4548_v18 = vpop.permute.xlu0 %454 }
 0x45f   :  { %v487_v15 = vmul.f32 %v4542_v11, %v4438_v55  ;;  %v460_v19 = vmul.f32 %v4548_v18, %v4430_v49 }
 0x460   :  { %v4162_v0 = vpop.eup %4161 }
 0x461   :  { %403 = vrot.lane.b32.xlu1 %v4532_v54, %s4326_s27  ;;  %v340_v1 = vsel %vm327_vm3, %v4162_v0, 0.0 }
 0x462   :  { %v501_v14 = vpop.permute.xlu1 %500 }
 0x463   :  { %v505_v16 = vadd.f32 %v501_v14, %v487_v15 }
 0x465   :  { %v509_v17 = vpack.c.bf16 %v505_v16, %v505_v16 }
 0x466   :  { %v4552_v24 = vpop.permute.xlu1 %456 }
 0x467   :  { %v461_v31 = vmul.f32 %v4552_v24, %v4438_v55 }
 0x468   :  { %v4164_v6 = vpop.eup %4163 }
 0x469   :  { %v343_v7 = vsel %vm327_vm3, %v4164_v6, 0.0 }
 0x478   :  { %341 = vadd.xlane.f32.xlu0 %v340_v1 }
 0x485   :  { %344 = vadd.xlane.f32.xlu1 %v343_v7 }
 0x48e   :  { %514 = vrot.lane.b32.xlu0 %v508_v13, %s4327_s28 }
 0x496   :  { %566 = vrot.lane.b32.xlu1 %v509_v17, %s4327_s28 }
 0x4c7   :  { %v473_v20 = vpop.permute.xlu0 %472 }
 0x4c8   :  { %v478_v21 = vadd.f32 %v473_v20, %v460_v19 }
 0x4ca   :  { %v506_v23 = vpack.c.bf16 %v478_v21, %v478_v21 }
 0x4cb   :  { %v354_v29 = vpop.permute.xlu0 %353 }
 0x4cc   :  { %511 = vrot.lane.b32.xlu0 %v506_v23, %s4328_s29  ;;  %v360_v30 = vsel %vm358_vm4, %v354_v29, 0 }
 0x4cd   :  { %3799 = vmatpush3.bf16.msra.mxu0 %v360_v30 }
 0x4ce   :  { %3810 = vmatprep.subr.bf16.mxu0 %v4319_v61 }
 0x4cf   :  { %v475_v32 = vpop.permute.xlu1 %474 }
 0x4d0   :  { %v479_v33 = vadd.f32 %v475_v32, %v461_v31 }
 0x4d2   :  { %v507_v34 = vpack.c.bf16 %v479_v33, %v479_v33 }
 0x4d3   :  { %v404_v35 = vpop.permute.xlu1 %403 }
 0x4d4   :  { %v409_v36 = vsel %vm358_vm4, %v404_v35, 0  ;;  %563 = vrot.lane.b32.xlu1 %v507_v34, %s4328_s29 }
 0x4d5   :  { %3805 = vmatpush3.bf16.msra.mxu1 %v409_v36 }
 0x4d6   :  { %3816 = vmatprep.subr.bf16.mxu1 %v4319_v61 }
 0x501   :  { %v342_v37 = vpop.xlane.xlu0 %341 }
 0x502   :  { %4165 = vrcp.f32 %v342_v37 }
 0x505   :  { %v515_v43 = vpop.permute.xlu0 %514 }
 0x506   :  { %v520_v46 = vsel %vm231_vm2, %v515_v43, 0  ;;  %v95_v43 = vld [vmem:[#allocation2 + $0x128] sm:$0xff] }
 0x50e   :  { %v345_v38 = vpop.xlane.xlu1 %344 }
 0x50f   :  { %v4166_v41 = vpop.eup %4165  ;;  %4167 = vrcp.f32 %v345_v38 }
 0x510   :  { %v348_v42 = vmul.f32 %v4166_v41, %v4162_v0 }
 0x512   :  { %v350_v45 = vpack.c.bf16 %v348_v42, %v348_v42  ;;  %v567_v57 = vpop.permute.xlu1 %566 }
 0x513   :  { %v572_v63 = vsel %vm231_vm2, %v567_v57, 0 }
 0x514   :  { %3801 = vmatmul.mubr.msk.bf16.vlgmr.msra.gmra.mxu0 %vm327_vm3, %v350_v45 }
 0x515   :  { %3811 = vmatpush3.bf16.xpose.msra.mxu0 %v520_v46  ;;  %3812 = vmatprep.mubr.msk.bf16.mxu0 %vm4320_vm1, %v4319_v61 }
 0x516   :  { %3822 = vmatprep.subr.bf16.mxu0 %v4319_v61 }
 0x51c   :  { %v4168_v52 = vpop.eup %4167 }
 0x51d   :  { %v349_v53 = vmul.f32 %v4168_v52, %v4164_v6  ;;  %v4601_v52 = vadd.f32 %v4494_v28, %v95_v43 }
 0x51f   :  { %v351_v60 = vpack.c.bf16 %v349_v53, %v349_v53 }
 0x521   :  { %3807 = vmatmul.mubr.msk.bf16.vlgmr.msra.gmra.mxu1 %vm327_vm3, %v351_v60 }
 0x522   :  { %3817 = vmatpush3.bf16.xpose.msra.mxu1 %v572_v63  ;;  %3818 = vmatprep.mubr.msk.bf16.mxu1 %vm4320_vm1, %v4319_v61 }
 0x523   :  { %3828 = vmatprep.subr.bf16.mxu1 %v4319_v61 }
 0x53e   :  { %v512_v0 = vpop.permute.xlu0 %511 }
 0x53f   :  { %3813 = vmatmul.mubr.msk.bf16.vlgmr.msra.gmra.mxu0 %vm231_vm2, %v512_v0 }
 0x540   :  { %3824 = vmatprep.mubr.msk.bf16.mxu0 %vm4320_vm1, %v4319_v61 }
 0x546   :  { %v564_v1 = vpop.permute.xlu1 %563 }
 0x547   :  { %3819 = vmatmul.mubr.msk.bf16.vlgmr.msra.gmra.mxu1 %vm231_vm2, %v564_v1 }
 0x548   :  { %3830 = vmatprep.mubr.msk.bf16.mxu1 %vm4320_vm1, %v4319_v61 }
 0x5d4   :  { %v4578_v6 = vpop.f32.mrf.mxu0 }
 0x5d6   :  { %v3802_v7 = vpop.f32.mrf.mxu0 }
 0x5d7   :  { %v93_v7 = vld [vmem:[#allocation2 + $0x40] sm:$0xff] }
 0x5d8   :  { %v399_v8 = vpop.f32.mrf.mxu0 }
 0x5d9   :  { %v4621_v8 = vadd.f32 %v4434_v51, %v93_v7 }
 0x5da   :  { %v3803_v10 = vpop.f32.mrf.mxu0 }
 0x5e1   :  { %v4580_v12 = vpop.f32.mrf.mxu1 }
 0x5e2   :  { %v451_v13 = vpack.c.bf16 %v4580_v12, %v4578_v6 }
 0x5e3   :  { %v3808_v14 = vpop.f32.mrf.mxu1 }
 0x5e5   :  { %v448_v15 = vpop.f32.mrf.mxu1 }
 0x5e7   :  { %v3809_v16 = vpop.f32.mrf.mxu1 }
 0x5ff   :  { %v556_v17 = vpop.f32.mrf.mxu0 }
 0x600   :  { %v614_v19 = vsel %vm327_vm3, %v556_v17, -inf }
 0x601   :  { %615 = vmax.xlane.f32.xlu0 %v614_v19  ;;  %v3814_v20 = vpop.f32.mrf.mxu0 }
 0x603   :  { %v559_v21 = vpop.f32.mrf.mxu0 }
 0x605   :  { %v3815_v23 = vpop.f32.mrf.mxu0 }
 0x607   :  { %v608_v29 = vpop.f32.mrf.mxu1 }
 0x608   :  { %v617_v30 = vsel %vm327_vm3, %v608_v29, -inf }
 0x609   :  { %618 = vmax.xlane.f32.xlu1 %v617_v30  ;;  %v3820_v31 = vpop.f32.mrf.mxu1 }
 0x60b   :  { %v611_v32 = vpop.f32.mrf.mxu1 }
 0x60d   :  { %v3821_v33 = vpop.f32.mrf.mxu1 }
 0x61a   :  { %686 = vrot.lane.b32.xlu1 %v4532_v54, %s4329_s30 }
 0x61e   :  { %881 = vrot.lane.b32.xlu1 %v4417_v25, %s4330_s7 }
 0x622   :  { %883 = vrot.lane.b32.xlu1 %v4419_v26, %s4330_s7 }
 0x626   :  { %855 = vrot.lane.b32.xlu1 %v4419_v26, %s4331_s0 }
 0x62a   :  { %875 = vrot.lane.b32.xlu1 %v4445_v58, %s4332_s5 }
 0x68a   :  { %v616_v34 = vpop.xlane.xlu0 %615 }
 0x68b   :  { %v620_v35 = vsub.f32 %v556_v17, %v616_v34  ;;  %v4106_v34 = vld [vmem:[%s5322_s2] sm:$0x3f]  }
 0x68d   :  { %v622_v36 = vmul.f32 1.442695, %v620_v35 }
 0x68f   :  { %4169 = vpow2.f32 %v622_v36 }
 0x692   :  { %v619_v54 = vpop.xlane.xlu1 %618 }
 0x693   :  { %v621_v37 = vsub.f32 %v608_v29, %v619_v54 }
 0x695   :  { %v624_v38 = vmul.f32 1.442695, %v621_v37 }
 0x696   :  { %v687_v41 = vpop.permute.xlu1 %686 }
 0x697   :  { %4171 = vpow2.f32 %v624_v38  ;;  %v692_v42 = vsel %vm358_vm4, %v687_v41, 0 }
 0x698   :  { %3829 = vmatpush3.bf16.msra.mxu1 %v692_v42  ;;  %v800_v42 = vsel %vm746_vm5, %v4106_v34, 0 }
 0x699   :  { %3840 = vmatprep.subr.bf16.mxu1 %v4319_v61 }
 0x69a   :  { %v4598_v45 = vpop.permute.xlu1 %881 }
 0x69b   :  { %v887_v10 = vmul.f32 %v4598_v45, %v4621_v8 }
 0x69c   :  { %v4170_v46 = vpop.eup %4169 }
 0x69d   :  { %v626_v53 = vsel %vm327_vm3, %v4170_v46, 0.0 }
 0x69e   :  { %v4604_v57 = vpop.permute.xlu1 %883  ;;  %627 = vadd.xlane.f32.xlu0 %v626_v53 }
 0x69f   :  { %v888_v60 = vmul.f32 %v4604_v57, %v4601_v52 }
 0x6a1   :  { %893 = vrot.lane.b32.xlu1 %v888_v60, %s4318_s21 }
 0x6a2   :  { %v4609_v0 = vpop.permute.xlu1 %855 }
 0x6a3   :  { %v860_v28 = vmul.f32 %v4609_v0, %v4601_v52 }
 0x6a4   :  { %v4172_v63 = vpop.eup %4171 }
 0x6a5   :  { %845 = vrot.lane.b32.xlu1 %v4445_v58, %s4333_s8  ;;  %v629_v1 = vsel %vm327_vm3, %v4172_v63, 0.0 }
 0x6a6   :  { %630 = vadd.xlane.f32.xlu0 %v629_v1  ;;  %v4629_v14 = vpop.permute.xlu1 %875 }
 0x6a9   :  { %865 = vrot.lane.b32.xlu1 %v860_v28, %s4318_s21 }
 0x6bc   :  { %638 = vrot.lane.b32.xlu0 %v4521_v47, %s4329_s30  ;;  %v880_v47 = vmul.f32 %v4629_v14, %v4601_v52 }
 0x6c0   :  { %853 = vrot.lane.b32.xlu0 %v4417_v25, %s4331_s0 }
 0x6c4   :  { %873 = vrot.lane.b32.xlu0 %v4423_v27, %s4332_s5 }
 0x6c8   :  { %891 = vrot.lane.b32.xlu0 %v887_v10, %s4318_s21 }
 0x6cc   :  { %843 = vrot.lane.b32.xlu0 %v4423_v27, %s4333_s8 }
 0x713   :  { %v894_v15 = vpop.permute.xlu1 %893 }
 0x714   :  { %v898_v16 = vadd.f32 %v894_v15, %v880_v47 }
 0x716   :  { %v904_v17 = vpack.c.bf16 %v898_v16, %v898_v16 }
 0x717   :  { %v4666_v53 = vpop.permute.xlu1 %845 }
 0x718   :  { %972 = vrot.lane.b32.xlu1 %v904_v17, %s4334_s9  ;;  %v851_v10 = vmul.f32 %v4666_v53, %v4438_v55  ;;  %v852_v47 = vmul.f32 %v4666_v53, %v4601_v52 }
 0x727   :  { %v628_v51 = vpop.xlane.xlu0 %627 }
 0x728   :  { %4173 = vrcp.f32 %v628_v51 }
 0x72f   :  { %v631_v19 = vpop.xlane.xlu0 %630 }
 0x730   :  { %4175 = vrcp.f32 %v631_v19 }
 0x733   :  { %v639_v20 = vpop.permute.xlu0 %638 }
 0x734   :  { %v644_v21 = vsel %vm358_vm4, %v639_v20, 0 }
 0x735   :  { %v4174_v23 = vpop.eup %4173  ;;  %3823 = vmatpush3.bf16.msra.mxu0 %v644_v21 }
 0x736   :  { %v634_v29 = vmul.f32 %v4174_v23, %v4170_v46  ;;  %3834 = vmatprep.subr.bf16.mxu0 %v4319_v61  ;;  %v4107_v46 = vld [vmem:[%s5322_s2 + $0x8] sm:$0x3f]  }
 0x737   :  { %v4636_v30 = vpop.permute.xlu0 %853  ;;  %v748_v60 = vsel %vm746_vm5, %v4107_v46, 0 }
 0x738   :  { %v859_v31 = vmul.f32 %v4636_v30, %v4621_v8  ;;  %v636_v32 = vpack.c.bf16 %v634_v29, %v634_v29 }
 0x73a   :  { %3825 = vmatmul.mubr.msk.bf16.vlgmr.msra.gmra.mxu0 %vm327_vm3, %v636_v32  ;;  %863 = vrot.lane.b32.xlu0 %v859_v31, %s4318_s21 }
 0x73b   :  { %v4642_v33 = vpop.permute.xlu0 %873  ;;  %3836 = vmatprep.mubr.msk.bf16.mxu0 %vm4320_vm1, %v4319_v61  ;;  %3835 = vmatpush3.bf16.msra.mxu0 %v748_v60 }
 0x73c   :  { %v879_v36 = vmul.f32 %v4642_v33, %v4621_v8  ;;  %3846 = vmatprep.subr.bf16.mxu0 %v4319_v61 }
 0x73d   :  { %v4176_v35 = vpop.eup %4175 }
 0x73e   :  { %v635_v54 = vmul.f32 %v4176_v35, %v4172_v63  ;;  %v866_v63 = vpop.permute.xlu1 %865 }
 0x73f   :  { %v892_v37 = vpop.permute.xlu0 %891  ;;  %v871_v17 = vadd.f32 %v866_v63, %v851_v10  ;;  %v872_v51 = vadd.f32 %v866_v63, %v852_v47 }
 0x740   :  { %v897_v38 = vadd.f32 %v892_v37, %v879_v36  ;;  %v637_v41 = vpack.c.bf16 %v635_v54, %v635_v54 }
 0x741   :  { %v901_v21 = vpack.c.bf16 %v871_v17, %v871_v17 }
 0x742   :  { %v903_v43 = vpack.c.bf16 %v897_v38, %v897_v38  ;;  %3831 = vmatmul.mubr.msk.bf16.vlgmr.msra.gmra.mxu1 %vm327_vm3, %v637_v41 }
 0x743   :  { %3841 = vmatpush3.bf16.msra.mxu1 %v800_v42  ;;  %3842 = vmatprep.mubr.msk.bf16.mxu1 %vm4320_vm1, %v4319_v61  ;;  %v4672_v12 = vpop.permute.xlu0 %843 }
 0x744   :  { %916 = vrot.lane.b32.xlu0 %v903_v43, %s4334_s9  ;;  %3852 = vmatprep.subr.bf16.mxu1 %v4319_v61  ;;  %v850_v28 = vmul.f32 %v4672_v12, %v4621_v8 }
 0x74a   :  { %3843 = vmatmul.mubr.msk.bf16.vlgmr.msra.gmra.mxu1 %vm231_vm2, %v451_v13  ;;  %v849_v13 = vmul.f32 %v4672_v12, %v4430_v49  ;;  %v902_v49 = vpack.c.bf16 %v872_v51, %v872_v51 }
 0x74b   :  { %3854 = vmatprep.mubr.msk.bf16.mxu1 %vm4320_vm1, %v4319_v61 }
 0x78a   :  { %v973_v1 = vpop.permute.xlu1 %972 }
 0x78b   :  { %v978_v6 = vsel %vm231_vm2, %v973_v1, 0 }
 0x78c   :  { %3853 = vmatpush3.bf16.xpose.msra.mxu1 %v978_v6 }
 0x78d   :  { %3864 = vmatprep.subr.bf16.mxu1 %v4319_v61 }
 0x7ac   :  { %v864_v7 = vpop.permute.xlu0 %863 }
 0x7ad   :  { %v869_v15 = vadd.f32 %v864_v7, %v849_v13  ;;  %v870_v16 = vadd.f32 %v864_v7, %v850_v28 }
 0x7af   :  { %v900_v19 = vpack.c.bf16 %v870_v16, %v870_v16  ;;  %v899_v20 = vpack.c.bf16 %v869_v15, %v869_v15 }
 0x7b1   :  { %911 = vrot.lane.b32.xlu1 %v900_v19, %s4335_s14  ;;  %909 = vrot.lane.b32.xlu0 %v899_v20, %s4335_s14 }
 0x7b5   :  { %968 = vrot.lane.b32.xlu1 %v902_v49, %s4335_s14  ;;  %966 = vrot.lane.b32.xlu0 %v901_v21, %s4335_s14 }
 0x7b6   :  { %v917_v32 = vpop.permute.xlu0 %916 }
 0x7b7   :  { %v922_v54 = vsel %vm231_vm2, %v917_v32, 0 }
 0x7fa   :  { %v680_v55 = vpop.f32.mrf.mxu0 }
 0x7fc   :  { %v3826_v23 = vpop.f32.mrf.mxu0 }
 0x7fe   :  { %v683_v29 = vpop.f32.mrf.mxu0 }
 0x800   :  { %v3827_v31 = vpop.f32.mrf.mxu0 }
 0x801   :  { %v4711_v31 = vpack.c.bf16 %v4601_v52, %v4601_v52 }
 0x802   :  { %v728_v34 = vpop.f32.mrf.mxu1 }
 0x803   :  { %v734_v35 = vpack.c.bf16 %v728_v34, %v680_v55 }
 0x804   :  { %v3832_v36 = vpop.f32.mrf.mxu1 }
 0x805   :  { %3837 = vmatmul.mubr.msk.bf16.vlgmr.msra.gmra.mxu0 %vm231_vm2, %v734_v35 }
 0x806   :  { %3847 = vmatpush3.bf16.xpose.msra.mxu0 %v922_v54  ;;  %v731_v37 = vpop.f32.mrf.mxu1  ;;  %3848 = vmatprep.mubr.msk.bf16.mxu0 %vm4320_vm1, %v4319_v61 }
 0x807   :  { %3858 = vmatprep.subr.bf16.mxu0 %v4319_v61 }
 0x808   :  { %v3833_v38 = vpop.f32.mrf.mxu1 }
 0x80a   :  { %v4691_v41 = vpop.f32.mrf.mxu1 }
 0x80c   :  { %v3844_v42 = vpop.f32.mrf.mxu1 }
 0x80e   :  { %v4693_v43 = vpop.f32.mrf.mxu1 }
 0x810   :  { %v3845_v46 = vpop.f32.mrf.mxu1 }
 0x823   :  { %v912_v60 = vpop.permute.xlu1 %911  ;;  %v910_v63 = vpop.permute.xlu0 %909 }
 0x824   :  { %v914_v1 = vsel %vm327_vm3, %v910_v63, %v912_v60 }
 0x825   :  { %3849 = vmatmul.mubr.msk.bf16.vlgmr.msra.gmra.mxu0 %vm231_vm2, %v914_v1 }
 0x826   :  { %3860 = vmatprep.mubr.msk.bf16.mxu0 %vm4320_vm1, %v4319_v61 }
 0x827   :  { %v969_v6 = vpop.permute.xlu1 %968  ;;  %v967_v13 = vpop.permute.xlu0 %966 }
 0x828   :  { %v970_v28 = vsel %vm327_vm3, %v967_v13, %v969_v6 }
 0x829   :  { %3855 = vmatmul.mubr.msk.bf16.vlgmr.msra.gmra.mxu1 %vm231_vm2, %v970_v28 }
 0x82a   :  { %3866 = vmatprep.mubr.msk.bf16.mxu1 %vm4320_vm1, %v4319_v61 }
 0x8c5   :  { %v4703_v7 = vpop.f32.mrf.mxu0 }
 0x8c7   :  { %v3838_v10 = vpop.f32.mrf.mxu0 }
 0x8c9   :  { %v4705_v47 = vpop.f32.mrf.mxu0 }
 0x8cb   :  { %v3839_v15 = vpop.f32.mrf.mxu0 }
 0x8cc   :  { %v4743_v15 = vpack.c.bf16 %v4621_v8, %v4621_v8 }
 0x8e5   :  { %v958_v16 = vpop.f32.mrf.mxu0 }
 0x8e6   :  { %v1020_v17 = vsel %vm327_vm3, %v958_v16, -inf }
 0x8e7   :  { %1021 = vmax.xlane.f32.xlu0 %v1020_v17  ;;  %v3850_v51 = vpop.f32.mrf.mxu0 }
 0x8e9   :  { %v961_v19 = vpop.f32.mrf.mxu0  ;;  %v1014_v20 = vpop.f32.mrf.mxu1 }
 0x8ea   :  { %v1023_v49 = vsel %vm327_vm3, %v1014_v20, -inf }
 0x8eb   :  { %1024 = vmax.xlane.f32.xlu1 %v1023_v49  ;;  %v3851_v21 = vpop.f32.mrf.mxu0  ;;  %v3856_v55 = vpop.f32.mrf.mxu1 }
 0x8ed   :  { %v1017_v23 = vpop.f32.mrf.mxu1 }
 0x8ef   :  { %v3857_v29 = vpop.f32.mrf.mxu1 }
 0x8fc   :  { %1094 = vrot.lane.b32.xlu1 %v4711_v31, %s4336_s15 }
 0x900   :  { %1234 = vrot.lane.b32.xlu1 %v4417_v25, %s4336_s15 }
 0x904   :  { %1236 = vrot.lane.b32.xlu1 %v4419_v26, %s4336_s15 }
 0x908   :  { %1210 = vrot.lane.b32.xlu1 %v4419_v26, %s4337_s16 }
 0x90c   :  { %1228 = vrot.lane.b32.xlu1 %v4445_v58, %s4338_s17 }
 0x970   :  { %v1022_v32 = vpop.xlane.xlu0 %1021 }
 0x971   :  { %v1026_v34 = vsub.f32 %v958_v16, %v1022_v32 }
 0x973   :  { %v1028_v54 = vmul.f32 1.442695, %v1026_v34 }
 0x974   :  { %v1025_v35 = vpop.xlane.xlu1 %1024 }
 0x975   :  { %v1027_v36 = vsub.f32 %v1014_v20, %v1025_v35 }
 0x977   :  { %v1030_v37 = vmul.f32 1.442695, %v1027_v36 }
 0x978   :  { %v1095_v38 = vpop.permute.xlu1 %1094 }
 0x979   :  { %4177 = vpow2.f32 %v1030_v37  ;;  %v1100_v42 = vsel %vm358_vm4, %v1095_v38, 0 }
 0x97a   :  { %3865 = vmatpush3.bf16.msra.mxu1 %v1100_v42  ;;  %4179 = vpow2.f32 %v1028_v54 }
 0x97b   :  { %3876 = vmatprep.subr.bf16.mxu1 %v4319_v61 }
 0x97c   :  { %v4725_v46 = vpop.permute.xlu1 %1234 }
 0x980   :  { %v4727_v26 = vpop.permute.xlu1 %1236 }
 0x981   :  { %v1241_v60 = vmul.f32 %v4727_v26, %v4601_v52 }
 0x983   :  { %1246 = vrot.lane.b32.xlu1 %v1241_v60, %s4318_s21 }
 0x984   :  { %v4732_v1 = vpop.permute.xlu1 %1210 }
 0x985   :  { %v1215_v28 = vmul.f32 %v4732_v1, %v4601_v52 }
 0x986   :  { %v4178_v63 = vpop.eup %4177 }
 0x987   :  { %1202 = vrot.lane.b32.xlu1 %v4445_v58, %s4339_s18  ;;  %v1035_v6 = vsel %vm327_vm3, %v4178_v63, 0.0  ;;  %v4180_v13 = vpop.eup %4179  ;;  %v1240_v58 = vmul.f32 %v4725_v46, %v4621_v8 }
 0x988   :  { %1036 = vadd.xlane.f32.xlu0 %v1035_v6  ;;  %v1032_v10 = vsel %vm327_vm3, %v4180_v13, 0.0  ;;  %v4756_v16 = vpop.permute.xlu1 %1228 }
 0x989   :  { %v1233_v17 = vmul.f32 %v4756_v16, %v4601_v52 }
 0x98b   :  { %1220 = vrot.lane.b32.xlu1 %v1215_v28, %s4318_s21 }
 0x98c   :  { %1033 = vadd.xlane.f32.xlu0 %v1032_v10 }
 0x9a2   :  { %1045 = vrot.lane.b32.xlu0 %v4743_v15, %s4336_s15 }
 0x9a6   :  { %1208 = vrot.lane.b32.xlu0 %v4417_v25, %s4337_s16 }
 0x9aa   :  { %1226 = vrot.lane.b32.xlu0 %v4423_v27, %s4338_s17 }
 0x9ae   :  { %1244 = vrot.lane.b32.xlu0 %v1240_v58, %s4318_s21 }
 0x9b2   :  { %1200 = vrot.lane.b32.xlu0 %v4423_v27, %s4339_s18 }
 0x9f5   :  { %v1247_v51 = vpop.permute.xlu1 %1246 }
 0x9f6   :  { %v1251_v19 = vadd.f32 %v1247_v51, %v1233_v17 }
 0x9f8   :  { %v1255_v20 = vpack.c.bf16 %v1251_v19, %v1251_v19 }
 0x9f9   :  { %v4760_v25 = vpop.permute.xlu1 %1202 }
 0x9fa   :  { %1312 = vrot.lane.b32.xlu1 %v1255_v20, %s4339_s18  ;;  %v1207_v49 = vmul.f32 %v4760_v25, %v4601_v52 }
 0x9fd   :  { %v1221_v21 = vpop.permute.xlu1 %1220 }
 0x9fe   :  { %v1225_v55 = vadd.f32 %v1221_v21, %v1207_v49 }
 0xa00   :  { %v1253_v23 = vpack.c.bf16 %v1225_v55, %v1225_v55 }
 0xa02   :  { %1309 = vrot.lane.b32.xlu1 %v1253_v23, %s4338_s17 }
 0xa11   :  { %v1037_v27 = vpop.xlane.xlu0 %1036 }
 0xa12   :  { %4181 = vrcp.f32 %v1037_v27 }
 0xa15   :  { %v1034_v29 = vpop.xlane.xlu0 %1033 }
 0xa16   :  { %4183 = vrcp.f32 %v1034_v29 }
 0xa19   :  { %v1046_v32 = vpop.permute.xlu0 %1045 }
 0xa1a   :  { %v1051_v34 = vsel %vm358_vm4, %v1046_v32, 0 }
 0xa1b   :  { %3859 = vmatpush3.bf16.msra.mxu0 %v1051_v34 }
 0xa1c   :  { %3870 = vmatprep.subr.bf16.mxu0 %v4319_v61 }
 0xa1d   :  { %v4768_v35 = vpop.permute.xlu0 %1208 }
 0xa1e   :  { %v1214_v52 = vmul.f32 %v4768_v35, %v4621_v8 }
 0xa1f   :  { %v4182_v36 = vpop.eup %4181 }
 0xa20   :  { %1218 = vrot.lane.b32.xlu0 %v1214_v52, %s4318_s21  ;;  %v1041_v54 = vmul.f32 %v4182_v36, %v4178_v63  ;;  %v4108_v63 = vld [vmem:[%s5322_s2 + $0x10] sm:$0x3f]  }
 0xa21   :  { %v4773_v37 = vpop.permute.xlu0 %1226 }
 0xa22   :  { %v1043_v38 = vpack.c.bf16 %v1041_v54, %v1041_v54  ;;  %v1232_v60 = vmul.f32 %v4773_v37, %v4621_v8 }
 0xa23   :  { %v4184_v42 = vpop.eup %4183 }
 0xa24   :  { %3867 = vmatmul.mubr.msk.bf16.vlgmr.msra.gmra.mxu1 %vm327_vm3, %v1043_v38  ;;  %v1040_v6 = vmul.f32 %v4184_v42, %v4180_v13  ;;  %v1155_v13 = vsel %vm746_vm5, %v4108_v63, 0 }
 0xa25   :  { %v1245_v28 = vpop.permute.xlu0 %1244  ;;  %3878 = vmatprep.mubr.msk.bf16.mxu1 %vm4320_vm1, %v4319_v61 }
 0xa26   :  { %v1250_v10 = vadd.f32 %v1245_v28, %v1232_v60  ;;  %v1042_v58 = vpack.c.bf16 %v1040_v6, %v1040_v6 }
 0xa28   :  { %v1254_v17 = vpack.c.bf16 %v1250_v10, %v1250_v10  ;;  %3861 = vmatmul.mubr.msk.bf16.vlgmr.msra.gmra.mxu0 %vm327_vm3, %v1042_v58  ;;  %v837_v10 = vadd.f32 %v4691_v41, %v4703_v7 }
 0xa29   :  { %3872 = vmatprep.mubr.msk.bf16.mxu0 %vm4320_vm1, %v4319_v61  ;;  %3871 = vmatpush3.bf16.msra.mxu0 %v1155_v13  ;;  %v4789_v51 = vpop.permute.xlu0 %1200  ;;  %v840_v13 = vadd.f32 %v4693_v43, %v4705_v47 }
 0xa2a   :  { %1260 = vrot.lane.b32.xlu0 %v1254_v17, %s4339_s18  ;;  %3882 = vmatprep.subr.bf16.mxu0 %v4319_v61  ;;  %v1206_v19 = vmul.f32 %v4789_v51, %v4621_v8 }
 0xa6c   :  { %v1313_v32 = vpop.permute.xlu1 %1312 }
 0xa6d   :  { %v1318_v8 = vsel %vm231_vm2, %v1313_v32, 0 }
 0xa74   :  { %v1310_v6 = vpop.permute.xlu1 %1309 }
 0xa92   :  { %v1219_v20 = vpop.permute.xlu0 %1218 }
 0xa93   :  { %v1224_v49 = vadd.f32 %v1219_v20, %v1206_v19 }
 0xa95   :  { %v1252_v21 = vpack.c.bf16 %v1224_v49, %v1224_v49 }
 0xa97   :  { %1257 = vrot.lane.b32.xlu0 %v1252_v21, %s4338_s17 }
 0xa9c   :  { %v1261_v55 = vpop.permute.xlu0 %1260 }
 0xa9d   :  { %v1266_v23 = vsel %vm231_vm2, %v1261_v55, 0 }
 0xa9e   :  { %3877 = vmatpush3.bf16.xpose.msra.mxu1 %v1266_v23 }
 0xa9f   :  { %3888 = vmatprep.subr.bf16.mxu1 %v4319_v61 }
 0xae4   :  { %v1136_v27 = vpop.f32.mrf.mxu1 }
 0xae6   :  { %v3868_v29 = vpop.f32.mrf.mxu1 }
 0xae8   :  { %v1087_v34 = vpop.f32.mrf.mxu0  ;;  %v1139_v52 = vpop.f32.mrf.mxu1 }
 0xae9   :  { %v1142_v36 = vpack.c.bf16 %v1136_v27, %v1087_v34 }
 0xaea   :  { %v3862_v54 = vpop.f32.mrf.mxu0  ;;  %v3869_v38 = vpop.f32.mrf.mxu1 }
 0xaeb   :  { %3873 = vmatmul.mubr.msk.bf16.vlgmr.msra.gmra.mxu0 %vm231_vm2, %v1142_v36 }
 0xaec   :  { %3883 = vmatpush3.bf16.xpose.msra.mxu0 %v1318_v8  ;;  %v1090_v42 = vpop.f32.mrf.mxu0  ;;  %3884 = vmatprep.mubr.msk.bf16.mxu0 %vm4320_vm1, %v4319_v61 }
 0xaed   :  { %3894 = vmatprep.subr.bf16.mxu0 %v4319_v61 }
 0xaee   :  { %v3863_v60 = vpop.f32.mrf.mxu0 }
 0xaf3   :  { %3885 = vmatmul.mubr.msk.bf16.vlgmr.msra.gmra.mxu0 %vm231_vm2, %v1310_v6 }
 0xaf4   :  { %3896 = vmatprep.mubr.msk.bf16.mxu0 %vm4320_vm1, %v4319_v61 }
 0xb09   :  { %v1258_v28 = vpop.permute.xlu0 %1257 }
 0xb0a   :  { %3879 = vmatmul.mubr.msk.bf16.vlgmr.msra.gmra.mxu1 %vm231_vm2, %v1258_v28 }
 0xb0b   :  { %3890 = vmatprep.mubr.msk.bf16.mxu1 %vm4320_vm1, %v4319_v61 }
 0xbab   :  { %v1191_v58 = vpop.f32.mrf.mxu0 }
 0xbac   :  { %v4809_v17 = vadd.f32 %v1191_v58, %v837_v10 }
 0xbad   :  { %v3874_v63 = vpop.f32.mrf.mxu0 }
 0xbaf   :  { %v1194_v19 = vpop.f32.mrf.mxu0 }
 0xbb0   :  { %v4813_v20 = vadd.f32 %v1194_v19, %v840_v13 }
 0xbb1   :  { %v3875_v49 = vpop.f32.mrf.mxu0 }
 0xbb3   :  { %v1354_v21 = vpop.f32.mrf.mxu0 }
 0xbb4   :  { %v1363_v55 = vsel %vm327_vm3, %v1354_v21, -inf }
 0xbb5   :  { %1364 = vmax.xlane.f32.xlu1 %v1363_v55  ;;  %v3886_v23 = vpop.f32.mrf.mxu0 }
 0xbb7   :  { %v1357_v27 = vpop.f32.mrf.mxu0 }
 0xbb9   :  { %v3887_v29 = vpop.f32.mrf.mxu0 }
 0xbba   :  { %v4109_v29 = vld [vmem:[%s5322_s2 + $0x18] sm:$0x3f]  }
 0xbc6   :  { %1432 = vrot.lane.b32.xlu1 %v4711_v31, %s4330_s7 }
 0xbca   :  { %v1302_v41 = vpop.f32.mrf.mxu1 }
 0xbcb   :  { %v1360_v7 = vsel %vm327_vm3, %v1302_v41, -inf }
 0xbcc   :  { %1361 = vmax.xlane.f32.xlu0 %v1360_v7  ;;  %v3880_v32 = vpop.f32.mrf.mxu1 }
 0xbce   :  { %v1305_v43 = vpop.f32.mrf.mxu1 }
 0xbd0   :  { %v3881_v47 = vpop.f32.mrf.mxu1 }
 0xc3e   :  { %v1365_v34 = vpop.xlane.xlu1 %1364 }
 0xc3f   :  { %v1367_v54 = vsub.f32 %v1354_v21, %v1365_v34 }
 0xc41   :  { %v1370_v42 = vmul.f32 1.442695, %v1367_v54 }
 0xc42   :  { %v1433_v52 = vpop.permute.xlu1 %1432 }
 0xc43   :  { %v1438_v36 = vsel %vm358_vm4, %v1433_v52, 0 }
 0xc44   :  { %3895 = vmatpush3.bf16.msra.mxu0 %v1438_v36 }
 0xc55   :  { %v1362_v38 = vpop.xlane.xlu0 %1361 }
 0xc56   :  { %v1366_v8 = vsub.f32 %v1302_v41, %v1362_v38  ;;  %v1493_v41 = vsel %vm746_vm5, %v4109_v29, 0 }
 0xc58   :  { %v1368_v60 = vmul.f32 1.442695, %v1366_v8 }
 0xc5a   :  { %4185 = vpow2.f32 %v1368_v60  ;;  %v1540_v60 = vld [vmem:[#allocation2 + $0x48] sm:$0xff] }
 0xc5b   :  { %4187 = vpow2.f32 %v1370_v42 }
 0xc67   :  { %v4186_v31 = vpop.eup %4185 }
 0xc68   :  { %v1372_v6 = vsel %vm327_vm3, %v4186_v31, 0.0  ;;  %v4188_v28 = vpop.eup %4187 }
 0xc69   :  { %1373 = vadd.xlane.f32.xlu0 %v1372_v6  ;;  %v1375_v10 = vsel %vm327_vm3, %v4188_v28, 0.0 }
 0xc6d   :  { %1376 = vadd.xlane.f32.xlu0 %v1375_v10 }
 0xc83   :  { %1384 = vrot.lane.b32.xlu0 %v4743_v15, %s4330_s7 }
 0xcf2   :  { %v1374_v58 = vpop.xlane.xlu0 %1373 }
 0xcf3   :  { %4189 = vrcp.f32 %v1374_v58 }
 0xcf6   :  { %v1377_v63 = vpop.xlane.xlu0 %1376 }
 0xcf7   :  { %4191 = vrcp.f32 %v1377_v63  ;;  %v1541_v63 = vld [vmem:[#allocation2 + $0x130] sm:$0xff] }
 0xcfa   :  { %v1385_v13 = vpop.permute.xlu0 %1384 }
 0xcfb   :  { %v1390_v19 = vsel %vm358_vm4, %v1385_v13, 0 }
 0xcfc   :  { %3889 = vmatpush3.bf16.msra.mxu1 %v1390_v19 }
 0xcfd   :  { %3900 = vmatprep.subr.bf16.mxu1 %v4319_v61 }
 0xd00   :  { %v4190_v49 = vpop.eup %4189 }
 0xd01   :  { %v1380_v21 = vmul.f32 %v4190_v49, %v4186_v31 }
 0xd03   :  { %v1382_v55 = vpack.c.bf16 %v1380_v21, %v1380_v21 }
 0xd04   :  { %v4192_v23 = vpop.eup %4191 }
 0xd05   :  { %3891 = vmatmul.mubr.msk.bf16.vlgmr.msra.gmra.mxu1 %vm327_vm3, %v1382_v55  ;;  %v1381_v27 = vmul.f32 %v4192_v23, %v4188_v28 }
 0xd06   :  { %3902 = vmatprep.mubr.msk.bf16.mxu1 %vm4320_vm1, %v4319_v61  ;;  %3901 = vmatpush3.bf16.msra.mxu1 %v1493_v41 }
 0xd07   :  { %v1383_v15 = vpack.c.bf16 %v1381_v27, %v1381_v27  ;;  %3906 = vmatprep.subr.bf16.mxu1 %v4319_v61 }
 0xd09   :  { %3897 = vmatmul.mubr.msk.bf16.vlgmr.msra.gmra.mxu0 %vm327_vm3, %v1383_v15 }
 0xd0a   :  { %1654 = vmatprep.mubr.bf16.mxu0 %v4314_v22 }
 0xdc5   :  { %v1426_v7 = vpop.f32.mrf.mxu1 }
 0xdc7   :  { %v3892_v32 = vpop.f32.mrf.mxu1 }
 0xdc8   :  { %v4112_v32 = vld [vmem:[%s5323_s3 + $0x24] ss:$8 sps:$4 sm:$0xff]  }
 0xdc9   :  { %v1429_v43 = vpop.f32.mrf.mxu1  ;;  %v1474_v47 = vpop.f32.mrf.mxu0  ;;  %1632 = vmatprep.subr.bf16.mxu0 %v4112_v32 }
 0xdca   :  { %v1480_v34 = vpack.c.bf16 %v1474_v47, %v1426_v7  ;;  %v4110_v43 = vld [vmem:[%s5323_s3 + $0x20] ss:$8 sps:$4 sm:$0xff]   ;;  %v4115_v47 = vld [vmem:[%s5323_s3 + $0x14] ss:$8 sps:$4 sm:$0xff]  }
 0xdcb   :  { %v3893_v52 = vpop.f32.mrf.mxu1  ;;  %v3898_v36 = vpop.f32.mrf.mxu0  ;;  %1633 = vmatpush1.bf16.msra.mxu0 %v4110_v43 }
 0xdcc   :  { %3903 = vmatmul.mubr.msk.bf16.vlgmr.msra.gmra.mxu1 %vm231_vm2, %v1480_v34  ;;  %v4113_v34 = vld [vmem:[%s5323_s3 + $0x10] ss:$8 sps:$4 sm:$0xff]   ;;  %v4118_v52 = vld [vmem:[%s5323_s3 + $0x4] ss:$8 sps:$4 sm:$0xff]   ;;  %1634 = vmatprep.subr.bf16.mxu0 %v4115_v47  ;;  %v4116_v36 = vld [vmem:[%s5323_s3] ss:$8 sps:$4 sm:$0xff]  }
 0xdcd   :  { %v1477_v54 = vpop.f32.mrf.mxu0  ;;  %3922 = vmatprep.mubr.msk.bf16.mxu1 %vm4320_vm1, %v4319_v61 }
 0xdcf   :  { %v3899_v38 = vpop.f32.mrf.mxu0  ;;  %1635 = vmatpush1.bf16.msra.mxu0 %v4113_v34 }
 0xdd0   :  { %1636 = vmatprep.subr.bf16.mxu0 %v4118_v52 }
 0xdd3   :  { %1637 = vmatpush1.bf16.msra.mxu0 %v4116_v36 }
 0xe8c   :  { %v1529_v8 = vpop.f32.mrf.mxu1 }
 0xe8d   :  { %v1536_v42 = vadd.f32 %v1529_v8, %v4809_v17 }
 0xe8e   :  { %v3904_v31 = vpop.f32.mrf.mxu1 }
 0xe8f   :  { %v1538_v6 = vadd.f32 %v1536_v42, %v4386_v3 }
 0xe90   :  { %v1532_v28 = vpop.f32.mrf.mxu1 }
 0xe91   :  { %v4841_v10 = vadd.f32 %v1540_v60, %v1538_v6  ;;  %v1537_v58 = vadd.f32 %v1532_v28, %v4813_v20 }
 0xe92   :  { %v3905_v13 = vpop.f32.mrf.mxu1 }
 0xe93   :  { %v1539_v19 = vadd.f32 %v1537_v58, %v4388_v5  ;;  %v1548_v49 = vsel %vm53_vm0, %v4841_v10, 0.0  ;;  %v1544_v58 = vld [vmem:[#allocation2 + $0x50] sm:$0xff]  ;;  %v1545_v13 = vld [vmem:[#allocation2 + $0x138] sm:$0xff] }
 0xe94   :  { %1549 = vadd.xlane.f32.xlu1 %v1548_v49 }
 0xe95   :  { %v4847_v21 = vadd.f32 %v1541_v63, %v1539_v19 }
 0xe97   :  { %v1551_v17 = vsel %vm53_vm0, %v4847_v21, 0.0 }
 0xe98   :  { %1552 = vadd.xlane.f32.xlu0 %v1551_v17  ;;  %v1546_v17 = vld [vmem:[#allocation2 + $0x58] sm:$0xff] }
 0xf1d   :  { %v1550_v3 = vpop.xlane.xlu1 %1549 }
 0xf1e   :  { %v1554_v55 = vmul.f32 0.020833334, %v1550_v3  ;;  %v1547_v3 = vld [vmem:[#allocation2 + $0x140] sm:$0xff] }
 0xf20   :  { %v1556_v23 = vsub.f32 %v4841_v10, %v1554_v55 }
 0xf21   :  { %v1553_v27 = vpop.xlane.xlu0 %1552 }
 0xf22   :  { %v1555_v20 = vmul.f32 0.020833334, %v1553_v27  ;;  %v1558_v15 = vmul.f32 %v1556_v23, %v1556_v23 }
 0xf24   :  { %v1557_v29 = vsub.f32 %v4847_v21, %v1555_v20  ;;  %v1560_v5 = vsel %vm53_vm0, %v1558_v15, 0.0 }
 0xf25   :  { %1561 = vadd.xlane.f32.xlu0 %v1560_v5  ;;  %v1585_v5 = vld [vmem:[#allocation2 + $0x60] sm:$0xff] }
 0xf26   :  { %v1559_v41 = vmul.f32 %v1557_v29, %v1557_v29 }
 0xf28   :  { %v1563_v7 = vsel %vm53_vm0, %v1559_v41, 0.0 }
 0xf29   :  { %1564 = vadd.xlane.f32.xlu1 %v1563_v7 }
 0xfae   :  { %v1562_v54 = vpop.xlane.xlu0 %1561 }
 0xfaf   :  { %v1566_v38 = vmul.f32 0.020833334, %v1562_v54 }
 0xfb1   :  { %v1568_v8 = vadd.f32 1e-05, %v1566_v38 }
 0xfb2   :  { %v1565_v42 = vpop.xlane.xlu1 %1564 }
 0xfb3   :  { %4193 = vrsqrt.f32 %v1568_v8  ;;  %v1567_v60 = vmul.f32 0.020833334, %v1565_v42  ;;  %v1586_v8 = vld [vmem:[#allocation2 + $0x68] sm:$0xff] }
 0xfb5   :  { %v1569_v31 = vadd.f32 1e-05, %v1567_v60 }
 0xfb7   :  { %4195 = vrsqrt.f32 %v1569_v31 }
 0xfc0   :  { %v4194_v6 = vpop.eup %4193 }
 0xfc1   :  { %v1572_v28 = vmul.f32 %v4194_v6, %v1556_v23  ;;  %v1587_v23 = vld [vmem:[#allocation2 + $0x148] sm:$0xff]  ;;  %v1588_v6 = vld [vmem:[#allocation2 + $0x150] sm:$0xff] }
 0xfc3   :  { %v1574_v49 = vmul.f32 %v1572_v28, %v1544_v58 }
 0xfc4   :  { %v4196_v63 = vpop.eup %4195 }
 0xfc5   :  { %v1573_v19 = vmul.f32 %v4196_v63, %v1557_v29  ;;  %v1576_v27 = vadd.f32 %v1574_v49, %v1546_v17  ;;  %v4119_v17 = vld [vmem:[%s5324_s4 + $0x38] sm:$0xff]  }
 0xfc6   :  { %3907 = vmatpush3.bf16.msra.mxu1 %v4119_v17  ;;  %v1684_v17 = vld [vmem:[#allocation2 + $0x160] sm:$0xff] }
 0xfc7   :  { %v1575_v55 = vmul.f32 %v1573_v19, %v1545_v13  ;;  %3908 = vmatprep.subr.bf16.mxu1 %v4319_v61 }
 0xfc9   :  { %v1577_v20 = vadd.f32 %v1575_v55, %v1547_v3 }
 0xfcb   :  { %v1578_v15 = vpack.c.bf16 %v1577_v20, %v1576_v27 }
 0xfcd   :  { %3593 = vmatmul.mubr.msk.bf16.vlgmr.msra.gmra.mxu0 %vm53_vm0, %v1578_v15 }
 0xfce   :  { %1933 = vmatprep.mubr.bf16.mxu0 %v4314_v22 }
0x108d   :  { %v1656_v41 = vpop.f32.mrf.mxu0 }
0x108e   :  { %v1657_v7 = vadd.f32 %v1656_v41, %v1585_v5 }
0x108f   :  { %v1658_v32 = vpop.f32.mrf.mxu0 }
0x1090   :  { %v3594_v43 = vmul.f32 -1.442695, %v1657_v7  ;;  %v1659_v31 = vadd.f32 %v1658_v32, %v1586_v8  ;;  %v4120_v32 = vld [vmem:[%s5324_s4 + $0x30] sm:$0xff]  }
0x1091   :  { %v1660_v47 = vpop.f32.mrf.mxu0  ;;  %3909 = vmatpush3.bf16.msra.mxu1 %v4120_v32 }
0x1092   :  { %4197 = vpow2.f32 %v3594_v43  ;;  %v1661_v29 = vadd.f32 %v1660_v47, %v1587_v23  ;;  %3910 = vmatprep.subr.bf16.mxu1 %v4319_v61  ;;  %v4121_v23 = vld [vmem:[%s5324_s4 + $0x28] sm:$0xff]   ;;  %v4122_v43 = vld [vmem:[%s5324_s4 + $0x20] sm:$0xff]   ;;  %v4123_v47 = vld [vmem:[%s5324_s4 + $0x18] sm:$0xff]  }
0x1093   :  { %v1662_v28 = vpop.f32.mrf.mxu0 }
0x1094   :  { %v3595_v34 = vmul.f32 -1.442695, %v1661_v29  ;;  %v1663_v19 = vadd.f32 %v1662_v28, %v1588_v6  ;;  %v1681_v28 = vld [vmem:[#allocation2 + $0x70] sm:$0xff] }
0x1095   :  { %3911 = vmatpush3.bf16.msra.mxu1 %v4121_v23 }
0x1096   :  { %4199 = vpow2.f32 %v3595_v34  ;;  %3912 = vmatprep.subr.bf16.mxu1 %v4319_v61  ;;  %v4125_v34 = vld [vmem:[%s5324_s4 + $0x8] sm:$0xff]  }
0x1099   :  { %3913 = vmatpush3.bf16.msra.mxu1 %v4122_v43 }
0x109a   :  { %3914 = vmatprep.subr.bf16.mxu1 %v4319_v61 }
0x109d   :  { %3915 = vmatpush3.bf16.msra.mxu1 %v4123_v47 }
0x109e   :  { %3916 = vmatprep.subr.bf16.mxu1 %v4319_v61 }
0x109f   :  { %v4198_v52 = vpop.eup %4197 }
0x10a0   :  { %v1671_v36 = vadd.f32 1.0, %v4198_v52  ;;  %v4126_v52 = vld [vmem:[%s5324_s4] sm:$0xff]  }
0x10a2   :  { %4201 = vrcp.f32 %v1671_v36 }
0x10a3   :  { %v4200_v54 = vpop.eup %4199 }
0x10a4   :  { %v1672_v38 = vadd.f32 1.0, %v4200_v54 }
0x10a6   :  { %4203 = vrcp.f32 %v1672_v38 }
0x10af   :  { %v4202_v42 = vpop.eup %4201 }
0x10b0   :  { %v1677_v60 = vmul.f32 %v4202_v42, %v1657_v7 }
0x10b2   :  { %v1679_v58 = vmul.f32 %v1677_v60, %v1659_v31 }
0x10b3   :  { %v4204_v63 = vpop.eup %4203 }
0x10b4   :  { %v1678_v13 = vmul.f32 %v4204_v63, %v1661_v29  ;;  %1685 = vadd.xlane.f32.xlu0 %v1679_v58  ;;  %v4124_v29 = vld [vmem:[%s5324_s4 + $0x10] sm:$0xff]   ;;  %v1682_v63 = vld [vmem:[#allocation2 + $0x158] sm:$0xff] }
0x10b5   :  { %3917 = vmatpush3.bf16.msra.mxu1 %v4124_v29 }
0x10b6   :  { %v1680_v49 = vmul.f32 %v1678_v13, %v1663_v19  ;;  %3918 = vmatprep.subr.bf16.mxu1 %v4319_v61 }
0x10b8   :  { %1687 = vadd.xlane.f32.xlu1 %v1680_v49 }
0x10b9   :  { %3919 = vmatpush3.bf16.msra.mxu1 %v4125_v34 }
0x10ba   :  { %3920 = vmatprep.subr.bf16.mxu1 %v4319_v61 }
0x10bd   :  { %3921 = vmatpush3.bf16.msra.mxu1 %v4126_v52 }
0x10be   :  { %3938 = vmatprep.subr.bf16.mxu1 %v4319_v61 }
0x113d   :  { %v1686_v3 = vpop.xlane.xlu0 %1685 }
0x113e   :  { %v1690_v55 = vmul.f32 0.0078125, %v1686_v3 }
0x1140   :  { %v1692_v27 = vsub.f32 %v1679_v58, %v1690_v55 }
0x1141   :  { %v1688_v20 = vpop.xlane.xlu1 %1687 }
0x1142   :  { %v1691_v15 = vmul.f32 0.0078125, %v1688_v20  ;;  %v1694_v5 = vmul.f32 %v1692_v27, %v1692_v27 }
0x1144   :  { %v1693_v41 = vsub.f32 %v1680_v49, %v1691_v15  ;;  %1696 = vadd.xlane.f32.xlu0 %v1694_v5  ;;  %v1683_v49 = vld [vmem:[#allocation2 + $0x78] sm:$0xff]  ;;  %v1729_v5 = vld [vmem:[#allocation2 + $0x80] sm:$0xff] }
0x1146   :  { %v1695_v7 = vmul.f32 %v1693_v41, %v1693_v41 }
0x1148   :  { %1698 = vadd.xlane.f32.xlu1 %v1695_v7 }
0x11cd   :  { %v1697_v36 = vpop.xlane.xlu0 %1696 }
0x11ce   :  { %v1700_v54 = vmul.f32 0.0078125, %v1697_v36 }
0x11d0   :  { %v1702_v38 = vadd.f32 1e-05, %v1700_v54 }
0x11d1   :  { %v1699_v8 = vpop.xlane.xlu1 %1698 }
0x11d2   :  { %4205 = vrsqrt.f32 %v1702_v38  ;;  %v1701_v42 = vmul.f32 0.0078125, %v1699_v8 }
0x11d4   :  { %v1703_v60 = vadd.f32 1e-05, %v1701_v42 }
0x11d6   :  { %4207 = vrsqrt.f32 %v1703_v60 }
0x11df   :  { %v4206_v31 = vpop.eup %4205 }
0x11e0   :  { %v1706_v6 = vmul.f32 %v4206_v31, %v1692_v27  ;;  %v1730_v27 = vld [vmem:[#allocation2 + $0x168] sm:$0xff] }
0x11e2   :  { %v1708_v19 = vmul.f32 %v1706_v6, %v1681_v28 }
0x11e3   :  { %v4208_v58 = vpop.eup %4207 }
0x11e4   :  { %v1707_v13 = vmul.f32 %v4208_v58, %v1693_v41  ;;  %v1710_v55 = vadd.f32 %v1708_v19, %v1683_v49  ;;  %v4129_v58 = vld [vmem:[%s5321_s1 + $0x54] ss:$8 sps:$4 sm:$0xff]   ;;  %v4130_v19 = vld [vmem:[%s5321_s1 + $0x40] ss:$8 sps:$4 sm:$0xff]  }
0x11e5   :  { %1911 = vmatprep.subr.bf16.mxu0 %v4129_v58  ;;  %v4135_v49 = vld [vmem:[%s5321_s1 + $0x34] ss:$8 sps:$4 sm:$0xff]   ;;  %v1866_v58 = vld [vmem:[#allocation2 + $0x180] sm:$0xff] }
0x11e6   :  { %v1709_v3 = vmul.f32 %v1707_v13, %v1682_v63  ;;  %v4127_v63 = vld [vmem:[%s5321_s1 + $0x50] ss:$8 sps:$4 sm:$0xff]   ;;  %v4132_v13 = vld [vmem:[%s5321_s1 + $0x44] ss:$8 sps:$4 sm:$0xff]  }
0x11e7   :  { %1912 = vmatpush1.bf16.msra.mxu0 %v4127_v63 }
0x11e8   :  { %v1711_v20 = vadd.f32 %v1709_v3, %v1684_v17  ;;  %1913 = vmatprep.subr.bf16.mxu0 %v4132_v13  ;;  %v4133_v17 = vld [vmem:[%s5321_s1 + $0x30] ss:$8 sps:$4 sm:$0xff]  }
0x11ea   :  { %v1712_v15 = vpack.c.bf16 %v1711_v20, %v1710_v55 }
0x11eb   :  { %1914 = vmatpush1.bf16.msra.mxu0 %v4130_v19 }
0x11ec   :  { %3923 = vmatmul.mubr.bf16.vlgmr.msra.gmra.mxu1 %v1712_v15  ;;  %1915 = vmatprep.subr.bf16.mxu0 %v4135_v49 }
0x11ed   :  { %3940 = vmatprep.mubr.msk.bf16.mxu1 %vm4320_vm1, %v4319_v61 }
0x11ef   :  { %1916 = vmatpush1.bf16.msra.mxu0 %v4133_v17 }
0x11f0   :  { %3926 = vmatprep.subr.bf16.mxu0 %v4319_v61 }
0x12ac   :  { %v1813_v7 = vpop.f32.mrf.mxu1 }
0x12ad   :  { %v1814_v32 = vadd.f32 %v1813_v7, %v1729_v5 }
0x12ae   :  { %v3924_v23 = vpop.f32.mrf.mxu1 }
0x12af   :  { %v4910_v43 = vadd.f32 %v1814_v32, %v4841_v10 }
0x12b0   :  { %v1816_v41 = vpop.f32.mrf.mxu1 }
0x12b1   :  { %v1817_v47 = vadd.f32 %v1816_v41, %v1730_v27  ;;  %v1826_v29 = vsel %vm53_vm0, %v4910_v43, 0.0  ;;  %v1822_v27 = vld [vmem:[#allocation2 + $0x88] sm:$0xff] }
0x12b2   :  { %1827 = vadd.xlane.f32.xlu0 %v1826_v29  ;;  %v3925_v34 = vpop.f32.mrf.mxu1 }
0x12b3   :  { %v4915_v52 = vadd.f32 %v1817_v47, %v4847_v21  ;;  %v1823_v47 = vld [vmem:[#allocation2 + $0x170] sm:$0xff] }
0x12b5   :  { %v1829_v36 = vsel %vm53_vm0, %v4915_v52, 0.0 }
0x12b6   :  { %1830 = vadd.xlane.f32.xlu1 %v1829_v36  ;;  %v1824_v36 = vld [vmem:[#allocation2 + $0x90] sm:$0xff] }
0x133b   :  { %v1828_v54 = vpop.xlane.xlu0 %1827 }
0x133c   :  { %v1832_v38 = vmul.f32 0.020833334, %v1828_v54  ;;  %v1825_v54 = vld [vmem:[#allocation2 + $0x178] sm:$0xff] }
0x133e   :  { %v1834_v8 = vsub.f32 %v4910_v43, %v1832_v38 }
0x133f   :  { %v1831_v10 = vpop.xlane.xlu1 %1830 }
0x1340   :  { %v1833_v42 = vmul.f32 0.020833334, %v1831_v10  ;;  %v1836_v60 = vmul.f32 %v1834_v8, %v1834_v8 }
0x1342   :  { %v1835_v31 = vsub.f32 %v4915_v52, %v1833_v42  ;;  %v1838_v6 = vsel %vm53_vm0, %v1836_v60, 0.0 }
0x1343   :  { %1839 = vadd.xlane.f32.xlu0 %v1838_v6  ;;  %v1864_v6 = vld [vmem:[#allocation2 + $0x98] sm:$0xff] }
0x1344   :  { %v1837_v28 = vmul.f32 %v1835_v31, %v1835_v31 }
0x1346   :  { %v1841_v21 = vsel %vm53_vm0, %v1837_v28, 0.0 }
0x1347   :  { %1842 = vadd.xlane.f32.xlu1 %v1841_v21 }
0x13cc   :  { %v1840_v3 = vpop.xlane.xlu0 %1839 }
0x13cd   :  { %v1844_v55 = vmul.f32 0.020833334, %v1840_v3 }
0x13cf   :  { %v1846_v20 = vadd.f32 1e-05, %v1844_v55 }
0x13d0   :  { %v1843_v15 = vpop.xlane.xlu1 %1842 }
0x13d1   :  { %4209 = vrsqrt.f32 %v1846_v20  ;;  %v1845_v5 = vmul.f32 0.020833334, %v1843_v15 }
0x13d3   :  { %v1847_v7 = vadd.f32 1e-05, %v1845_v5 }
0x13d5   :  { %4211 = vrsqrt.f32 %v1847_v7 }
0x13de   :  { %v4210_v32 = vpop.eup %4209 }
0x13df   :  { %v1850_v23 = vmul.f32 %v4210_v32, %v1834_v8  ;;  %v4265_v32 = vld [vmem:[#allocation2 + $0x8] sm:$0xff] }
0x13e1   :  { %v1852_v34 = vmul.f32 %v1850_v23, %v1822_v27 }
0x13e2   :  { %v4212_v41 = vpop.eup %4211 }
0x13e3   :  { %v1851_v29 = vmul.f32 %v4212_v41, %v1835_v31  ;;  %v1854_v10 = vadd.f32 %v1852_v34, %v1824_v36  ;;  %v4266_v36 = vld [vmem:[#allocation2 + $0xf0] sm:$0xff] }
0x13e5   :  { %v1853_v38 = vmul.f32 %v1851_v29, %v1823_v47 }
0x13e7   :  { %v1855_v42 = vadd.f32 %v1853_v38, %v1825_v54 }
0x13e9   :  { %v1856_v60 = vpack.c.bf16 %v1855_v42, %v1854_v10 }
0x13eb   :  { %3616 = vmatmul.mubr.msk.bf16.vlgmr.msra.gmra.mxu0 %vm53_vm0, %v1856_v60 }
0x13ec   :  { %3928 = vmatprep.mubr.msk.bf16.mxu0 %vm4320_vm1, %v4319_v61 }
0x14ab   :  { %v1935_v28 = vpop.f32.mrf.mxu0 }
0x14ac   :  { %v4945_v21 = vadd.f32 %v1935_v28, %v1864_v6 }
0x14ad   :  { %v4947_v8 = vpop.f32.mrf.mxu0 }
0x14ae   :  { %v1960_v31 = vmul.f32 %v4945_v21, %v4432_v50  ;;  %v1958_v49 = vmul.f32 %v4945_v21, %v4459_v62  ;;  %v1946_v7 = vmul.f32 %v4945_v21, %v4450_v59  ;;  %v1944_v23 = vmul.f32 %v4265_v32, %v4945_v21 }
0x14af   :  { %v1939_v63 = vpop.f32.mrf.mxu0 }
0x14b0   :  { %v4951_v13 = vadd.f32 %v1939_v63, %v1866_v58  ;;  %1964 = vrot.lane.b32.xlu0 %v1960_v31, %s4318_s21 }
0x14b1   :  { %v4981_v10 = vpop.f32.mrf.mxu0 }
0x14b2   :  { %v1961_v19 = vmul.f32 %v4951_v13, %v4441_v56  ;;  %v1959_v20 = vmul.f32 %v4951_v13, %v4467_v4  ;;  %v1947_v56 = vmul.f32 %v4951_v13, %v4472_v9  ;;  %v1945_v9 = vmul.f32 %v4266_v36, %v4951_v13 }
0x14b4   :  { %1966 = vrot.lane.b32.xlu1 %v1961_v19, %s4318_s21 }
0x1522   :  { %v1965_v17 = vpop.permute.xlu0 %1964 }
0x1523   :  { %v1970_v3 = vadd.f32 %v1965_v17, %v1958_v49 }
0x1525   :  { %v1974_v55 = vpack.c.bf16 %v1970_v3, %v1970_v3  ;;  %v2218_v3 = vmul.f32 %v4945_v21, %v4499_v39  ;;  %v5005_v39 = vpack.c.bf16 %v4951_v13, %v4951_v13 }
0x1526   :  { %v1967_v50 = vpop.permute.xlu1 %1966 }
0x1527   :  { %v1971_v15 = vadd.f32 %v1967_v50, %v1959_v20  ;;  %1979 = vrot.lane.b32.xlu1 %v1974_v55, %s4321_s22  ;;  %v2219_v55 = vmul.f32 %v4951_v13, %v4503_v40  ;;  %v2204_v20 = vmul.f32 %v4945_v21, %v4514_v44  ;;  %v2205_v50 = vmul.f32 %v4951_v13, %v4525_v48 }
0x1529   :  { %v1975_v5 = vpack.c.bf16 %v1971_v15, %v1971_v15  ;;  %v4998_v15 = vpack.c.bf16 %v4945_v21, %v4945_v21 }
0x152b   :  { %2028 = vrot.lane.b32.xlu0 %v1975_v5, %s4321_s22  ;;  %1950 = vrot.lane.b32.xlu1 %v1946_v7, %s4318_s21 }
0x152f   :  { %1952 = vrot.lane.b32.xlu1 %v1947_v56, %s4318_s21 }
0x1599   :  { %v1980_v62 = vpop.permute.xlu1 %1979 }
0x159a   :  { %v1985_v4 = vsel %vm231_vm2, %v1980_v62, 0 }
0x159b   :  { %3927 = vmatpush3.bf16.xpose.msra.mxu0 %v1985_v4 }
0x159c   :  { %3932 = vmatprep.subr.bf16.mxu0 %v4319_v61 }
0x159d   :  { %v1951_v27 = vpop.permute.xlu1 %1950  ;;  %v2029_v41 = vpop.permute.xlu0 %2028 }
0x159e   :  { %v1956_v59 = vadd.f32 %v1951_v27, %v1944_v23  ;;  %v2034_v34 = vsel %vm231_vm2, %v2029_v41, 0 }
0x15a0   :  { %v1972_v47 = vpack.c.bf16 %v1956_v59, %v1956_v59 }
0x15a1   :  { %v1953_v29 = vpop.permute.xlu1 %1952 }
0x15a2   :  { %3929 = vmatmul.mubr.msk.bf16.vlgmr.msra.gmra.mxu0 %vm231_vm2, %v1972_v47  ;;  %v1957_v54 = vadd.f32 %v1953_v29, %v1945_v9 }
0x15a3   :  { %3933 = vmatpush3.bf16.xpose.msra.mxu0 %v2034_v34  ;;  %3934 = vmatprep.mubr.msk.bf16.mxu0 %vm4320_vm1, %v4319_v61 }
0x15a4   :  { %3944 = vmatprep.subr.bf16.mxu0 %v4319_v61  ;;  %v1973_v38 = vpack.c.bf16 %v1957_v54, %v1957_v54  ;;  %v2216_v54 = vmul.f32 %v4945_v21, %v4537_v2 }
0x15aa   :  { %3935 = vmatmul.mubr.msk.bf16.vlgmr.msra.gmra.mxu0 %vm231_vm2, %v1973_v38 }
0x15ab   :  { %3946 = vmatprep.mubr.msk.bf16.mxu0 %vm4320_vm1, %v4319_v61 }
0x1662   :  { %v2021_v42 = vpop.f32.mrf.mxu0 }
0x1663   :  { %v2076_v60 = vsel %vm327_vm3, %v2021_v42, -inf }
0x1664   :  { %2077 = vmax.xlane.f32.xlu0 %v2076_v60  ;;  %v3930_v6 = vpop.f32.mrf.mxu0  ;;  %v2202_v60 = vmul.f32 %v4945_v21, %v4548_v18 }
0x1666   :  { %v2024_v28 = vpop.f32.mrf.mxu0 }
0x1668   :  { %v3931_v58 = vpop.f32.mrf.mxu0 }
0x166a   :  { %v2070_v31 = vpop.f32.mrf.mxu0 }
0x166b   :  { %v2079_v63 = vsel %vm327_vm3, %v2070_v31, -inf }
0x166c   :  { %2080 = vmax.xlane.f32.xlu1 %v2079_v63  ;;  %v3936_v19 = vpop.f32.mrf.mxu0 }
0x166e   :  { %v2073_v49 = vpop.f32.mrf.mxu0 }
0x1670   :  { %v3937_v17 = vpop.f32.mrf.mxu0 }
0x167a   :  { %2222 = vrot.lane.b32.xlu0 %v2218_v3, %s4318_s21 }
0x167d   :  { %2224 = vrot.lane.b32.xlu1 %v2219_v55, %s4318_s21 }
0x167e   :  { %2208 = vrot.lane.b32.xlu0 %v2204_v20, %s4318_s21 }
0x1681   :  { %2210 = vrot.lane.b32.xlu1 %v2205_v50, %s4318_s21 }
0x1682   :  { %2101 = vrot.lane.b32.xlu0 %v4998_v15, %s4326_s27 }
0x1685   :  { %2150 = vrot.lane.b32.xlu1 %v5005_v39, %s4326_s27 }
0x16ed   :  { %v2078_v40 = vpop.xlane.xlu0 %2077 }
0x16ee   :  { %v2082_v44 = vsub.f32 %v2021_v42, %v2078_v40  ;;  %v2217_v42 = vmul.f32 %v4951_v13, %v4542_v11 }
0x16f0   :  { %v2084_v5 = vmul.f32 1.442695, %v2082_v44 }
0x16f1   :  { %v2223_v48 = vpop.permute.xlu0 %2222 }
0x16f2   :  { %4213 = vpow2.f32 %v2084_v5  ;;  %v2228_v38 = vadd.f32 %v2223_v48, %v2216_v54 }
0x16f4   :  { %v2232_v28 = vpack.c.bf16 %v2228_v38, %v2228_v38 }
0x16f5   :  { %v2209_v7 = vpop.permute.xlu0 %2208  ;;  %v2081_v56 = vpop.xlane.xlu1 %2080 }
0x16f6   :  { %v2083_v62 = vsub.f32 %v2070_v31, %v2081_v56  ;;  %v2214_v58 = vadd.f32 %v2209_v7, %v2202_v60  ;;  %v2203_v31 = vmul.f32 %v4951_v13, %v4552_v24 }
0x16f8   :  { %v2086_v4 = vmul.f32 1.442695, %v2083_v62  ;;  %v2230_v49 = vpack.c.bf16 %v2214_v58, %v2214_v58 }
0x16f9   :  { %v2102_v32 = vpop.permute.xlu0 %2101  ;;  %v2225_v23 = vpop.permute.xlu1 %2224 }
0x16fa   :  { %4215 = vpow2.f32 %v2086_v4  ;;  %v2107_v27 = vsel %vm358_vm4, %v2102_v32, 0  ;;  %v2229_v6 = vadd.f32 %v2225_v23, %v2217_v42 }
0x16fb   :  { %3939 = vmatpush3.bf16.msra.mxu1 %v2107_v27 }
0x16fc   :  { %3950 = vmatprep.subr.bf16.mxu1 %v4319_v61  ;;  %v2233_v63 = vpack.c.bf16 %v2229_v6, %v2229_v6 }
0x16fd   :  { %v2211_v59 = vpop.permute.xlu1 %2210 }
0x16fe   :  { %v2215_v19 = vadd.f32 %v2211_v59, %v2203_v31  ;;  %v1865_v31 = vld [vmem:[#allocation2 + $0xa0] sm:$0xff] }
0x16ff   :  { %v4214_v41 = vpop.eup %4213 }
0x1700   :  { %v2088_v47 = vsel %vm327_vm3, %v4214_v41, 0.0  ;;  %v2231_v2 = vpack.c.bf16 %v2215_v19, %v2215_v19  ;;  %v1867_v19 = vld [vmem:[#allocation2 + $0x188] sm:$0xff] }
0x1701   :  { %2089 = vadd.xlane.f32.xlu0 %v2088_v47  ;;  %v2151_v29 = vpop.permute.xlu1 %2150 }
0x1702   :  { %v2156_v34 = vsel %vm358_vm4, %v2151_v29, 0 }
0x1703   :  { %3945 = vmatpush3.bf16.msra.mxu0 %v2156_v34 }
0x1704   :  { %3956 = vmatprep.subr.bf16.mxu0 %v4319_v61 }
0x1707   :  { %v4216_v36 = vpop.eup %4215 }
0x1708   :  { %v2091_v9 = vsel %vm327_vm3, %v4216_v36, 0.0 }
0x1709   :  { %2092 = vadd.xlane.f32.xlu1 %v2091_v9 }
0x1717   :  { %2238 = vrot.lane.b32.xlu0 %v2232_v28, %s4327_s28 }
0x171a   :  { %2290 = vrot.lane.b32.xlu1 %v2233_v63, %s4327_s28  ;;  %v5052_v63 = vadd.f32 %v4947_v8, %v1865_v31 }
0x171b   :  { %2235 = vrot.lane.b32.xlu0 %v2230_v49, %s4328_s29  ;;  %v5057_v49 = vadd.f32 %v4981_v10, %v1867_v19 }
0x171d   :  { %v2571_v8 = vmul.f32 %v5057_v49, %v4609_v0  ;;  %v2585_v0 = vmul.f32 %v5057_v49, %v4629_v14  ;;  %v2570_v14 = vmul.f32 %v5052_v63, %v4636_v30  ;;  %v2567_v30 = vmul.f32 %v5052_v63, %v4672_v12 }
0x171e   :  { %2287 = vrot.lane.b32.xlu1 %v2231_v2, %s4328_s29  ;;  %v2586_v2 = vmul.f32 %v5052_v63, %v4598_v45 }
0x178a   :  { %v2090_v11 = vpop.xlane.xlu0 %2089 }
0x178b   :  { %4217 = vrcp.f32 %v2090_v11  ;;  %v2587_v11 = vmul.f32 %v5057_v49, %v4604_v57 }
0x178e   :  { %v2239_v55 = vpop.permute.xlu0 %2238 }
0x178f   :  { %v2244_v20 = vsel %vm231_vm2, %v2239_v55, 0 }
0x1792   :  { %v2093_v18 = vpop.xlane.xlu1 %2092  ;;  %v2236_v48 = vpop.permute.xlu0 %2235 }
0x1793   :  { %4219 = vrcp.f32 %v2093_v18 }
0x1796   :  { %v2291_v44 = vpop.permute.xlu1 %2290 }
0x1797   :  { %v2296_v7 = vsel %vm231_vm2, %v2291_v44, 0 }
0x1798   :  { %v4218_v17 = vpop.eup %4217 }
0x1799   :  { %v2096_v3 = vmul.f32 %v4218_v17, %v4214_v41 }
0x179a   :  { %v2288_v56 = vpop.permute.xlu1 %2287 }
0x179b   :  { %v2098_v24 = vpack.c.bf16 %v2096_v3, %v2096_v3 }
0x179d   :  { %3941 = vmatmul.mubr.msk.bf16.vlgmr.msra.gmra.mxu1 %vm327_vm3, %v2098_v24 }
0x179e   :  { %3951 = vmatpush3.bf16.xpose.msra.mxu1 %v2244_v20  ;;  %3952 = vmatprep.mubr.msk.bf16.mxu1 %vm4320_vm1, %v4319_v61 }
0x179f   :  { %3962 = vmatprep.subr.bf16.mxu1 %v4319_v61 }
0x17a0   :  { %v4220_v50 = vpop.eup %4219 }
0x17a1   :  { %v2097_v40 = vmul.f32 %v4220_v50, %v4216_v36 }
0x17a3   :  { %v2099_v5 = vpack.c.bf16 %v2097_v40, %v2097_v40 }
0x17a5   :  { %3947 = vmatmul.mubr.msk.bf16.vlgmr.msra.gmra.mxu0 %vm327_vm3, %v2099_v5  ;;  %3953 = vmatmul.mubr.msk.bf16.vlgmr.msra.gmra.mxu1 %vm231_vm2, %v2236_v48 }
0x17a6   :  { %3957 = vmatpush3.bf16.xpose.msra.mxu0 %v2296_v7  ;;  %3958 = vmatprep.mubr.msk.bf16.mxu0 %vm4320_vm1, %v4319_v61 }
0x17a7   :  { %3968 = vmatprep.subr.bf16.mxu0 %v4319_v61  ;;  %3964 = vmatprep.mubr.msk.bf16.mxu1 %vm4320_vm1, %v4319_v61 }
0x17ad   :  { %3959 = vmatmul.mubr.msk.bf16.vlgmr.msra.gmra.mxu0 %vm231_vm2, %v2288_v56  ;;  %v2584_v56 = vmul.f32 %v5052_v63, %v4642_v33 }
0x17ae   :  { %3970 = vmatprep.mubr.msk.bf16.mxu0 %vm4320_vm1, %v4319_v61 }
0x185d   :  { %v5043_v62 = vpop.f32.mrf.mxu1 }
0x185f   :  { %v3942_v4 = vpop.f32.mrf.mxu1 }
0x1861   :  { %v2146_v32 = vpop.f32.mrf.mxu1 }
0x1863   :  { %v3943_v23 = vpop.f32.mrf.mxu1 }
0x1865   :  { %v5045_v27 = vpop.f32.mrf.mxu0  ;;  %v2280_v59 = vpop.f32.mrf.mxu1 }
0x1866   :  { %v2198_v41 = vpack.c.bf16 %v5045_v27, %v5043_v62  ;;  %v2338_v47 = vsel %vm327_vm3, %v2280_v59, -inf }
0x1867   :  { %v3948_v29 = vpop.f32.mrf.mxu0  ;;  %2339 = vmax.xlane.f32.xlu0 %v2338_v47  ;;  %v3954_v34 = vpop.f32.mrf.mxu1 }
0x1869   :  { %v2195_v36 = vpop.f32.mrf.mxu0  ;;  %v2283_v9 = vpop.f32.mrf.mxu1 }
0x186a   :  { %v2568_v36 = vmul.f32 %v4951_v13, %v4666_v53 }
0x186b   :  { %v3949_v54 = vpop.f32.mrf.mxu0  ;;  %v3955_v38 = vpop.f32.mrf.mxu1 }
0x186c   :  { %v2569_v38 = vmul.f32 %v5057_v49, %v4666_v53  ;;  %v4136_v53 = vld [vmem:[%s5322_s2 + $0x20] sm:$0x3f]  }
0x186d   :  { %v2332_v42 = vpop.f32.mrf.mxu0 }
0x186e   :  { %v2341_v60 = vsel %vm327_vm3, %v2332_v42, -inf }
0x186f   :  { %2342 = vmax.xlane.f32.xlu1 %v2341_v60  ;;  %v3960_v6 = vpop.f32.mrf.mxu0 }
0x1871   :  { %v2335_v28 = vpop.f32.mrf.mxu0 }
0x1873   :  { %v3961_v58 = vpop.f32.mrf.mxu0 }
0x1880   :  { %2410 = vrot.lane.b32.xlu1 %v5005_v39, %s4329_s30 }
0x1884   :  { %2590 = vrot.lane.b32.xlu1 %v2586_v2, %s4318_s21 }
0x1888   :  { %2592 = vrot.lane.b32.xlu1 %v2587_v11, %s4318_s21 }
0x188c   :  { %2576 = vrot.lane.b32.xlu1 %v2571_v8, %s4318_s21  ;;  %v2523_v8 = vsel %vm746_vm5, %v4136_v53, 0 }
0x18f0   :  { %v2340_v18 = vpop.xlane.xlu0 %2339 }
0x18f1   :  { %v2344_v39 = vsub.f32 %v2280_v59, %v2340_v18 }
0x18f3   :  { %v2346_v17 = vmul.f32 1.442695, %v2344_v39 }
0x18f5   :  { %4221 = vpow2.f32 %v2346_v17  ;;  %v4137_v17 = vld [vmem:[%s5322_s2 + $0x28] sm:$0x3f]  }
0x18f8   :  { %v2343_v10 = vpop.xlane.xlu1 %2342 }
0x18f9   :  { %v2345_v3 = vsub.f32 %v2332_v42, %v2343_v10  ;;  %v2471_v10 = vsel %vm746_vm5, %v4137_v17, 0  ;;  %v2899_v17 = vmul.f32 %v5057_v49, %v4760_v25  ;;  %v5173_v25 = vpack.c.bf16 %v5052_v63, %v5052_v63 }
0x18fb   :  { %v2348_v55 = vmul.f32 1.442695, %v2345_v3 }
0x18fc   :  { %v2411_v45 = vpop.permute.xlu1 %2410 }
0x18fd   :  { %4223 = vpow2.f32 %v2348_v55  ;;  %v2416_v24 = vsel %vm358_vm4, %v2411_v45, 0 }
0x18fe   :  { %3969 = vmatpush3.bf16.msra.mxu0 %v2416_v24 }
0x18ff   :  { %3980 = vmatprep.subr.bf16.mxu0 %v4319_v61 }
0x1900   :  { %v2591_v57 = vpop.permute.xlu1 %2590 }
0x1901   :  { %v2596_v4 = vadd.f32 %v2591_v57, %v2584_v56 }
0x1902   :  { %v4222_v20 = vpop.eup %4221 }
0x1903   :  { %v2350_v50 = vsel %vm327_vm3, %v4222_v20, 0.0  ;;  %v2602_v32 = vpack.c.bf16 %v2596_v4, %v2596_v4 }
0x1904   :  { %v2593_v40 = vpop.permute.xlu1 %2592  ;;  %2351 = vadd.xlane.f32.xlu0 %v2350_v50 }
0x1905   :  { %v2597_v44 = vadd.f32 %v2593_v40, %v2585_v0 }
0x1907   :  { %v2603_v5 = vpack.c.bf16 %v2597_v44, %v2597_v44 }
0x1908   :  { %v2577_v9 = vpop.permute.xlu1 %2576 }
0x1909   :  { %2670 = vrot.lane.b32.xlu1 %v2603_v5, %s4334_s9  ;;  %v2582_v28 = vadd.f32 %v2577_v9, %v2568_v36  ;;  %v2583_v58 = vadd.f32 %v2577_v9, %v2569_v38  ;;  %v2915_v36 = vmul.f32 %v5057_v49, %v4727_v26  ;;  %v2901_v9 = vmul.f32 %v5057_v49, %v4732_v1 }
0x190a   :  { %v4224_v48 = vpop.eup %4223 }
0x190b   :  { %v2353_v7 = vsel %vm327_vm3, %v4224_v48, 0.0  ;;  %v2600_v13 = vpack.c.bf16 %v2582_v28, %v2582_v28  ;;  %v2601_v19 = vpack.c.bf16 %v2583_v58, %v2583_v58 }
0x190c   :  { %2354 = vadd.xlane.f32.xlu0 %v2353_v7 }
0x1922   :  { %2362 = vrot.lane.b32.xlu0 %v4998_v15, %s4329_s30  ;;  %v2566_v15 = vmul.f32 %v4945_v21, %v4672_v12 }
0x1926   :  { %2574 = vrot.lane.b32.xlu0 %v2570_v14, %s4318_s21 }
0x192a   :  { %2614 = vrot.lane.b32.xlu0 %v2602_v32, %s4334_s9 }
0x197b   :  { %v2671_v18 = vpop.permute.xlu1 %2670 }
0x197c   :  { %v2676_v39 = vsel %vm231_vm2, %v2671_v18, 0 }
0x198d   :  { %v2352_v23 = vpop.xlane.xlu0 %2351 }
0x198e   :  { %4225 = vrcp.f32 %v2352_v23 }
0x1995   :  { %v2355_v59 = vpop.xlane.xlu0 %2354 }
0x1996   :  { %4227 = vrcp.f32 %v2355_v59 }
0x1999   :  { %v2363_v47 = vpop.permute.xlu0 %2362 }
0x199a   :  { %v2368_v29 = vsel %vm358_vm4, %v2363_v47, 0 }
0x199b   :  { %v4226_v33 = vpop.eup %4225  ;;  %3963 = vmatpush3.bf16.msra.mxu1 %v2368_v29 }
0x199c   :  { %v2358_v34 = vmul.f32 %v4226_v33, %v4222_v20  ;;  %3974 = vmatprep.subr.bf16.mxu1 %v4319_v61 }
0x199d   :  { %v2575_v54 = vpop.permute.xlu0 %2574 }
0x199e   :  { %v2580_v42 = vadd.f32 %v2575_v54, %v2566_v15  ;;  %v2581_v60 = vadd.f32 %v2575_v54, %v2567_v30  ;;  %v2360_v6 = vpack.c.bf16 %v2358_v34, %v2358_v34  ;;  %v5141_v30 = vpack.c.bf16 %v5057_v49, %v5057_v49 }
0x199f   :  { %v2914_v34 = vmul.f32 %v5052_v63, %v4725_v46 }
0x19a0   :  { %v2598_v21 = vpack.c.bf16 %v2580_v42, %v2580_v42  ;;  %v2599_v31 = vpack.c.bf16 %v2581_v60, %v2581_v60  ;;  %3965 = vmatmul.mubr.msk.bf16.vlgmr.msra.gmra.mxu1 %vm327_vm3, %v2360_v6 }
0x19a1   :  { %3976 = vmatprep.mubr.msk.bf16.mxu1 %vm4320_vm1, %v4319_v61  ;;  %3975 = vmatpush3.bf16.msra.mxu1 %v2471_v10  ;;  %v2615_v3 = vpop.permute.xlu0 %2614 }
0x19a2   :  { %2610 = vrot.lane.b32.xlu1 %v2599_v31, %s4335_s14  ;;  %2608 = vrot.lane.b32.xlu0 %v2598_v21, %s4335_s14 }
0x19a3   :  { %v4228_v12 = vpop.eup %4227  ;;  %3986 = vmatprep.subr.bf16.mxu1 %v4319_v61 }
0x19a4   :  { %v2359_v2 = vmul.f32 %v4228_v12, %v4224_v48  ;;  %v2620_v48 = vsel %vm231_vm2, %v2615_v3, 0 }
0x19a6   :  { %2666 = vrot.lane.b32.xlu1 %v2601_v19, %s4335_s14  ;;  %2664 = vrot.lane.b32.xlu0 %v2600_v13, %s4335_s14  ;;  %v2361_v11 = vpack.c.bf16 %v2359_v2, %v2359_v2  ;;  %v2912_v13 = vmul.f32 %v5052_v63, %v4773_v37 }
0x19a8   :  { %3971 = vmatmul.mubr.msk.bf16.vlgmr.msra.gmra.mxu0 %vm327_vm3, %v2361_v11  ;;  %v2913_v11 = vmul.f32 %v5057_v49, %v4756_v16  ;;  %v2900_v49 = vmul.f32 %v5052_v63, %v4768_v35 }
0x19a9   :  { %3981 = vmatpush3.bf16.msra.mxu0 %v2523_v8  ;;  %3982 = vmatprep.mubr.msk.bf16.mxu0 %vm4320_vm1, %v4319_v61 }
0x19aa   :  { %3992 = vmatprep.subr.bf16.mxu0 %v4319_v61 }
0x19b0   :  { %3983 = vmatmul.mubr.msk.bf16.vlgmr.msra.gmra.mxu0 %vm231_vm2, %v2198_v41 }
0x19b1   :  { %3993 = vmatpush3.bf16.xpose.msra.mxu0 %v2676_v39  ;;  %3994 = vmatprep.mubr.msk.bf16.mxu0 %vm4320_vm1, %v4319_v61 }
0x19b2   :  { %4004 = vmatprep.subr.bf16.mxu0 %v4319_v61 }
0x1a14   :  { %v2611_v55 = vpop.permute.xlu1 %2610  ;;  %v2609_v62 = vpop.permute.xlu0 %2608 }
0x1a15   :  { %v2612_v27 = vsel %vm327_vm3, %v2609_v62, %v2611_v55 }
0x1a18   :  { %v2667_v41 = vpop.permute.xlu1 %2666  ;;  %v2665_v45 = vpop.permute.xlu0 %2664 }
0x1a19   :  { %v2668_v24 = vsel %vm327_vm3, %v2665_v45, %v2667_v41 }
0x1a1a   :  { %3995 = vmatmul.mubr.msk.bf16.vlgmr.msra.gmra.mxu0 %vm231_vm2, %v2668_v24 }
0x1a1b   :  { %4006 = vmatprep.mubr.msk.bf16.mxu0 %vm4320_vm1, %v4319_v61 }
0x1a60   :  { %v2404_v57 = vpop.f32.mrf.mxu1 }
0x1a62   :  { %v3966_v20 = vpop.f32.mrf.mxu1 }
0x1a64   :  { %v2407_v0 = vpop.f32.mrf.mxu1 }
0x1a66   :  { %v3967_v50 = vpop.f32.mrf.mxu1 }
0x1a68   :  { %v2452_v40 = vpop.f32.mrf.mxu0 }
0x1a69   :  { %v2458_v44 = vpack.c.bf16 %v2452_v40, %v2404_v57 }
0x1a6a   :  { %v3972_v5 = vpop.f32.mrf.mxu0 }
0x1a6b   :  { %3977 = vmatmul.mubr.msk.bf16.vlgmr.msra.gmra.mxu1 %vm231_vm2, %v2458_v44 }
0x1a6c   :  { %3987 = vmatpush3.bf16.xpose.msra.mxu1 %v2620_v48  ;;  %v2455_v7 = vpop.f32.mrf.mxu0  ;;  %3988 = vmatprep.mubr.msk.bf16.mxu1 %vm4320_vm1, %v4319_v61  ;;  %v2898_v48 = vmul.f32 %v5052_v63, %v4789_v51 }
0x1a6d   :  { %3998 = vmatprep.subr.bf16.mxu1 %v4319_v61 }
0x1a6e   :  { %v3973_v56 = vpop.f32.mrf.mxu0 }
0x1a70   :  { %v5131_v4 = vpop.f32.mrf.mxu0 }
0x1a72   :  { %v3984_v14 = vpop.f32.mrf.mxu0 }
0x1a73   :  { %3989 = vmatmul.mubr.msk.bf16.vlgmr.msra.gmra.mxu1 %vm231_vm2, %v2612_v27 }
0x1a74   :  { %v5134_v32 = vpop.f32.mrf.mxu0  ;;  %4000 = vmatprep.mubr.msk.bf16.mxu1 %vm4320_vm1, %v4319_v61 }
0x1a76   :  { %v3985_v23 = vpop.f32.mrf.mxu0 }
0x1ada   :  { %v2712_v59 = vpop.f32.mrf.mxu0 }
0x1adb   :  { %v2721_v47 = vsel %vm327_vm3, %v2712_v59, -inf }
0x1adc   :  { %2722 = vmax.xlane.f32.xlu1 %v2721_v47  ;;  %v3996_v29 = vpop.f32.mrf.mxu0  ;;  %v4138_v47 = vld [vmem:[%s5322_s2 + $0x30] sm:$0x3f]  }
0x1add   :  { %v2853_v63 = vsel %vm746_vm5, %v4138_v47, 0 }
0x1ade   :  { %v2715_v33 = vpop.f32.mrf.mxu0 }
0x1ae0   :  { %v3997_v15 = vpop.f32.mrf.mxu0 }
0x1aed   :  { %2792 = vrot.lane.b32.xlu1 %v5141_v30, %s4336_s15 }
0x1af1   :  { %2918 = vrot.lane.b32.xlu1 %v2914_v34, %s4318_s21 }
0x1af5   :  { %2920 = vrot.lane.b32.xlu1 %v2915_v36, %s4318_s21 }
0x1af9   :  { %2906 = vrot.lane.b32.xlu1 %v2901_v9, %s4318_s21 }
0x1b2b   :  { %v5154_v54 = vpop.f32.mrf.mxu1 }
0x1b2d   :  { %v3978_v38 = vpop.f32.mrf.mxu1 }
0x1b2f   :  { %v5156_v42 = vpop.f32.mrf.mxu1 }
0x1b31   :  { %v3979_v60 = vpop.f32.mrf.mxu1 }
0x1b33   :  { %v2656_v6 = vpop.f32.mrf.mxu1 }
0x1b34   :  { %v2718_v46 = vsel %vm327_vm3, %v2656_v6, -inf }
0x1b35   :  { %2719 = vmax.xlane.f32.xlu0 %v2718_v46  ;;  %v3990_v28 = vpop.f32.mrf.mxu1 }
0x1b37   :  { %v2659_v58 = vpop.f32.mrf.mxu1 }
0x1b39   :  { %v3991_v26 = vpop.f32.mrf.mxu1 }
0x1b65   :  { %v2723_v21 = vpop.xlane.xlu1 %2722 }
0x1b66   :  { %v2725_v31 = vsub.f32 %v2712_v59, %v2723_v21 }
0x1b68   :  { %v2728_v53 = vmul.f32 1.442695, %v2725_v31 }
0x1b69   :  { %v2793_v12 = vpop.permute.xlu1 %2792 }
0x1b6a   :  { %4229 = vpow2.f32 %v2728_v53  ;;  %v2798_v1 = vsel %vm358_vm4, %v2793_v12, 0 }
0x1b6b   :  { %4005 = vmatpush3.bf16.msra.mxu0 %v2798_v1 }
0x1b6c   :  { %4016 = vmatprep.subr.bf16.mxu0 %v4319_v61 }
0x1b6d   :  { %v2919_v19 = vpop.permute.xlu1 %2918 }
0x1b6e   :  { %v2924_v2 = vadd.f32 %v2919_v19, %v2912_v13 }
0x1b70   :  { %v2928_v57 = vpack.c.bf16 %v2924_v2, %v2924_v2  ;;  %v2560_v2 = vadd.f32 %v5131_v4, %v5154_v54 }
0x1b71   :  { %v2921_v8 = vpop.permute.xlu1 %2920 }
0x1b72   :  { %v2925_v18 = vadd.f32 %v2921_v8, %v2913_v11 }
0x1b74   :  { %v2929_v39 = vpack.c.bf16 %v2925_v18, %v2925_v18 }
0x1b75   :  { %v2907_v10 = vpop.permute.xlu1 %2906 }
0x1b76   :  { %v2911_v3 = vadd.f32 %v2907_v10, %v2899_v17  ;;  %2986 = vrot.lane.b32.xlu1 %v2929_v39, %s4339_s18  ;;  %v2563_v39 = vadd.f32 %v5134_v32, %v5156_v42 }
0x1b77   :  { %v4230_v55 = vpop.eup %4229 }
0x1b78   :  { %v2927_v62 = vpack.c.bf16 %v2911_v3, %v2911_v3  ;;  %v2733_v37 = vsel %vm327_vm3, %v4230_v55, 0.0 }
0x1b79   :  { %2734 = vadd.xlane.f32.xlu0 %v2733_v37 }
0x1b7a   :  { %2983 = vrot.lane.b32.xlu1 %v2927_v62, %s4338_s17 }
0x1bbe   :  { %v2720_v27 = vpop.xlane.xlu0 %2719 }
0x1bbf   :  { %v2724_v41 = vsub.f32 %v2656_v6, %v2720_v27 }
0x1bc1   :  { %v2726_v16 = vmul.f32 1.442695, %v2724_v41 }
0x1bc3   :  { %4231 = vpow2.f32 %v2726_v16 }
0x1bd0   :  { %v4232_v45 = vpop.eup %4231 }
0x1bd1   :  { %v2730_v24 = vsel %vm327_vm3, %v4232_v45, 0.0 }
0x1bd2   :  { %2731 = vadd.xlane.f32.xlu0 %v2730_v24 }
0x1be8   :  { %2743 = vrot.lane.b32.xlu0 %v5173_v25, %s4336_s15  ;;  %v2987_v60 = vpop.permute.xlu1 %2986 }
0x1be9   :  { %v2992_v58 = vsel %vm231_vm2, %v2987_v60, 0  ;;  %v3214_v60 = vld [vmem:[#allocation2 + $0xa8] sm:$0xff] }
0x1bec   :  { %2904 = vrot.lane.b32.xlu0 %v2900_v49, %s4318_s21  ;;  %v2984_v31 = vpop.permute.xlu1 %2983 }
0x1bf0   :  { %2934 = vrot.lane.b32.xlu0 %v2928_v57, %s4339_s18 }
0x1c02   :  { %v2735_v20 = vpop.xlane.xlu0 %2734 }
0x1c03   :  { %4233 = vrcp.f32 %v2735_v20 }
0x1c10   :  { %v4234_v0 = vpop.eup %4233 }
0x1c11   :  { %v2739_v50 = vmul.f32 %v4234_v0, %v4230_v55 }
0x1c13   :  { %v2741_v40 = vpack.c.bf16 %v2739_v50, %v2739_v50 }
0x1c15   :  { %4007 = vmatmul.mubr.msk.bf16.vlgmr.msra.gmra.mxu0 %vm327_vm3, %v2741_v40 }
0x1c16   :  { %4018 = vmatprep.mubr.msk.bf16.mxu0 %vm4320_vm1, %v4319_v61 }
0x1c5b   :  { %v2732_v44 = vpop.xlane.xlu0 %2731 }
0x1c5c   :  { %4235 = vrcp.f32 %v2732_v44 }
0x1c5f   :  { %v2744_v5 = vpop.permute.xlu0 %2743 }
0x1c60   :  { %v2749_v35 = vsel %vm358_vm4, %v2744_v5, 0 }
0x1c61   :  { %3999 = vmatpush3.bf16.msra.mxu1 %v2749_v35 }
0x1c62   :  { %4010 = vmatprep.subr.bf16.mxu1 %v4319_v61 }
0x1c63   :  { %v2905_v7 = vpop.permute.xlu0 %2904 }
0x1c64   :  { %v2910_v56 = vadd.f32 %v2905_v7, %v2898_v48 }
0x1c66   :  { %v2926_v14 = vpack.c.bf16 %v2910_v56, %v2910_v56 }
0x1c67   :  { %v2935_v23 = vpop.permute.xlu0 %2934 }
0x1c68   :  { %v2940_v59 = vsel %vm231_vm2, %v2935_v23, 0  ;;  %2931 = vrot.lane.b32.xlu0 %v2926_v14, %s4338_s17  ;;  %v4139_v23 = vld [vmem:[%s5322_s2 + $0x38] sm:$0x3f]  }
0x1c69   :  { %v4236_v29 = vpop.eup %4235  ;;  %4017 = vmatpush3.bf16.xpose.msra.mxu0 %v2940_v59  ;;  %v3167_v59 = vsel %vm746_vm5, %v4139_v23, 0 }
0x1c6a   :  { %v2738_v33 = vmul.f32 %v4236_v29, %v4232_v45  ;;  %4028 = vmatprep.subr.bf16.mxu0 %v4319_v61 }
0x1c6c   :  { %v2740_v51 = vpack.c.bf16 %v2738_v33, %v2738_v33 }
0x1c6e   :  { %4001 = vmatmul.mubr.msk.bf16.vlgmr.msra.gmra.mxu1 %vm327_vm3, %v2740_v51 }
0x1c6f   :  { %4011 = vmatpush3.bf16.msra.mxu1 %v2853_v63  ;;  %4012 = vmatprep.mubr.msk.bf16.mxu1 %vm4320_vm1, %v4319_v61 }
0x1c70   :  { %4022 = vmatprep.subr.bf16.mxu1 %v4319_v61 }
0x1cd5   :  { %v2834_v15 = vpop.f32.mrf.mxu0 }
0x1cd7   :  { %v4008_v34 = vpop.f32.mrf.mxu0 }
0x1cd9   :  { %v2837_v36 = vpop.f32.mrf.mxu0 }
0x1cda   :  { %v2932_v9 = vpop.permute.xlu0 %2931 }
0x1cdb   :  { %v4009_v38 = vpop.f32.mrf.mxu0  ;;  %4019 = vmatmul.mubr.msk.bf16.vlgmr.msra.gmra.mxu0 %vm231_vm2, %v2932_v9 }
0x1cdc   :  { %4030 = vmatprep.mubr.msk.bf16.mxu0 %vm4320_vm1, %v4319_v61 }
0x1d2e   :  { %v2785_v6 = vpop.f32.mrf.mxu1 }
0x1d2f   :  { %v2840_v46 = vpack.c.bf16 %v2834_v15, %v2785_v6 }
0x1d30   :  { %v4002_v28 = vpop.f32.mrf.mxu1 }
0x1d31   :  { %4013 = vmatmul.mubr.msk.bf16.vlgmr.msra.gmra.mxu1 %vm231_vm2, %v2840_v46 }
0x1d32   :  { %4023 = vmatpush3.bf16.xpose.msra.mxu1 %v2992_v58  ;;  %v2788_v26 = vpop.f32.mrf.mxu1  ;;  %4024 = vmatprep.mubr.msk.bf16.mxu1 %vm4320_vm1, %v4319_v61 }
0x1d33   :  { %4034 = vmatprep.subr.bf16.mxu1 %v4319_v61 }
0x1d34   :  { %v4003_v21 = vpop.f32.mrf.mxu1 }
0x1d35   :  { %v3215_v21 = vld [vmem:[#allocation2 + $0x190] sm:$0xff] }
0x1d39   :  { %4025 = vmatmul.mubr.msk.bf16.vlgmr.msra.gmra.mxu1 %vm231_vm2, %v2984_v31 }
0x1d3a   :  { %4036 = vmatprep.mubr.msk.bf16.mxu1 %vm4320_vm1, %v4319_v61 }
0x1d9b   :  { %v2976_v53 = vpop.f32.mrf.mxu0 }
0x1d9c   :  { %v3034_v12 = vsel %vm327_vm3, %v2976_v53, -inf }
0x1d9d   :  { %3035 = vmax.xlane.f32.xlu0 %v3034_v12  ;;  %v4020_v1 = vpop.f32.mrf.mxu0 }
0x1d9f   :  { %v2979_v13 = vpop.f32.mrf.mxu0 }
0x1da1   :  { %v4021_v19 = vpop.f32.mrf.mxu0 }
0x1df1   :  { %v2889_v11 = vpop.f32.mrf.mxu1 }
0x1df2   :  { %v5213_v8 = vadd.f32 %v2889_v11, %v2560_v2 }
0x1df3   :  { %v4014_v18 = vpop.f32.mrf.mxu1 }
0x1df5   :  { %v2892_v17 = vpop.f32.mrf.mxu1 }
0x1df6   :  { %v5217_v10 = vadd.f32 %v2892_v17, %v2563_v39 }
0x1df7   :  { %v4015_v3 = vpop.f32.mrf.mxu1 }
0x1df8   :  { %v4140_v3 = vld [vmem:[%s5323_s3 + $0x50] ss:$8 sps:$4 sm:$0xff]  }
0x1df9   :  { %v3028_v55 = vpop.f32.mrf.mxu1 }
0x1dfa   :  { %v3037_v62 = vsel %vm327_vm3, %v3028_v55, -inf }
0x1dfb   :  { %3038 = vmax.xlane.f32.xlu1 %v3037_v62  ;;  %v4026_v37 = vpop.f32.mrf.mxu1  ;;  %v4145_v62 = vld [vmem:[%s5323_s3 + $0x44] ss:$8 sps:$4 sm:$0xff]  }
0x1dfc   :  { %v4143_v37 = vld [vmem:[%s5323_s3 + $0x40] ss:$8 sps:$4 sm:$0xff]  }
0x1dfd   :  { %v3031_v27 = vpop.f32.mrf.mxu1 }
0x1dfe   :  { %v4148_v27 = vld [vmem:[%s5323_s3 + $0x34] ss:$8 sps:$4 sm:$0xff]  }
0x1dff   :  { %v4027_v41 = vpop.f32.mrf.mxu1 }
0x1e00   :  { %v4146_v41 = vld [vmem:[%s5323_s3 + $0x30] ss:$8 sps:$4 sm:$0xff]  }
0x1e0c   :  { %3106 = vrot.lane.b32.xlu1 %v5141_v30, %s4330_s7 }
0x1e26   :  { %v3036_v4 = vpop.xlane.xlu0 %3035 }
0x1e27   :  { %v3040_v54 = vsub.f32 %v2976_v53, %v3036_v4 }
0x1e29   :  { %v3042_v16 = vmul.f32 1.442695, %v3040_v54 }
0x1e2b   :  { %4237 = vpow2.f32 %v3042_v16 }
0x1e38   :  { %v4238_v45 = vpop.eup %4237 }
0x1e39   :  { %v3046_v32 = vsel %vm327_vm3, %v4238_v45, 0.0 }
0x1e3a   :  { %3047 = vadd.xlane.f32.xlu0 %v3046_v32 }
0x1e84   :  { %v3039_v42 = vpop.xlane.xlu1 %3038 }
0x1e85   :  { %v3041_v24 = vsub.f32 %v3028_v55, %v3039_v42  ;;  %v4142_v55 = vld [vmem:[%s5323_s3 + $0x54] ss:$8 sps:$4 sm:$0xff]  }
0x1e87   :  { %v3044_v49 = vmul.f32 1.442695, %v3041_v24 }
0x1e88   :  { %v3107_v57 = vpop.permute.xlu1 %3106 }
0x1e89   :  { %4239 = vpow2.f32 %v3044_v49  ;;  %v3112_v20 = vsel %vm358_vm4, %v3107_v57, 0  ;;  %v3218_v57 = vld [vmem:[#allocation2 + $0xb0] sm:$0xff] }
0x1e8a   :  { %4035 = vmatpush3.bf16.msra.mxu1 %v3112_v20 }
0x1e8b   :  { %3307 = vmatprep.subr.bf16.mxu1 %v4142_v55  ;;  %v4154_v55 = vld [vmem:[%s5324_s4 + $0x50] sm:$0xff]  }
0x1e96   :  { %v4240_v0 = vpop.eup %4239 }
0x1e97   :  { %v3049_v50 = vsel %vm327_vm3, %v4240_v0, 0.0 }
0x1e98   :  { %3050 = vadd.xlane.f32.xlu0 %v3049_v50 }
0x1eae   :  { %3058 = vrot.lane.b32.xlu0 %v5173_v25, %s4330_s7 }
0x1ec3   :  { %v3048_v30 = vpop.xlane.xlu0 %3047 }
0x1ec4   :  { %4241 = vrcp.f32 %v3048_v30 }
0x1ed1   :  { %v4242_v40 = vpop.eup %4241 }
0x1ed2   :  { %v3054_v5 = vmul.f32 %v4242_v40, %v4238_v45  ;;  %v3220_v40 = vld [vmem:[#allocation2 + $0xb8] sm:$0xff] }
0x1ed4   :  { %v3056_v7 = vpack.c.bf16 %v3054_v5, %v3054_v5 }
0x1f21   :  { %v3051_v44 = vpop.xlane.xlu0 %3050 }
0x1f22   :  { %4243 = vrcp.f32 %v3051_v44  ;;  %v3221_v44 = vld [vmem:[#allocation2 + $0x1a0] sm:$0xff] }
0x1f25   :  { %v3059_v35 = vpop.permute.xlu0 %3058 }
0x1f26   :  { %v3064_v48 = vsel %vm358_vm4, %v3059_v35, 0 }
0x1f27   :  { %4029 = vmatpush3.bf16.msra.mxu0 %v3064_v48 }
0x1f28   :  { %4040 = vmatprep.subr.bf16.mxu0 %v4319_v61 }
0x1f2a   :  { %4031 = vmatmul.mubr.msk.bf16.vlgmr.msra.gmra.mxu0 %vm327_vm3, %v3056_v7 }
0x1f2b   :  { %4042 = vmatprep.mubr.msk.bf16.mxu0 %vm4320_vm1, %v4319_v61  ;;  %4041 = vmatpush3.bf16.msra.mxu0 %v3167_v59  ;;  %v3262_v59 = vld [vmem:[#allocation2 + $0x1a8] sm:$0xff] }
0x1f2c   :  { %4046 = vmatprep.subr.bf16.mxu0 %v4319_v61 }
0x1f2f   :  { %v4244_v56 = vpop.eup %4243 }
0x1f30   :  { %v3055_v25 = vmul.f32 %v4244_v56, %v4240_v0  ;;  %v3219_v0 = vld [vmem:[#allocation2 + $0x198] sm:$0xff]  ;;  %v3260_v56 = vld [vmem:[#allocation2 + $0xc0] sm:$0xff] }
0x1f32   :  { %v3057_v14 = vpack.c.bf16 %v3055_v25, %v3055_v25 }
0x1f34   :  { %4037 = vmatmul.mubr.msk.bf16.vlgmr.msra.gmra.mxu1 %vm327_vm3, %v3057_v14 }
0x1f35   :  { %3329 = vmatprep.mubr.bf16.mxu1 %v4314_v22  ;;  %3308 = vmatpush1.bf16.msra.mxu1 %v4140_v3  ;;  %v4153_v3 = vld [vmem:[%s5324_s4 + $0x58] sm:$0xff]  }
0x1f36   :  { %3309 = vmatprep.subr.bf16.mxu1 %v4145_v62  ;;  %v4155_v62 = vld [vmem:[%s5324_s4 + $0x48] sm:$0xff]  }
0x1f39   :  { %3310 = vmatpush1.bf16.msra.mxu1 %v4143_v37  ;;  %v4156_v37 = vld [vmem:[%s5324_s4 + $0x40] sm:$0xff]  }
0x1f3a   :  { %3311 = vmatprep.subr.bf16.mxu1 %v4148_v27 }
0x1f3d   :  { %3312 = vmatpush1.bf16.msra.mxu1 %v4146_v41 }
0x1fea   :  { %v3100_v47 = vpop.f32.mrf.mxu0 }
0x1fec   :  { %v4032_v29 = vpop.f32.mrf.mxu0 }
0x1fee   :  { %v3103_v33 = vpop.f32.mrf.mxu0 }
0x1ff0   :  { %v4033_v51 = vpop.f32.mrf.mxu0 }
0x1ff4   :  { %v3148_v63 = vpop.f32.mrf.mxu1 }
0x1ff5   :  { %v3154_v15 = vpack.c.bf16 %v3148_v63, %v3100_v47 }
0x1ff6   :  { %v4038_v34 = vpop.f32.mrf.mxu1 }
0x1ff7   :  { %4043 = vmatmul.mubr.msk.bf16.vlgmr.msra.gmra.mxu0 %vm231_vm2, %v3154_v15 }
0x1ff8   :  { %v3151_v36 = vpop.f32.mrf.mxu1  ;;  %4062 = vmatprep.mubr.msk.bf16.mxu0 %vm4320_vm1, %v4319_v61 }
0x1ffa   :  { %v4039_v22 = vpop.f32.mrf.mxu1 }
0x1ffb   :  { %v3261_v22 = vld [vmem:[#allocation2 + $0xc8] sm:$0xff] }
0x20b7   :  { %v3203_v9 = vpop.f32.mrf.mxu0 }
0x20b8   :  { %v3210_v38 = vadd.f32 %v3203_v9, %v5213_v8 }
0x20b9   :  { %v4044_v6 = vpop.f32.mrf.mxu0 }
0x20ba   :  { %v3212_v46 = vadd.f32 %v3210_v38, %v4910_v43  ;;  %v3263_v6 = vld [vmem:[#allocation2 + $0x1b0] sm:$0xff] }
0x20bb   :  { %v3206_v28 = vpop.f32.mrf.mxu0 }
0x20bc   :  { %v5244_v58 = vadd.f32 %v3214_v60, %v3212_v46  ;;  %v3211_v26 = vadd.f32 %v3206_v28, %v5217_v10 }
0x20bd   :  { %v4045_v31 = vpop.f32.mrf.mxu0 }
0x20be   :  { %v3213_v53 = vadd.f32 %v3211_v26, %v4915_v52  ;;  %v3222_v12 = vsel %vm53_vm0, %v5244_v58, 0.0 }
0x20bf   :  { %3223 = vadd.xlane.f32.xlu1 %v3222_v12  ;;  %v4149_v12 = vld [vmem:[%s5324_s4 + $0x78] sm:$0xff]  }
0x20c0   :  { %v5250_v1 = vadd.f32 %v3215_v21, %v3213_v53  ;;  %4047 = vmatpush3.bf16.msra.mxu0 %v4149_v12  ;;  %v3497_v12 = vld [vmem:[#allocation2 + $0x18] sm:$0xff] }
0x20c1   :  { %4048 = vmatprep.subr.bf16.mxu0 %v4319_v61 }
0x20c2   :  { %v3225_v13 = vsel %vm53_vm0, %v5250_v1, 0.0 }
0x20c3   :  { %3226 = vadd.xlane.f32.xlu0 %v3225_v13 }
0x2148   :  { %v3224_v43 = vpop.xlane.xlu1 %3223 }
0x2149   :  { %v3228_v19 = vmul.f32 0.020833334, %v3224_v43 }
0x214b   :  { %v3230_v2 = vsub.f32 %v5244_v58, %v3228_v19 }
0x214c   :  { %v3227_v11 = vpop.xlane.xlu0 %3226 }
0x214d   :  { %v3229_v8 = vmul.f32 0.020833334, %v3227_v11  ;;  %v3232_v18 = vmul.f32 %v3230_v2, %v3230_v2 }
0x214f   :  { %v3231_v39 = vsub.f32 %v5250_v1, %v3229_v8  ;;  %v3234_v52 = vsel %vm53_vm0, %v3232_v18, 0.0 }
0x2150   :  { %3235 = vadd.xlane.f32.xlu0 %v3234_v52  ;;  %v4150_v52 = vld [vmem:[%s5324_s4 + $0x70] sm:$0xff]  }
0x2151   :  { %v3233_v17 = vmul.f32 %v3231_v39, %v3231_v39  ;;  %4049 = vmatpush3.bf16.msra.mxu0 %v4150_v52 }
0x2152   :  { %4050 = vmatprep.subr.bf16.mxu0 %v4319_v61 }
0x2153   :  { %v3237_v10 = vsel %vm53_vm0, %v3233_v17, 0.0  ;;  %v4151_v17 = vld [vmem:[%s5324_s4 + $0x68] sm:$0xff]  }
0x2154   :  { %3238 = vadd.xlane.f32.xlu1 %v3237_v10  ;;  %v4152_v10 = vld [vmem:[%s5324_s4 + $0x60] sm:$0xff]   ;;  %s4340_s4 = smov [#allocation5]  }
0x2155   :  { %4051 = vmatpush3.bf16.msra.mxu0 %v4151_v17  ;;  %s3538_s2 = sshll.u32 %s4340_s4, 4  ;;  %s3539_s2 = int_to_ptr.vmem [resolvable:$true] %s3538_s2 }
0x2156   :  { %4052 = vmatprep.subr.bf16.mxu0 %v4319_v61  ;;  %s4287_s9 = scalar_lea.vmem %s3539_s2, 256  ;;  %p4292_p6 = scmp.lt.s32.totalorder %s3539_s2, %s3539_s2 }
0x2157   :  { %p4288_p5 = scmp.ne.s32.totalorder %s3539_s2, %s4287_s9  ;;  %p4293_p7 = scmp.lt.s32.totalorder %s4287_s9, %s4287_s9 }
0x2159   :  { %4053 = vmatpush3.bf16.msra.mxu0 %v4152_v10  ;;  %p4294_p8 = por %p4293_p7, %p4292_p6 }
0x215a   :  { %4054 = vmatprep.subr.bf16.mxu0 %v4319_v61 }
0x215b   :  { %p4295_p9 = pnand %p4294_p8, %p4288_p5 }
0x215d   :  { %4055 = vmatpush3.bf16.msra.mxu0 %v4153_v3 }
0x215e   :  { %4056 = vmatprep.subr.bf16.mxu0 %v4319_v61 }
0x2161   :  { %4057 = vmatpush3.bf16.msra.mxu0 %v4154_v55 }
0x2162   :  { %4058 = vmatprep.subr.bf16.mxu0 %v4319_v61 }
0x2165   :  { %4059 = vmatpush3.bf16.msra.mxu0 %v4155_v62 }
0x2166   :  { %4060 = vmatprep.subr.bf16.mxu0 %v4319_v61 }
0x2169   :  { %4061 = vmatpush3.bf16.msra.mxu0 %v4156_v37 }
0x21d9   :  { %v3236_v4 = vpop.xlane.xlu0 %3235 }
0x21da   :  { %v3240_v54 = vmul.f32 0.020833334, %v3236_v4 }
0x21dc   :  { %v3242_v16 = vadd.f32 1e-05, %v3240_v54 }
0x21dd   :  { %v3239_v45 = vpop.xlane.xlu1 %3238 }
0x21de   :  { %4245 = vrsqrt.f32 %v3242_v16  ;;  %v3241_v32 = vmul.f32 0.020833334, %v3239_v45 }
0x21e0   :  { %v3243_v42 = vadd.f32 1e-05, %v3241_v32 }
0x21e2   :  { %4247 = vrsqrt.f32 %v3243_v42 }
0x21eb   :  { %v4246_v24 = vpop.eup %4245 }
0x21ec   :  { %v3246_v49 = vmul.f32 %v4246_v24, %v3230_v2  ;;  %v3356_v24 = vld [vmem:[#allocation2 + $0xd0] sm:$0xff] }
0x21ee   :  { %v3248_v30 = vmul.f32 %v3246_v49, %v3218_v57  ;;  %v3357_v57 = vld [vmem:[#allocation2 + $0x1b8] sm:$0xff] }
0x21ef   :  { %v4248_v20 = vpop.eup %4247 }
0x21f0   :  { %v3247_v50 = vmul.f32 %v4248_v20, %v3231_v39  ;;  %v3250_v35 = vadd.f32 %v3248_v30, %v3220_v40  ;;  %v3359_v30 = vld [vmem:[#allocation2 + $0x1c0] sm:$0xff] }
0x21f2   :  { %v3249_v5 = vmul.f32 %v3247_v50, %v3219_v0  ;;  %v3358_v50 = vld [vmem:[#allocation2 + $0xd8] sm:$0xff] }
0x21f4   :  { %v3251_v48 = vadd.f32 %v3249_v5, %v3221_v44 }
0x21f6   :  { %v3252_v7 = vpack.c.bf16 %v3251_v48, %v3250_v35  ;;  %v3404_v35 = vld [vmem:[#allocation2 + $0xe0] sm:$0xff] }
0x21f8   :  { %3661 = vmatmul.mubr.msk.bf16.vlgmr.msra.gmra.mxu1 %vm53_vm0, %v3252_v7 }
0x22b8   :  { %v3331_v25 = vpop.f32.mrf.mxu1 }
0x22b9   :  { %v3332_v14 = vadd.f32 %v3331_v25, %v3260_v56  ;;  %v3405_v25 = vld [vmem:[#allocation2 + $0x1c8] sm:$0xff] }
0x22ba   :  { %v3333_v23 = vpop.f32.mrf.mxu1 }
0x22bb   :  { %v3662_v47 = vmul.f32 -1.442695, %v3332_v14  ;;  %v3334_v60 = vadd.f32 %v3333_v23, %v3261_v22 }
0x22bc   :  { %v3335_v29 = vpop.f32.mrf.mxu1 }
0x22bd   :  { %4249 = vpow2.f32 %v3662_v47  ;;  %v3336_v33 = vadd.f32 %v3335_v29, %v3262_v59 }
0x22be   :  { %v3337_v46 = vpop.f32.mrf.mxu1 }
0x22bf   :  { %v3663_v51 = vmul.f32 -1.442695, %v3336_v33  ;;  %v3338_v31 = vadd.f32 %v3337_v46, %v3263_v6 }
0x22c1   :  { %4251 = vpow2.f32 %v3663_v51 }
0x22ca   :  { %v4250_v63 = vpop.eup %4249 }
0x22cb   :  { %v3346_v15 = vadd.f32 1.0, %v4250_v63 }
0x22cd   :  { %4253 = vrcp.f32 %v3346_v15 }
0x22ce   :  { %v4252_v34 = vpop.eup %4251 }
0x22cf   :  { %v3347_v36 = vadd.f32 1.0, %v4252_v34 }
0x22d1   :  { %4255 = vrcp.f32 %v3347_v36 }
0x22da   :  { %v4254_v9 = vpop.eup %4253 }
0x22db   :  { %v3352_v38 = vmul.f32 %v4254_v9, %v3332_v14 }
0x22dd   :  { %v3354_v28 = vmul.f32 %v3352_v38, %v3334_v60 }
0x22de   :  { %v4256_v26 = vpop.eup %4255 }
0x22df   :  { %v3353_v21 = vmul.f32 %v4256_v26, %v3336_v33  ;;  %3360 = vadd.xlane.f32.xlu0 %v3354_v28 }
0x22e1   :  { %v3355_v53 = vmul.f32 %v3353_v21, %v3338_v31 }
0x22e3   :  { %3362 = vadd.xlane.f32.xlu1 %v3355_v53 }
0x2368   :  { %v3361_v13 = vpop.xlane.xlu0 %3360 }
0x2369   :  { %v3364_v43 = vmul.f32 0.0078125, %v3361_v13 }
0x236b   :  { %v3366_v19 = vsub.f32 %v3354_v28, %v3364_v43  ;;  %v3499_v43 = vld [vmem:[#allocation2 + $0x20] sm:$0xff] }
0x236c   :  { %v3363_v2 = vpop.xlane.xlu1 %3362 }
0x236d   :  { %v3365_v11 = vmul.f32 0.0078125, %v3363_v2  ;;  %v3368_v8 = vmul.f32 %v3366_v19, %v3366_v19 }
0x236f   :  { %v3367_v18 = vsub.f32 %v3355_v53, %v3365_v11  ;;  %3370 = vadd.xlane.f32.xlu0 %v3368_v8  ;;  %v3498_v11 = vld [vmem:[#allocation2 + $0x100] sm:$0xff] }
0x2371   :  { %v3369_v39 = vmul.f32 %v3367_v18, %v3367_v18 }
0x2373   :  { %3372 = vadd.xlane.f32.xlu1 %v3369_v39  ;;  %v3500_v39 = vld [vmem:[#allocation2 + $0x108] sm:$0xff] }
0x23f8   :  { %v3371_v27 = vpop.xlane.xlu0 %3370 }
0x23f9   :  { %v3374_v41 = vmul.f32 0.0078125, %v3371_v27 }
0x23fb   :  { %v3376_v4 = vadd.f32 1e-05, %v3374_v41 }
0x23fc   :  { %v3373_v54 = vpop.xlane.xlu1 %3372 }
0x23fd   :  { %4257 = vrsqrt.f32 %v3376_v4  ;;  %v3375_v16 = vmul.f32 0.0078125, %v3373_v54 }
0x23ff   :  { %v3377_v45 = vadd.f32 1e-05, %v3375_v16 }
0x2401   :  { %4259 = vrsqrt.f32 %v3377_v45 }
0x240a   :  { %v4258_v32 = vpop.eup %4257 }
0x240b   :  { %v3380_v42 = vmul.f32 %v4258_v32, %v3366_v19 }
0x240d   :  { %v3382_v0 = vmul.f32 %v3380_v42, %v3356_v24 }
0x240e   :  { %v4260_v49 = vpop.eup %4259 }
0x240f   :  { %v3381_v20 = vmul.f32 %v4260_v49, %v3367_v18  ;;  %v3384_v61 = vadd.f32 %v3382_v0, %v3358_v50 }
0x2411   :  { %v3383_v40 = vmul.f32 %v3381_v20, %v3357_v57 }
0x2413   :  { %v3385_v44 = vadd.f32 %v3383_v40, %v3359_v30 }
0x2415   :  { %v3386_v5 = vpack.c.bf16 %v3385_v44, %v3384_v61 }
0x2417   :  { %4063 = vmatmul.mubr.bf16.vlgmr.msra.gmra.mxu0 %v3386_v5 }
0x24d7   :  { %v3488_v48 = vpop.f32.mrf.mxu0 }
0x24d8   :  { %v3489_v7 = vadd.f32 %v3488_v48, %v3404_v35 }
0x24d9   :  { %v4064_v56 = vpop.f32.mrf.mxu0 }
0x24da   :  { %v3495_v14 = vadd.f32 %v3489_v7, %v5244_v58 }
0x24db   :  { %v3491_v23 = vpop.f32.mrf.mxu0 }
0x24dc   :  { %v3492_v59 = vadd.f32 %v3491_v23, %v3405_v25  ;;  %v3501_v47 = vsel %vm53_vm0, %v3495_v14, 0.0 }
0x24dd   :  { %3502 = vadd.xlane.f32.xlu0 %v3501_v47  ;;  %v4065_v29 = vpop.f32.mrf.mxu0 }
0x24de   :  { %v3496_v33 = vadd.f32 %v3492_v59, %v5250_v1 }
0x24e0   :  { %v3504_v51 = vsel %vm53_vm0, %v3496_v33, 0.0 }
0x24e1   :  { %3505 = vadd.xlane.f32.xlu1 %v3504_v51 }
0x2566   :  { %v3503_v63 = vpop.xlane.xlu0 %3502 }
0x2567   :  { %v3507_v15 = vmul.f32 0.020833334, %v3503_v63 }
0x2569   :  { %v3509_v34 = vsub.f32 %v3495_v14, %v3507_v15 }
0x256a   :  { %v3506_v36 = vpop.xlane.xlu1 %3505 }
0x256b   :  { %v3508_v22 = vmul.f32 0.020833334, %v3506_v36  ;;  %v3511_v9 = vmul.f32 %v3509_v34, %v3509_v34 }
0x256d   :  { %v3510_v38 = vsub.f32 %v3496_v33, %v3508_v22  ;;  %v3513_v58 = vsel %vm53_vm0, %v3511_v9, 0.0 }
0x256e   :  { %3514 = vadd.xlane.f32.xlu0 %v3513_v58 }
0x256f   :  { %v3512_v60 = vmul.f32 %v3510_v38, %v3510_v38 }
0x2571   :  { %v3516_v6 = vsel %vm53_vm0, %v3512_v60, 0.0 }
0x2572   :  { %3517 = vadd.xlane.f32.xlu1 %v3516_v6 }
0x25f7   :  { %v3515_v46 = vpop.xlane.xlu0 %3514 }
0x25f8   :  { %v3519_v28 = vmul.f32 0.020833334, %v3515_v46 }
0x25fa   :  { %v3521_v1 = vadd.f32 1e-05, %v3519_v28 }
0x25fb   :  { %v3518_v26 = vpop.xlane.xlu1 %3517 }
0x25fc   :  { %4261 = vrsqrt.f32 %v3521_v1  ;;  %v3520_v21 = vmul.f32 0.020833334, %v3518_v26 }
0x25fe   :  { %v3522_v31 = vadd.f32 1e-05, %v3520_v21 }
0x2600   :  { %4263 = vrsqrt.f32 %v3522_v31 }
0x2609   :  { %v4262_v53 = vpop.eup %4261 }
0x260a   :  { %v3525_v13 = vmul.f32 %v4262_v53, %v3509_v34 }
0x260c   :  { %v3527_v19 = vmul.f32 %v3525_v13, %v3497_v12 }
0x260d   :  { %v4264_v2 = vpop.eup %4263 }
0x260e   :  { %v3526_v8 = vmul.f32 %v4264_v2, %v3510_v38  ;;  %v3529_v18 = vadd.f32 %v3527_v19, %v3499_v43 }
0x2610   :  { %v3528_v52 = vmul.f32 %v3526_v8, %v3498_v11  ;;  %3531 = vst.msk [vmem:[#allocation5] sm:$0xff] %vm53_vm0, %v3529_v18 }
0x2612   :  { %v3530_v17 = vadd.f32 %v3528_v52, %v3500_v39 }
0x2614   :  { %3532 = vst.msk [vmem:[#allocation5 + $0x8] sm:$0xff] %vm53_vm0, %v3530_v17 }
0x2615   :  { %4298 = shalt.err (!%p4295_p9)
}
0x2616   :  { %s4341_s15 = smov 128  }
0x2617   :  { %3544 = dma.vmem_to_hbm [thread:$0]  %s3539_s2, 256, %s5326_s6, [#allocation4], %s4341_s15, %s4341_s15, %s4335_s14  }
0x2618   :  { %4309 = dma.done.wait [#allocation4], 256  }
0x2619   :  { %4310 = vsyncadd [#allocation4], 4294967040 }
0x261a   :  { %3548 = vsyncpa [#allocation3], 1 }
0x261b   :  { %3549 = vsyncpa [#allocation4], 1 }

</bundles_post_ra>
